<compile_context>
chip_gen: v7x
topology: tpu7x:2x2x1
jax: 0.10.0
libtpu: 0.0.40
codegen_flags: <defaults>
</compile_context>

<pallas_src>
import functools

import jax
import jax.numpy as jnp
from jax.experimental import pallas as pl
from jax.experimental.pallas import tpu as pltpu


# ----------------------------- Pallas kernels ------------------------------ #

def _rcu_fused_kernel(xcat_ref, ypat_ref, xorig_ref,
                      wconv_ref, bconv_ref, w132_ref, b132_ref,
                      wq1t_ref, bq1_ref, wk1_ref, bk1_ref,
                      wq2t_ref, bq2_ref, wk2_ref, bk2_ref,
                      wq3_ref, bq3_ref, wk3_ref, bk3_ref,
                      w6a_ref, w6b_ref, b6_ref,
                      xout_ref):
    f32 = jnp.float32
    bf16 = jnp.bfloat16

    def mm(a, b):                       # bf16 MXU operands, fp32 accumulation
        return jnp.dot(a.astype(bf16), b.astype(bf16), preferred_element_type=f32)

    xcat = xcat_ref[0]                  # ((C+group)*9, HW) im2col of interleaved concat
    ypat = ypat_ref[0]                  # (9, HW)           im2col of y
    x_in = xorig_ref[0].astype(f32)     # (C, HW)           residual source

    # conv: 3x3 (channel+group -> channel) + ReLU, as im2col matmul
    x1 = jnp.maximum(mm(wconv_ref[...], xcat) + bconv_ref[...], 0.0)   # (32, HW)
    # conv1_32: 3x3 (1 -> 32) on y
    x2 = mm(w132_ref[...], ypat) + b132_ref[...]                       # (32, HW)

    x1t = x1.T                          # (HW, 32) fp32 transpose (XLU, cheap)

    # 1x1 query/key convs (query1/2 produced directly in transposed form)
    q1t = mm(x1t, wq1t_ref[...]) + bq1_ref[...]      # (HW, 32) == query_conv1(x1)^T
    q2t = mm(x1t, wq2t_ref[...]) + bq2_ref[...]      # (HW, 32) == query_conv2(x1)^T
    k1 = mm(wk1_ref[...], x1) + bk1_ref[...]         # (32, HW)
    k2 = mm(wk2_ref[...], x1) + bk2_ref[...]         # (32, HW)
    yq = mm(wq3_ref[...], x2) + bq3_ref[...]         # (32, HW)
    yk = mm(wk3_ref[...], x2) + bk3_ref[...]         # (32, HW)

    # spatial attention:  x_hw = softmax_{-1}( query1^T @ key2 )   (HW, HW)
    s_hw = mm(q1t, k2)
    s_hw = s_hw - jnp.max(s_hw, axis=-1, keepdims=True)
    e_hw = jnp.exp(s_hw)
    a_hw = e_hw * pl.reciprocal(jnp.sum(e_hw, axis=-1, keepdims=True), approx=True)

    # channel attention:  x_c = softmax_{-1}( key1 @ query2^T )    (32, 32)
    s_c = mm(k1, q2t)
    s_c = s_c - jnp.max(s_c, axis=-1, keepdims=True)
    e_c = jnp.exp(s_c)
    a_c = e_c * pl.reciprocal(jnp.sum(e_c, axis=-1, keepdims=True), approx=True)

    xy_hw = mm(yq, a_hw)                             # (32, HW) == y_query @ x_hw
    xy_c = mm(a_c.T, yk)                             # (32, HW) == x_c^T @ y_key

    # conv6 (1x1, 64 -> 32) on concat([xy_hw, xy_c]) as a split matmul (no concat)
    out = mm(w6a_ref[...], xy_hw) + mm(w6b_ref[...], xy_c) + b6_ref[...]
    xout_ref[0] = (x_in + out).astype(xout_ref.dtype)


def _score_residual_kernel(xpat_ref, y_ref, ws_ref, bs_ref, yout_ref):
    # y_out = y + score(x_out): 3x3 conv (channel -> 1) as im2col matmul + residual
    s = jnp.dot(ws_ref[...].astype(jnp.bfloat16), xpat_ref[0].astype(jnp.bfloat16),
                preferred_element_type=jnp.float32)                     # (1, HW)
    yout_ref[0] = (y_ref[0].astype(jnp.float32) + s + bs_ref[...]).astype(yout_ref.dtype)


# ------------------------------ plain-JAX glue ------------------------------ #

def _interleave_concat(x, y, group):
    # torch.chunk(x, group, dim=1) interleaved with y -> (B, channel+group, H, W)
    B, C, H, W = x.shape
    sub = C // group
    pieces = []
    for g in range(group):
        pieces.append(x[:, g * sub:(g + 1) * sub])
        pieces.append(y)
    return jnp.concatenate(pieces, axis=1)


def _im2col3x3(x):
    # (B, C, H, W) -> (B, C*9, H*W); 3x3 window, zero padding 1, order (c, ky, kx)
    B, C, H, W = x.shape
    xp = jnp.pad(x, ((0, 0), (0, 0), (1, 1), (1, 1)))
    slabs = [xp[:, :, ky:ky + H, kx:kx + W] for ky in range(3) for kx in range(3)]
    pat = jnp.stack(slabs, axis=2)                   # (B, C, 9, H, W)
    return pat.reshape(B, C * 9, H * W)


# ------------------------------- parameters --------------------------------- #

def _conv_init(kw, kb, cout, cin, ksz):
    # PyTorch Conv2d default-ish init: uniform(+-1/sqrt(fan_in))
    fan_in = cin * ksz * ksz
    bound = 1.0 / (fan_in ** 0.5)
    w = jax.random.uniform(kw, (cout, cin, ksz, ksz), jnp.float32, -bound, bound)
    b = jax.random.uniform(kb, (cout,), jnp.float32, -bound, bound)
    return w, b


def init_params(key, channel=32, subchannel=16):
    assert channel == 32, "RCU's attention convs are hard-wired to 32 channels"
    group = channel // subchannel
    it = iter(jax.random.split(key, 20))
    p = {}
    p["conv_w"], p["conv_b"] = _conv_init(next(it), next(it), channel, channel + group, 3)
    p["score_w"], p["score_b"] = _conv_init(next(it), next(it), 1, channel, 3)
    p["conv1_32_w"], p["conv1_32_b"] = _conv_init(next(it), next(it), 32, 1, 3)
    for name in ("q1", "k1", "q2", "k2", "q3", "k3"):
        w, b = _conv_init(next(it), next(it), 32, 32, 1)
        p[name + "_w"], p[name + "_b"] = w.reshape(32, 32), b
    w6, b6 = _conv_init(next(it), next(it), 32, 64, 1)
    p["conv6_w"], p["conv6_b"] = w6.reshape(32, 64), b6
    return p


# --------------------------------- forward ---------------------------------- #

def rcu_forward(params, x, y, *, group):
    B, C, H, W = x.shape
    HW = H * W
    bf16 = jnp.bfloat16

    # glue: interleaved channel concat + im2col for the 3x3 convs
    xcat_pat = _im2col3x3(_interleave_concat(x, y, group))   # (B, (C+group)*9, HW)
    y_pat = _im2col3x3(y)                                    # (B, 9, HW)
    x_flat = x.reshape(B, C, HW)
    K1 = xcat_pat.shape[1]

    # weights in kernel layout (matmul operands pre-cast to bf16, biases fp32)
    wconv = params["conv_w"].reshape(C, K1).astype(bf16)
    bconv = params["conv_b"].reshape(C, 1)
    w132 = params["conv1_32_w"].reshape(32, 9).astype(bf16)
    b132 = params["conv1_32_b"].reshape(32, 1)
    wq1t = params["q1_w"].T.astype(bf16); bq1 = params["q1_b"].reshape(1, 32)
    wq2t = params["q2_w"].T.astype(bf16); bq2 = params["q2_b"].reshape(1, 32)
    wk1 = params["k1_w"].astype(bf16); bk1 = params["k1_b"].reshape(32, 1)
    wk2 = params["k2_w"].astype(bf16); bk2 = params["k2_b"].reshape(32, 1)
    wq3 = params["q3_w"].astype(bf16); bq3 = params["q3_b"].reshape(32, 1)
    wk3 = params["k3_w"].astype(bf16); bk3 = params["k3_b"].reshape(32, 1)
    w6a = params["conv6_w"][:, :32].astype(bf16)
    w6b = params["conv6_w"][:, 32:].astype(bf16)
    b6 = params["conv6_b"].reshape(32, 1)

    weights = (wconv, bconv, w132, b132,
               wq1t, bq1, wk1, bk1, wq2t, bq2, wk2, bk2,
               wq3, bq3, wk3, bk3, w6a, w6b, b6)

    x_out_flat = pl.pallas_call(
        _rcu_fused_kernel,
        out_shape=jax.ShapeDtypeStruct((B, C, HW), x.dtype),
        grid_spec=pltpu.PrefetchScalarGridSpec(
            num_scalar_prefetch=0,
            grid=(B,),
            in_specs=[
                pl.BlockSpec((1, K1, HW), lambda b: (b, 0, 0)),
                pl.BlockSpec((1, 9, HW), lambda b: (b, 0, 0)),
                pl.BlockSpec((1, C, HW), lambda b: (b, 0, 0)),
            ] + [pl.BlockSpec(w.shape, lambda b: (0, 0)) for w in weights],
            out_specs=pl.BlockSpec((1, C, HW), lambda b: (b, 0, 0)),
        ),
        compiler_params=pltpu.CompilerParams(dimension_semantics=("parallel",)),
    )(xcat_pat, y_pat, x_flat, *weights)

    x_out = x_out_flat.reshape(B, C, H, W)

    # score: 3x3 conv (channel -> 1) on x_out, residual added to y
    xo_pat = _im2col3x3(x_out)                               # (B, C*9, HW)
    ws = params["score_w"].reshape(1, C * 9).astype(bf16)
    bs = params["score_b"].reshape(1, 1)
    y_flat = y.reshape(B, 1, HW)

    y_out_flat = pl.pallas_call(
        _score_residual_kernel,
        out_shape=jax.ShapeDtypeStruct((B, 1, HW), y.dtype),
        grid_spec=pltpu.PrefetchScalarGridSpec(
            num_scalar_prefetch=0,
            grid=(B,),
            in_specs=[
                pl.BlockSpec((1, C * 9, HW), lambda b: (b, 0, 0)),
                pl.BlockSpec((1, 1, HW), lambda b: (b, 0, 0)),
                pl.BlockSpec((1, C * 9), lambda b: (0, 0)),
                pl.BlockSpec((1, 1), lambda b: (0, 0)),
            ],
            out_specs=pl.BlockSpec((1, 1, HW), lambda b: (b, 0, 0)),
        ),
        compiler_params=pltpu.CompilerParams(dimension_semantics=("parallel",)),
    )(xo_pat, y_flat, ws, bs)

    y_out = y_out_flat.reshape(B, 1, H, W)
    return x_out, y_out


# ----------------------------------- main ------------------------------------ #

if __name__ == "__main__":
    key = jax.random.PRNGKey(0)
    kp, kx, ky = jax.random.split(key, 3)

    channel, subchannel = 32, 16          # group = 2 -> exercises the interleave path
    group = channel // subchannel
    B, H, W = 2, 16, 16                   # HW = 256 -> lane-dense last dim

    params = init_params(kp, channel=channel, subchannel=subchannel)
    x = jax.random.normal(kx, (B, channel, H, W), jnp.float32)
    y = jax.random.normal(ky, (B, 1, H, W), jnp.float32)

    fwd = jax.jit(functools.partial(rcu_forward, group=group))
    x_out, y_out = fwd(params, x, y)
    jax.block_until_ready((x_out, y_out))

    assert x_out.shape == (B, channel, H, W), x_out.shape
    assert y_out.shape == (B, 1, H, W), y_out.shape
    assert bool(jnp.isfinite(x_out).all()) and bool(jnp.isfinite(y_out).all())
    print("KERNEL_OK")
</pallas_src>

<mosaic_0001>
module attributes {stable_mosaic.version = 11 : i64} {
  func.func @_rcu_fused_kernel(%arg0: i32, %arg1: memref<1x306x256xf32, #tpu.memory_space<vmem>>, %arg2: memref<1x9x256xf32, #tpu.memory_space<vmem>>, %arg3: memref<1x32x256xf32, #tpu.memory_space<vmem>>, %arg4: memref<32x306xbf16, #tpu.memory_space<vmem>>, %arg5: memref<32x1xf32, #tpu.memory_space<vmem>>, %arg6: memref<32x9xbf16, #tpu.memory_space<vmem>>, %arg7: memref<32x1xf32, #tpu.memory_space<vmem>>, %arg8: memref<32x32xbf16, #tpu.memory_space<vmem>>, %arg9: memref<1x32xf32, #tpu.memory_space<vmem>>, %arg10: memref<32x32xbf16, #tpu.memory_space<vmem>>, %arg11: memref<32x1xf32, #tpu.memory_space<vmem>>, %arg12: memref<32x32xbf16, #tpu.memory_space<vmem>>, %arg13: memref<1x32xf32, #tpu.memory_space<vmem>>, %arg14: memref<32x32xbf16, #tpu.memory_space<vmem>>, %arg15: memref<32x1xf32, #tpu.memory_space<vmem>>, %arg16: memref<32x32xbf16, #tpu.memory_space<vmem>>, %arg17: memref<32x1xf32, #tpu.memory_space<vmem>>, %arg18: memref<32x32xbf16, #tpu.memory_space<vmem>>, %arg19: memref<32x1xf32, #tpu.memory_space<vmem>>, %arg20: memref<32x32xbf16, #tpu.memory_space<vmem>>, %arg21: memref<32x32xbf16, #tpu.memory_space<vmem>>, %arg22: memref<32x1xf32, #tpu.memory_space<vmem>>, %arg23: memref<1x32x256xf32, #tpu.memory_space<vmem>>) attributes {dimension_semantics = [#tpu.dimension_semantics<parallel>], iteration_bounds = array<i64: 2>, scalar_prefetch = 0 : i64, scratch_operands = 0 : i64, tpu.core_type = #tpu.core_type<tc>, window_params = [{transform_indices = @transform_0, window_bounds = array<i64: 1, 306, 256>}, {transform_indices = @transform_1, window_bounds = array<i64: 1, 9, 256>}, {transform_indices = @transform_2, window_bounds = array<i64: 1, 32, 256>}, {pipeline_mode = #tpu.pipeline_mode<synchronous>, transform_indices = @transform_3, window_bounds = array<i64: 32, 306>}, {pipeline_mode = #tpu.pipeline_mode<synchronous>, transform_indices = @transform_4, window_bounds = array<i64: 32, 1>}, {pipeline_mode = #tpu.pipeline_mode<synchronous>, transform_indices = @transform_5, window_bounds = array<i64: 32, 9>}, {pipeline_mode = #tpu.pipeline_mode<synchronous>, transform_indices = @transform_6, window_bounds = array<i64: 32, 1>}, {pipeline_mode = #tpu.pipeline_mode<synchronous>, transform_indices = @transform_7, window_bounds = array<i64: 32, 32>}, {pipeline_mode = #tpu.pipeline_mode<synchronous>, transform_indices = @transform_8, window_bounds = array<i64: 1, 32>}, {pipeline_mode = #tpu.pipeline_mode<synchronous>, transform_indices = @transform_9, window_bounds = array<i64: 32, 32>}, {pipeline_mode = #tpu.pipeline_mode<synchronous>, transform_indices = @transform_10, window_bounds = array<i64: 32, 1>}, {pipeline_mode = #tpu.pipeline_mode<synchronous>, transform_indices = @transform_11, window_bounds = array<i64: 32, 32>}, {pipeline_mode = #tpu.pipeline_mode<synchronous>, transform_indices = @transform_12, window_bounds = array<i64: 1, 32>}, {pipeline_mode = #tpu.pipeline_mode<synchronous>, transform_indices = @transform_13, window_bounds = array<i64: 32, 32>}, {pipeline_mode = #tpu.pipeline_mode<synchronous>, transform_indices = @transform_14, window_bounds = array<i64: 32, 1>}, {pipeline_mode = #tpu.pipeline_mode<synchronous>, transform_indices = @transform_15, window_bounds = array<i64: 32, 32>}, {pipeline_mode = #tpu.pipeline_mode<synchronous>, transform_indices = @transform_16, window_bounds = array<i64: 32, 1>}, {pipeline_mode = #tpu.pipeline_mode<synchronous>, transform_indices = @transform_17, window_bounds = array<i64: 32, 32>}, {pipeline_mode = #tpu.pipeline_mode<synchronous>, transform_indices = @transform_18, window_bounds = array<i64: 32, 1>}, {pipeline_mode = #tpu.pipeline_mode<synchronous>, transform_indices = @transform_19, window_bounds = array<i64: 32, 32>}, {pipeline_mode = #tpu.pipeline_mode<synchronous>, transform_indices = @transform_20, window_bounds = array<i64: 32, 32>}, {pipeline_mode = #tpu.pipeline_mode<synchronous>, transform_indices = @transform_21, window_bounds = array<i64: 32, 1>}, {transform_indices = @transform_22, window_bounds = array<i64: 1, 32, 256>}]} {
    %c0 = arith.constant 0 : index
    %c0_0 = arith.constant 0 : index
    %c0_1 = arith.constant 0 : index
    %0 = vector.load %arg1[%c0, %c0_0, %c0_1] : memref<1x306x256xf32, #tpu.memory_space<vmem>>, vector<1x306x256xf32>
    %1 = vector.shape_cast %0 : vector<1x306x256xf32> to vector<306x256xf32>
    %c0_2 = arith.constant 0 : index
    %c0_3 = arith.constant 0 : index
    %c0_4 = arith.constant 0 : index
    %2 = vector.load %arg2[%c0_2, %c0_3, %c0_4] : memref<1x9x256xf32, #tpu.memory_space<vmem>>, vector<1x9x256xf32>
    %3 = vector.shape_cast %2 : vector<1x9x256xf32> to vector<9x256xf32>
    %c0_5 = arith.constant 0 : index
    %c0_6 = arith.constant 0 : index
    %c0_7 = arith.constant 0 : index
    %4 = vector.load %arg3[%c0_5, %c0_6, %c0_7] : memref<1x32x256xf32, #tpu.memory_space<vmem>>, vector<1x32x256xf32>
    %5 = vector.shape_cast %4 : vector<1x32x256xf32> to vector<32x256xf32>
    %c0_8 = arith.constant 0 : index
    %c0_9 = arith.constant 0 : index
    %6 = vector.load %arg4[%c0_8, %c0_9] : memref<32x306xbf16, #tpu.memory_space<vmem>>, vector<32x306xbf16>
    %7 = arith.truncf %1 : vector<306x256xf32> to vector<306x256xbf16>
    %cst = arith.constant dense<0.000000e+00> : vector<32x256xf32>
    %8 = tpu.matmul %6, %7, %cst {dimension_numbers = #tpu.dot_dimension_numbers<[1], [0], [0], [1], [0, 0, 1, 1], [], []>} : vector<32x306xbf16>, vector<306x256xbf16>, vector<32x256xf32> -> vector<32x256xf32>
    %c0_10 = arith.constant 0 : index
    %c0_11 = arith.constant 0 : index
    %9 = vector.load %arg5[%c0_10, %c0_11] : memref<32x1xf32, #tpu.memory_space<vmem>>, vector<32x1xf32>
    %10 = vector.broadcast %9 : vector<32x1xf32> to vector<32x256xf32>
    %11 = arith.addf %8, %10 : vector<32x256xf32>
    %cst_12 = arith.constant 0.000000e+00 : f32
    %12 = vector.broadcast %cst_12 : f32 to vector<32x256xf32>
    %13 = arith.maximumf %11, %12 : vector<32x256xf32>
    %c0_13 = arith.constant 0 : index
    %c0_14 = arith.constant 0 : index
    %14 = vector.load %arg6[%c0_13, %c0_14] : memref<32x9xbf16, #tpu.memory_space<vmem>>, vector<32x9xbf16>
    %15 = arith.truncf %3 : vector<9x256xf32> to vector<9x256xbf16>
    %cst_15 = arith.constant dense<0.000000e+00> : vector<32x256xf32>
    %16 = tpu.matmul %14, %15, %cst_15 {dimension_numbers = #tpu.dot_dimension_numbers<[1], [0], [0], [1], [0, 0, 1, 1], [], []>} : vector<32x9xbf16>, vector<9x256xbf16>, vector<32x256xf32> -> vector<32x256xf32>
    %c0_16 = arith.constant 0 : index
    %c0_17 = arith.constant 0 : index
    %17 = vector.load %arg7[%c0_16, %c0_17] : memref<32x1xf32, #tpu.memory_space<vmem>>, vector<32x1xf32>
    %18 = vector.broadcast %17 : vector<32x1xf32> to vector<32x256xf32>
    %19 = arith.addf %16, %18 : vector<32x256xf32>
    %20 = tpu.transpose %13, [1, 0] : vector<32x256xf32> -> vector<256x32xf32>
    %c0_18 = arith.constant 0 : index
    %c0_19 = arith.constant 0 : index
    %21 = vector.load %arg8[%c0_18, %c0_19] : memref<32x32xbf16, #tpu.memory_space<vmem>>, vector<32x32xbf16>
    %22 = arith.truncf %20 : vector<256x32xf32> to vector<256x32xbf16>
    %cst_20 = arith.constant dense<0.000000e+00> : vector<256x32xf32>
    %23 = tpu.matmul %22, %21, %cst_20 {dimension_numbers = #tpu.dot_dimension_numbers<[1], [0], [0], [1], [0, 0, 1, 1], [], []>} : vector<256x32xbf16>, vector<32x32xbf16>, vector<256x32xf32> -> vector<256x32xf32>
    %c0_21 = arith.constant 0 : index
    %c0_22 = arith.constant 0 : index
    %24 = vector.load %arg9[%c0_21, %c0_22] : memref<1x32xf32, #tpu.memory_space<vmem>>, vector<1x32xf32>
    %25 = vector.broadcast %24 : vector<1x32xf32> to vector<256x32xf32>
    %26 = arith.addf %23, %25 : vector<256x32xf32>
    %c0_23 = arith.constant 0 : index
    %c0_24 = arith.constant 0 : index
    %27 = vector.load %arg12[%c0_23, %c0_24] : memref<32x32xbf16, #tpu.memory_space<vmem>>, vector<32x32xbf16>
    %28 = arith.truncf %20 : vector<256x32xf32> to vector<256x32xbf16>
    %cst_25 = arith.constant dense<0.000000e+00> : vector<256x32xf32>
    %29 = tpu.matmul %28, %27, %cst_25 {dimension_numbers = #tpu.dot_dimension_numbers<[1], [0], [0], [1], [0, 0, 1, 1], [], []>} : vector<256x32xbf16>, vector<32x32xbf16>, vector<256x32xf32> -> vector<256x32xf32>
    %c0_26 = arith.constant 0 : index
    %c0_27 = arith.constant 0 : index
    %30 = vector.load %arg13[%c0_26, %c0_27] : memref<1x32xf32, #tpu.memory_space<vmem>>, vector<1x32xf32>
    %31 = vector.broadcast %30 : vector<1x32xf32> to vector<256x32xf32>
    %32 = arith.addf %29, %31 : vector<256x32xf32>
    %c0_28 = arith.constant 0 : index
    %c0_29 = arith.constant 0 : index
    %33 = vector.load %arg10[%c0_28, %c0_29] : memref<32x32xbf16, #tpu.memory_space<vmem>>, vector<32x32xbf16>
    %34 = arith.truncf %13 : vector<32x256xf32> to vector<32x256xbf16>
    %cst_30 = arith.constant dense<0.000000e+00> : vector<32x256xf32>
    %35 = tpu.matmul %33, %34, %cst_30 {dimension_numbers = #tpu.dot_dimension_numbers<[1], [0], [0], [1], [0, 0, 1, 1], [], []>} : vector<32x32xbf16>, vector<32x256xbf16>, vector<32x256xf32> -> vector<32x256xf32>
    %c0_31 = arith.constant 0 : index
    %c0_32 = arith.constant 0 : index
    %36 = vector.load %arg11[%c0_31, %c0_32] : memref<32x1xf32, #tpu.memory_space<vmem>>, vector<32x1xf32>
    %37 = vector.broadcast %36 : vector<32x1xf32> to vector<32x256xf32>
    %38 = arith.addf %35, %37 : vector<32x256xf32>
    %c0_33 = arith.constant 0 : index
    %c0_34 = arith.constant 0 : index
    %39 = vector.load %arg14[%c0_33, %c0_34] : memref<32x32xbf16, #tpu.memory_space<vmem>>, vector<32x32xbf16>
    %40 = arith.truncf %13 : vector<32x256xf32> to vector<32x256xbf16>
    %cst_35 = arith.constant dense<0.000000e+00> : vector<32x256xf32>
    %41 = tpu.matmul %39, %40, %cst_35 {dimension_numbers = #tpu.dot_dimension_numbers<[1], [0], [0], [1], [0, 0, 1, 1], [], []>} : vector<32x32xbf16>, vector<32x256xbf16>, vector<32x256xf32> -> vector<32x256xf32>
    %c0_36 = arith.constant 0 : index
    %c0_37 = arith.constant 0 : index
    %42 = vector.load %arg15[%c0_36, %c0_37] : memref<32x1xf32, #tpu.memory_space<vmem>>, vector<32x1xf32>
    %43 = vector.broadcast %42 : vector<32x1xf32> to vector<32x256xf32>
    %44 = arith.addf %41, %43 : vector<32x256xf32>
    %c0_38 = arith.constant 0 : index
    %c0_39 = arith.constant 0 : index
    %45 = vector.load %arg16[%c0_38, %c0_39] : memref<32x32xbf16, #tpu.memory_space<vmem>>, vector<32x32xbf16>
    %46 = arith.truncf %19 : vector<32x256xf32> to vector<32x256xbf16>
    %cst_40 = arith.constant dense<0.000000e+00> : vector<32x256xf32>
    %47 = tpu.matmul %45, %46, %cst_40 {dimension_numbers = #tpu.dot_dimension_numbers<[1], [0], [0], [1], [0, 0, 1, 1], [], []>} : vector<32x32xbf16>, vector<32x256xbf16>, vector<32x256xf32> -> vector<32x256xf32>
    %c0_41 = arith.constant 0 : index
    %c0_42 = arith.constant 0 : index
    %48 = vector.load %arg17[%c0_41, %c0_42] : memref<32x1xf32, #tpu.memory_space<vmem>>, vector<32x1xf32>
    %49 = vector.broadcast %48 : vector<32x1xf32> to vector<32x256xf32>
    %50 = arith.addf %47, %49 : vector<32x256xf32>
    %c0_43 = arith.constant 0 : index
    %c0_44 = arith.constant 0 : index
    %51 = vector.load %arg18[%c0_43, %c0_44] : memref<32x32xbf16, #tpu.memory_space<vmem>>, vector<32x32xbf16>
    %52 = arith.truncf %19 : vector<32x256xf32> to vector<32x256xbf16>
    %cst_45 = arith.constant dense<0.000000e+00> : vector<32x256xf32>
    %53 = tpu.matmul %51, %52, %cst_45 {dimension_numbers = #tpu.dot_dimension_numbers<[1], [0], [0], [1], [0, 0, 1, 1], [], []>} : vector<32x32xbf16>, vector<32x256xbf16>, vector<32x256xf32> -> vector<32x256xf32>
    %c0_46 = arith.constant 0 : index
    %c0_47 = arith.constant 0 : index
    %54 = vector.load %arg19[%c0_46, %c0_47] : memref<32x1xf32, #tpu.memory_space<vmem>>, vector<32x1xf32>
    %55 = vector.broadcast %54 : vector<32x1xf32> to vector<32x256xf32>
    %56 = arith.addf %53, %55 : vector<32x256xf32>
    %57 = arith.truncf %26 : vector<256x32xf32> to vector<256x32xbf16>
    %58 = arith.truncf %44 : vector<32x256xf32> to vector<32x256xbf16>
    %cst_48 = arith.constant dense<0.000000e+00> : vector<256x256xf32>
    %59 = tpu.matmul %57, %58, %cst_48 {dimension_numbers = #tpu.dot_dimension_numbers<[1], [0], [0], [1], [0, 0, 1, 1], [], []>} : vector<256x32xbf16>, vector<32x256xbf16>, vector<256x256xf32> -> vector<256x256xf32>
    %cst_49 = arith.constant dense<0xFF800000> : vector<256xf32>
    %60 = vector.multi_reduction <maximumf>, %59, %cst_49 [1] : vector<256x256xf32> to vector<256xf32>
    %61 = vector.shape_cast %60 : vector<256xf32> to vector<256x1xf32>
    %62 = vector.broadcast %61 : vector<256x1xf32> to vector<256x256xf32>
    %63 = arith.subf %59, %62 : vector<256x256xf32>
    %64 = math.exp %63 : vector<256x256xf32>
    %cst_50 = arith.constant dense<0.000000e+00> : vector<256xf32>
    %65 = vector.multi_reduction <add>, %64, %cst_50 [1] : vector<256x256xf32> to vector<256xf32>
    %66 = vector.shape_cast %65 : vector<256xf32> to vector<256x1xf32>
    %67 = tpu.reciprocal %66 {approx = true} : vector<256x1xf32> -> vector<256x1xf32>
    %68 = vector.broadcast %67 : vector<256x1xf32> to vector<256x256xf32>
    %69 = arith.mulf %64, %68 : vector<256x256xf32>
    %70 = arith.truncf %38 : vector<32x256xf32> to vector<32x256xbf16>
    %71 = arith.truncf %32 : vector<256x32xf32> to vector<256x32xbf16>
    %cst_51 = arith.constant dense<0.000000e+00> : vector<32x32xf32>
    %72 = tpu.matmul %70, %71, %cst_51 {dimension_numbers = #tpu.dot_dimension_numbers<[1], [0], [0], [1], [0, 0, 1, 1], [], []>} : vector<32x256xbf16>, vector<256x32xbf16>, vector<32x32xf32> -> vector<32x32xf32>
    %cst_52 = arith.constant dense<0xFF800000> : vector<32xf32>
    %73 = vector.multi_reduction <maximumf>, %72, %cst_52 [1] : vector<32x32xf32> to vector<32xf32>
    %74 = vector.shape_cast %73 : vector<32xf32> to vector<32x1xf32>
    %75 = vector.broadcast %74 : vector<32x1xf32> to vector<32x32xf32>
    %76 = arith.subf %72, %75 : vector<32x32xf32>
    %77 = math.exp %76 : vector<32x32xf32>
    %cst_53 = arith.constant dense<0.000000e+00> : vector<32xf32>
    %78 = vector.multi_reduction <add>, %77, %cst_53 [1] : vector<32x32xf32> to vector<32xf32>
    %79 = vector.shape_cast %78 : vector<32xf32> to vector<32x1xf32>
    %80 = tpu.reciprocal %79 {approx = true} : vector<32x1xf32> -> vector<32x1xf32>
    %81 = vector.broadcast %80 : vector<32x1xf32> to vector<32x32xf32>
    %82 = arith.mulf %77, %81 : vector<32x32xf32>
    %83 = arith.truncf %50 : vector<32x256xf32> to vector<32x256xbf16>
    %84 = arith.truncf %69 : vector<256x256xf32> to vector<256x256xbf16>
    %cst_54 = arith.constant dense<0.000000e+00> : vector<32x256xf32>
    %85 = tpu.matmul %83, %84, %cst_54 {dimension_numbers = #tpu.dot_dimension_numbers<[1], [0], [0], [1], [0, 0, 1, 1], [], []>} : vector<32x256xbf16>, vector<256x256xbf16>, vector<32x256xf32> -> vector<32x256xf32>
    %86 = tpu.transpose %82, [1, 0] : vector<32x32xf32> -> vector<32x32xf32>
    %87 = arith.truncf %86 : vector<32x32xf32> to vector<32x32xbf16>
    %88 = arith.truncf %56 : vector<32x256xf32> to vector<32x256xbf16>
    %cst_55 = arith.constant dense<0.000000e+00> : vector<32x256xf32>
    %89 = tpu.matmul %87, %88, %cst_55 {dimension_numbers = #tpu.dot_dimension_numbers<[1], [0], [0], [1], [0, 0, 1, 1], [], []>} : vector<32x32xbf16>, vector<32x256xbf16>, vector<32x256xf32> -> vector<32x256xf32>
    %c0_56 = arith.constant 0 : index
    %c0_57 = arith.constant 0 : index
    %90 = vector.load %arg20[%c0_56, %c0_57] : memref<32x32xbf16, #tpu.memory_space<vmem>>, vector<32x32xbf16>
    %91 = arith.truncf %85 : vector<32x256xf32> to vector<32x256xbf16>
    %cst_58 = arith.constant dense<0.000000e+00> : vector<32x256xf32>
    %92 = tpu.matmul %90, %91, %cst_58 {dimension_numbers = #tpu.dot_dimension_numbers<[1], [0], [0], [1], [0, 0, 1, 1], [], []>} : vector<32x32xbf16>, vector<32x256xbf16>, vector<32x256xf32> -> vector<32x256xf32>
    %c0_59 = arith.constant 0 : index
    %c0_60 = arith.constant 0 : index
    %93 = vector.load %arg21[%c0_59, %c0_60] : memref<32x32xbf16, #tpu.memory_space<vmem>>, vector<32x32xbf16>
    %94 = arith.truncf %89 : vector<32x256xf32> to vector<32x256xbf16>
    %cst_61 = arith.constant dense<0.000000e+00> : vector<32x256xf32>
    %95 = tpu.matmul %93, %94, %cst_61 {dimension_numbers = #tpu.dot_dimension_numbers<[1], [0], [0], [1], [0, 0, 1, 1], [], []>} : vector<32x32xbf16>, vector<32x256xbf16>, vector<32x256xf32> -> vector<32x256xf32>
    %96 = arith.addf %92, %95 : vector<32x256xf32>
    %c0_62 = arith.constant 0 : index
    %c0_63 = arith.constant 0 : index
    %97 = vector.load %arg22[%c0_62, %c0_63] : memref<32x1xf32, #tpu.memory_space<vmem>>, vector<32x1xf32>
    %98 = vector.broadcast %97 : vector<32x1xf32> to vector<32x256xf32>
    %99 = arith.addf %96, %98 : vector<32x256xf32>
    %100 = arith.addf %5, %99 : vector<32x256xf32>
    %c0_64 = arith.constant 0 : index
    %c0_65 = arith.constant 0 : index
    %c0_66 = arith.constant 0 : index
    %101 = vector.load %arg23[%c0_64, %c0_65, %c0_66] : memref<1x32x256xf32, #tpu.memory_space<vmem>>, vector<1x32x256xf32>
    %102 = vector.shape_cast %101 : vector<1x32x256xf32> to vector<32x256xf32>
    %103 = vector.shape_cast %100 : vector<32x256xf32> to vector<1x32x256xf32>
    tpu.vector_store %arg23[%c0_64, %c0_65, %c0_66], %103 {strides = array<i32>} : memref<1x32x256xf32, #tpu.memory_space<vmem>>, vector<1x32x256xf32>,
    return
  }
  func.func @transform_0(%arg0: i32) -> (i32, i32, i32) {
    %c0_i32 = arith.constant 0 : i32
    %c0_i32_0 = arith.constant 0 : i32
    %c0_i32_1 = arith.constant 0 : i32
    return %arg0, %c0_i32, %c0_i32_0 : i32, i32, i32
  }
  func.func @transform_1(%arg0: i32) -> (i32, i32, i32) {
    %c0_i32 = arith.constant 0 : i32
    %c0_i32_0 = arith.constant 0 : i32
    %c0_i32_1 = arith.constant 0 : i32
    return %arg0, %c0_i32, %c0_i32_0 : i32, i32, i32
  }
  func.func @transform_2(%arg0: i32) -> (i32, i32, i32) {
    %c0_i32 = arith.constant 0 : i32
    %c0_i32_0 = arith.constant 0 : i32
    %c0_i32_1 = arith.constant 0 : i32
    return %arg0, %c0_i32, %c0_i32_0 : i32, i32, i32
  }
  func.func @transform_3(%arg0: i32) -> (i32, i32) {
    %c0_i32 = arith.constant 0 : i32
    %c0_i32_0 = arith.constant 0 : i32
    %c0_i32_1 = arith.constant 0 : i32
    return %c0_i32, %c0_i32_0 : i32, i32
  }
  func.func @transform_4(%arg0: i32) -> (i32, i32) {
    %c0_i32 = arith.constant 0 : i32
    %c0_i32_0 = arith.constant 0 : i32
    %c0_i32_1 = arith.constant 0 : i32
    return %c0_i32, %c0_i32_0 : i32, i32
  }
  func.func @transform_5(%arg0: i32) -> (i32, i32) {
    %c0_i32 = arith.constant 0 : i32
    %c0_i32_0 = arith.constant 0 : i32
    %c0_i32_1 = arith.constant 0 : i32
    return %c0_i32, %c0_i32_0 : i32, i32
  }
  func.func @transform_6(%arg0: i32) -> (i32, i32) {
    %c0_i32 = arith.constant 0 : i32
    %c0_i32_0 = arith.constant 0 : i32
    %c0_i32_1 = arith.constant 0 : i32
    return %c0_i32, %c0_i32_0 : i32, i32
  }
  func.func @transform_7(%arg0: i32) -> (i32, i32) {
    %c0_i32 = arith.constant 0 : i32
    %c0_i32_0 = arith.constant 0 : i32
    %c0_i32_1 = arith.constant 0 : i32
    return %c0_i32, %c0_i32_0 : i32, i32
  }
  func.func @transform_8(%arg0: i32) -> (i32, i32) {
    %c0_i32 = arith.constant 0 : i32
    %c0_i32_0 = arith.constant 0 : i32
    %c0_i32_1 = arith.constant 0 : i32
    return %c0_i32, %c0_i32_0 : i32, i32
  }
  func.func @transform_9(%arg0: i32) -> (i32, i32) {
    %c0_i32 = arith.constant 0 : i32
    %c0_i32_0 = arith.constant 0 : i32
    %c0_i32_1 = arith.constant 0 : i32
    return %c0_i32, %c0_i32_0 : i32, i32
  }
  func.func @transform_10(%arg0: i32) -> (i32, i32) {
    %c0_i32 = arith.constant 0 : i32
    %c0_i32_0 = arith.constant 0 : i32
    %c0_i32_1 = arith.constant 0 : i32
    return %c0_i32, %c0_i32_0 : i32, i32
  }
  func.func @transform_11(%arg0: i32) -> (i32, i32) {
    %c0_i32 = arith.constant 0 : i32
    %c0_i32_0 = arith.constant 0 : i32
    %c0_i32_1 = arith.constant 0 : i32
    return %c0_i32, %c0_i32_0 : i32, i32
  }
  func.func @transform_12(%arg0: i32) -> (i32, i32) {
    %c0_i32 = arith.constant 0 : i32
    %c0_i32_0 = arith.constant 0 : i32
    %c0_i32_1 = arith.constant 0 : i32
    return %c0_i32, %c0_i32_0 : i32, i32
  }
  func.func @transform_13(%arg0: i32) -> (i32, i32) {
    %c0_i32 = arith.constant 0 : i32
    %c0_i32_0 = arith.constant 0 : i32
    %c0_i32_1 = arith.constant 0 : i32
    return %c0_i32, %c0_i32_0 : i32, i32
  }
  func.func @transform_14(%arg0: i32) -> (i32, i32) {
    %c0_i32 = arith.constant 0 : i32
    %c0_i32_0 = arith.constant 0 : i32
    %c0_i32_1 = arith.constant 0 : i32
    return %c0_i32, %c0_i32_0 : i32, i32
  }
  func.func @transform_15(%arg0: i32) -> (i32, i32) {
    %c0_i32 = arith.constant 0 : i32
    %c0_i32_0 = arith.constant 0 : i32
    %c0_i32_1 = arith.constant 0 : i32
    return %c0_i32, %c0_i32_0 : i32, i32
  }
  func.func @transform_16(%arg0: i32) -> (i32, i32) {
    %c0_i32 = arith.constant 0 : i32
    %c0_i32_0 = arith.constant 0 : i32
    %c0_i32_1 = arith.constant 0 : i32
    return %c0_i32, %c0_i32_0 : i32, i32
  }
  func.func @transform_17(%arg0: i32) -> (i32, i32) {
    %c0_i32 = arith.constant 0 : i32
    %c0_i32_0 = arith.constant 0 : i32
    %c0_i32_1 = arith.constant 0 : i32
    return %c0_i32, %c0_i32_0 : i32, i32
  }
  func.func @transform_18(%arg0: i32) -> (i32, i32) {
    %c0_i32 = arith.constant 0 : i32
    %c0_i32_0 = arith.constant 0 : i32
    %c0_i32_1 = arith.constant 0 : i32
    return %c0_i32, %c0_i32_0 : i32, i32
  }
  func.func @transform_19(%arg0: i32) -> (i32, i32) {
    %c0_i32 = arith.constant 0 : i32
    %c0_i32_0 = arith.constant 0 : i32
    %c0_i32_1 = arith.constant 0 : i32
    return %c0_i32, %c0_i32_0 : i32, i32
  }
  func.func @transform_20(%arg0: i32) -> (i32, i32) {
    %c0_i32 = arith.constant 0 : i32
    %c0_i32_0 = arith.constant 0 : i32
    %c0_i32_1 = arith.constant 0 : i32
    return %c0_i32, %c0_i32_0 : i32, i32
  }
  func.func @transform_21(%arg0: i32) -> (i32, i32) {
    %c0_i32 = arith.constant 0 : i32
    %c0_i32_0 = arith.constant 0 : i32
    %c0_i32_1 = arith.constant 0 : i32
    return %c0_i32, %c0_i32_0 : i32, i32
  }
  func.func @transform_22(%arg0: i32) -> (i32, i32, i32) {
    %c0_i32 = arith.constant 0 : i32
    %c0_i32_0 = arith.constant 0 : i32
    %c0_i32_1 = arith.constant 0 : i32
    return %arg0, %c0_i32, %c0_i32_0 : i32, i32, i32
  }
}

module attributes {stable_mosaic.version = 11 : i64} {
  func.func @_score_residual_kernel(%arg0: i32, %arg1: memref<1x288x256xf32, #tpu.memory_space<vmem>>, %arg2: memref<1x1x256xf32, #tpu.memory_space<vmem>>, %arg3: memref<1x288xbf16, #tpu.memory_space<vmem>>, %arg4: memref<1x1xf32, #tpu.memory_space<vmem>>, %arg5: memref<1x1x256xf32, #tpu.memory_space<vmem>>) attributes {dimension_semantics = [#tpu.dimension_semantics<parallel>], iteration_bounds = array<i64: 2>, scalar_prefetch = 0 : i64, scratch_operands = 0 : i64, tpu.core_type = #tpu.core_type<tc>, window_params = [{transform_indices = @transform_0, window_bounds = array<i64: 1, 288, 256>}, {transform_indices = @transform_1, window_bounds = array<i64: 1, 1, 256>}, {pipeline_mode = #tpu.pipeline_mode<synchronous>, transform_indices = @transform_2, window_bounds = array<i64: 1, 288>}, {pipeline_mode = #tpu.pipeline_mode<synchronous>, transform_indices = @transform_3, window_bounds = array<i64: 1, 1>}, {transform_indices = @transform_4, window_bounds = array<i64: 1, 1, 256>}]} {
    %c0 = arith.constant 0 : index
    %c0_0 = arith.constant 0 : index
    %0 = vector.load %arg3[%c0, %c0_0] : memref<1x288xbf16, #tpu.memory_space<vmem>>, vector<1x288xbf16>
    %c0_1 = arith.constant 0 : index
    %c0_2 = arith.constant 0 : index
    %c0_3 = arith.constant 0 : index
    %1 = vector.load %arg1[%c0_1, %c0_2, %c0_3] : memref<1x288x256xf32, #tpu.memory_space<vmem>>, vector<1x288x256xf32>
    %2 = vector.shape_cast %1 : vector<1x288x256xf32> to vector<288x256xf32>
    %3 = arith.truncf %2 : vector<288x256xf32> to vector<288x256xbf16>
    %cst = arith.constant dense<0.000000e+00> : vector<1x256xf32>
    %4 = tpu.matmul %0, %3, %cst {dimension_numbers = #tpu.dot_dimension_numbers<[1], [0], [0], [1], [0, 0, 1, 1], [], []>} : vector<1x288xbf16>, vector<288x256xbf16>, vector<1x256xf32> -> vector<1x256xf32>
    %c0_4 = arith.constant 0 : index
    %c0_5 = arith.constant 0 : index
    %c0_6 = arith.constant 0 : index
    %5 = vector.load %arg2[%c0_4, %c0_5, %c0_6] : memref<1x1x256xf32, #tpu.memory_space<vmem>>, vector<1x1x256xf32>
    %6 = vector.shape_cast %5 : vector<1x1x256xf32> to vector<1x256xf32>
    %7 = arith.addf %6, %4 : vector<1x256xf32>
    %c0_7 = arith.constant 0 : index
    %c0_8 = arith.constant 0 : index
    %8 = vector.load %arg4[%c0_7, %c0_8] : memref<1x1xf32, #tpu.memory_space<vmem>>, vector<1x1xf32>
    %9 = vector.broadcast %8 : vector<1x1xf32> to vector<1x256xf32>
    %10 = arith.addf %7, %9 : vector<1x256xf32>
    %c0_9 = arith.constant 0 : index
    %c0_10 = arith.constant 0 : index
    %c0_11 = arith.constant 0 : index
    %11 = vector.load %arg5[%c0_9, %c0_10, %c0_11] : memref<1x1x256xf32, #tpu.memory_space<vmem>>, vector<1x1x256xf32>
    %12 = vector.shape_cast %11 : vector<1x1x256xf32> to vector<1x256xf32>
    %13 = vector.shape_cast %10 : vector<1x256xf32> to vector<1x1x256xf32>
    tpu.vector_store %arg5[%c0_9, %c0_10, %c0_11], %13 {strides = array<i32>} : memref<1x1x256xf32, #tpu.memory_space<vmem>>, vector<1x1x256xf32>,
    return
  }
  func.func @transform_0(%arg0: i32) -> (i32, i32, i32) {
    %c0_i32 = arith.constant 0 : i32
    %c0_i32_0 = arith.constant 0 : i32
    %c0_i32_1 = arith.constant 0 : i32
    return %arg0, %c0_i32, %c0_i32_0 : i32, i32, i32
  }
  func.func @transform_1(%arg0: i32) -> (i32, i32, i32) {
    %c0_i32 = arith.constant 0 : i32
    %c0_i32_0 = arith.constant 0 : i32
    %c0_i32_1 = arith.constant 0 : i32
    return %arg0, %c0_i32, %c0_i32_0 : i32, i32, i32
  }
  func.func @transform_2(%arg0: i32) -> (i32, i32) {
    %c0_i32 = arith.constant 0 : i32
    %c0_i32_0 = arith.constant 0 : i32
    %c0_i32_1 = arith.constant 0 : i32
    return %c0_i32, %c0_i32_0 : i32, i32
  }
  func.func @transform_3(%arg0: i32) -> (i32, i32) {
    %c0_i32 = arith.constant 0 : i32
    %c0_i32_0 = arith.constant 0 : i32
    %c0_i32_1 = arith.constant 0 : i32
    return %c0_i32, %c0_i32_0 : i32, i32
  }
  func.func @transform_4(%arg0: i32) -> (i32, i32, i32) {
    %c0_i32 = arith.constant 0 : i32
    %c0_i32_0 = arith.constant 0 : i32
    %c0_i32_1 = arith.constant 0 : i32
    return %arg0, %c0_i32, %c0_i32_0 : i32, i32, i32
  }
}

</mosaic_0001>

<bundles_post_ra>
// kernel: rcu_forward.2
= control target key start
LH: loop header
LB: loop body
LE: loop exit
PB: predicated region body
PF: predicated region fallthrough
CT: control target
= control target key end

     0   :  { %s5253_s0 = inlined_call_operand.vmem [shape: f32[2,306,256], index: 0, kind: input, shape index: {}]   ;;  %s5254_s1 = inlined_call_operand.vmem [shape: f32[2,9,256], index: 1, kind: input, shape index: {}]   ;;  %s5255_s2 = inlined_call_operand.vmem [shape: f32[2,32,256], index: 2, kind: input, shape index: {}]   ;;  %s5256_s3 = inlined_call_operand.vmem [shape: bf16[32,306], index: 3, kind: input, shape index: {}]   ;;  %s5257_s4 = inlined_call_operand.vmem [shape: f32[32,1], index: 4, kind: input, shape index: {}]   ;;  %s5258_s5 = inlined_call_operand.vmem [shape: bf16[32,9], index: 5, kind: input, shape index: {}]   ;;  %s5259_s6 = inlined_call_operand.vmem [shape: f32[32,1], index: 6, kind: input, shape index: {}]   ;;  %s5260_s7 = inlined_call_operand.vmem [shape: bf16[32,32], index: 7, kind: input, shape index: {}]   ;;  %s5261_s8 = inlined_call_operand.vmem [shape: f32[1,32], index: 8, kind: input, shape index: {}]   ;;  %s5262_s9 = inlined_call_operand.vmem [shape: bf16[32,32], index: 9, kind: input, shape index: {}]   ;;  %s5263_s10 = inlined_call_operand.vmem [shape: f32[32,1], index: 10, kind: input, shape index: {}]   ;;  %s5264_s11 = inlined_call_operand.vmem [shape: bf16[32,32], index: 11, kind: input, shape index: {}]   ;;  %s5265_s12 = inlined_call_operand.vmem [shape: f32[1,32], index: 12, kind: input, shape index: {}]   ;;  %s5266_s13 = inlined_call_operand.vmem [shape: bf16[32,32], index: 13, kind: input, shape index: {}]   ;;  %s5267_s14 = inlined_call_operand.vmem [shape: f32[32,1], index: 14, kind: input, shape index: {}]   ;;  %s5268_s15 = inlined_call_operand.vmem [shape: bf16[32,32], index: 15, kind: input, shape index: {}]   ;;  %s5269_s16 = inlined_call_operand.vmem [shape: f32[32,1], index: 16, kind: input, shape index: {}]   ;;  %s5270_s17 = inlined_call_operand.vmem [shape: bf16[32,32], index: 17, kind: input, shape index: {}]   ;;  %s5271_s18 = inlined_call_operand.vmem [shape: f32[32,1], index: 18, kind: input, shape index: {}]   ;;  %s5272_s19 = inlined_call_operand.vmem [shape: bf16[32,32], index: 19, kind: input, shape index: {}]   ;;  %s5273_s20 = inlined_call_operand.vmem [shape: bf16[32,32], index: 20, kind: input, shape index: {}]   ;;  %s5274_s21 = inlined_call_operand.vmem [shape: f32[32,1], index: 21, kind: input, shape index: {}]   ;;  %s5275_s22 = inlined_call_operand.vmem [shape: f32[2,32,256], index: 22, kind: output, shape index: {}]  }
   0x1   :  { %5322 = sst [smem:[#allocation41_spill]] %s5253_s0 }
   0x2   :  { %5323 = sst [smem:[#allocation42_spill]] %s5254_s1 }
   0x3   :  { %5324 = sst [smem:[#allocation43_spill]] %s5255_s2 }
   0x4   :  { %5325 = sst [smem:[#allocation44_spill]] %s5256_s3  ;;  %s4012_s3 = smov 0  }
   0x5   :  { %5326 = sst [smem:[#allocation45_spill]] %s5257_s4 }
   0x6   :  { %5327 = sst [smem:[#allocation46_spill]] %s5258_s5 }
   0x7   :  { %5328 = sst [smem:[#allocation47_spill]] %s5259_s6 }
   0x8 LB: > { %s3369_s28 = sadd.s32 4294967295, %s3893_s3   ;;  %p3373_p0 = scmp.ge.s32.totalorder %s3893_s3, 1  ;;  %s3893_s3 = sphi %s4012_s3, %s32_s3  }
   0x9   : > { %p632_p1 = scmp.lt.s32.totalorder %s3893_s3, 3 }
   0xb   : > { %p633_p2 = pnand %p3373_p0, %p632_p1 }
   0xd   : > { %636 = sbr.rel (%p633_p2) target bundleno = 2010 (0x7da), region = 108 }
  0x14   : > { %p704_p3 = scmp.lt.s32.totalorder %s3369_s28, 1  ;;  %s5329_s4 = sld [smem:[#allocation44_spill]]  ;;  %v5280_v1 = vmov 0   ;;  %vm924_vm0 = vcmask 1040384   ;;  %vm917_vm1 = vcmask 408576   ;;  %vm1092_vm2 = vcmask 1043456  }
  0x15   : > { %3651 = vset.pattern.permute.xlu0 %v5280_v1  ;;  %s5330_s1 = sld [smem:[#allocation45_spill]]  ;;  %3652 = vset.pattern.permute.xlu1 %v5280_v1  ;;  %s5331_s0 = sld [smem:[#allocation41_spill]]  ;;  %vm1093_vm3 = vcmask 1044480   ;;  %vm1085_vm4 = vcmask 72704   ;;  %vm1258_vm5 = vcmask 261120  }
  0x16   : > { %s5459_s28 = smov (!%p704_p3, %s3369_s28), 1  ;;  %1134 = vmatprep.mubr.bf16.mxu1 %v5280_v1  ;;  %s5332_s6 = sld [smem:[#allocation42_spill]] }
  0x17   : > { %s3639_s5 = smul.u32 624, %s5459_s28  ;;  %s5333_s27 = sld [smem:[#allocation46_spill]] }
  0x18   : > { %s5334_s26 = sld [smem:[#allocation47_spill]] }
  0x1a   : > { %v3655_v0 = vld [vmem:[%s5329_s4 + $0x4] ss:$12 sps:$4 sm:$0xff]  }
  0x1b   : > { %v863_v2 = vld [vmem:[%s5330_s1] sm:$0xff]  ;;  %963 = vmatprep.mubr.bf16.mxu0 %v3655_v0  ;;  %v864_v3 = vld [vmem:[%s5330_s1 + $0x8] sm:$0xff]  ;;  %v865_v4 = vld [vmem:[%s5330_s1 + $0x10] sm:$0xff]  ;;  %s4044_s23 = scalar_lea.vmem %s5331_s0, %s3639_s5  ;;  %s3477_s5 = sshll.u32 %s5459_s28, 6 }
  0x1c   : > { %869 = vperm.xlu0 %3651, %v863_v2   ;;  %v866_v5 = vld [vmem:[%s5330_s1 + $0x18] sm:$0xff]  ;;  %879 = vperm.xlu1 %3652, %v865_v4   ;;  %v726_v6 = vld [vmem:[%s4044_s23 + $0x8] sm:$0xff]  ;;  %v725_v8 = vld [vmem:[%s4044_s23] sm:$0xff]  ;;  %s5234_s0 = scalar_lea.vmem %s5275_s22, %s3477_s5 }
  0x1d   : > { %v728_v7 = vld [vmem:[%s4044_s23 + $0x18] sm:$0xff]  ;;  %v727_v10 = vld [vmem:[%s4044_s23 + $0x10] sm:$0xff]  ;;  %v730_v11 = vld [vmem:[%s4044_s23 + $0x28] sm:$0xff] }
  0x1e   : > { %v824_v9 = vpack.c.bf16 %v728_v7, %v726_v6  ;;  %v732_v12 = vld [vmem:[%s4044_s23 + $0x38] sm:$0xff]  ;;  %v823_v13 = vpack.c.bf16 %v727_v10, %v725_v8  ;;  %v729_v15 = vld [vmem:[%s4044_s23 + $0x20] sm:$0xff]  ;;  %v731_v16 = vld [vmem:[%s4044_s23 + $0x30] sm:$0xff] }
  0x1f   : > { %v826_v14 = vpack.c.bf16 %v732_v12, %v730_v11  ;;  %v734_v17 = vld [vmem:[%s4044_s23 + $0x48] sm:$0xff]  ;;  %v736_v18 = vld [vmem:[%s4044_s23 + $0x58] sm:$0xff]  ;;  %v825_v19 = vpack.c.bf16 %v731_v16, %v729_v15  ;;  %v733_v21 = vld [vmem:[%s4044_s23 + $0x40] sm:$0xff] }
  0x20   : > { %874 = vperm.xlu0 %3651, %v864_v3   ;;  %931 = vmatprep.subr.bf16.mxu0 %v824_v9  ;;  %v828_v20 = vpack.c.bf16 %v736_v18, %v734_v17  ;;  %v735_v22 = vld [vmem:[%s4044_s23 + $0x50] sm:$0xff]  ;;  %v738_v23 = vld [vmem:[%s4044_s23 + $0x68] sm:$0xff]  ;;  %v740_v24 = vld [vmem:[%s4044_s23 + $0x78] sm:$0xff] }
  0x21   : > { %884 = vperm.xlu1 %3652, %v866_v5   ;;  %932 = vmatpush1.bf16.msra.mxu0 %v823_v13  ;;  %v827_v25 = vpack.c.bf16 %v735_v22, %v733_v21  ;;  %v830_v26 = vpack.c.bf16 %v740_v24, %v738_v23  ;;  %v737_v27 = vld [vmem:[%s4044_s23 + $0x60] sm:$0xff]  ;;  %v739_v28 = vld [vmem:[%s4044_s23 + $0x70] sm:$0xff]  ;;  %v742_v29 = vld [vmem:[%s4044_s23 + $0x88] sm:$0xff] }
  0x22   : > { %933 = vmatprep.subr.bf16.mxu0 %v826_v14  ;;  %v744_v30 = vld [vmem:[%s4044_s23 + $0x98] sm:$0xff]  ;;  %v829_v31 = vpack.c.bf16 %v739_v28, %v737_v27  ;;  %v741_v33 = vld [vmem:[%s4044_s23 + $0x80] sm:$0xff]  ;;  %v743_v34 = vld [vmem:[%s4044_s23 + $0x90] sm:$0xff] }
  0x23   : > { %v832_v32 = vpack.c.bf16 %v744_v30, %v742_v29  ;;  %v746_v35 = vld [vmem:[%s4044_s23 + $0xa8] sm:$0xff]  ;;  %v748_v36 = vld [vmem:[%s4044_s23 + $0xb8] sm:$0xff]  ;;  %v831_v37 = vpack.c.bf16 %v743_v34, %v741_v33  ;;  %v745_v39 = vld [vmem:[%s4044_s23 + $0xa0] sm:$0xff] }
  0x24   : > { %v834_v38 = vpack.c.bf16 %v748_v36, %v746_v35  ;;  %v747_v40 = vld [vmem:[%s4044_s23 + $0xb0] sm:$0xff]  ;;  %v750_v41 = vld [vmem:[%s4044_s23 + $0xc8] sm:$0xff]  ;;  %v752_v42 = vld [vmem:[%s4044_s23 + $0xd8] sm:$0xff] }
  0x25   : > { %934 = vmatpush1.bf16.msra.mxu0 %v825_v19  ;;  %v833_v43 = vpack.c.bf16 %v747_v40, %v745_v39  ;;  %v836_v44 = vpack.c.bf16 %v752_v42, %v750_v41  ;;  %v749_v45 = vld [vmem:[%s4044_s23 + $0xc0] sm:$0xff]  ;;  %v751_v46 = vld [vmem:[%s4044_s23 + $0xd0] sm:$0xff]  ;;  %v754_v47 = vld [vmem:[%s4044_s23 + $0xe8] sm:$0xff] }
  0x26   : > { %935 = vmatprep.subr.bf16.mxu0 %v828_v20  ;;  %v756_v48 = vld [vmem:[%s4044_s23 + $0xf8] sm:$0xff]  ;;  %v835_v49 = vpack.c.bf16 %v751_v46, %v749_v45  ;;  %v753_v50 = vld [vmem:[%s4044_s23 + $0xe0] sm:$0xff]  ;;  %v755_v52 = vld [vmem:[%s4044_s23 + $0xf0] sm:$0xff] }
  0x27   : > { %v838_v51 = vpack.c.bf16 %v756_v48, %v754_v47  ;;  %v758_v53 = vld [vmem:[%s4044_s23 + $0x108] sm:$0xff]  ;;  %v760_v54 = vld [vmem:[%s4044_s23 + $0x118] sm:$0xff]  ;;  %v757_v55 = vld [vmem:[%s4044_s23 + $0x100] sm:$0xff]  ;;  %v837_v57 = vpack.c.bf16 %v755_v52, %v753_v50 }
  0x28   : > { %v759_v56 = vld [vmem:[%s4044_s23 + $0x110] sm:$0xff]  ;;  %v762_v58 = vld [vmem:[%s4044_s23 + $0x128] sm:$0xff]  ;;  %v764_v59 = vld [vmem:[%s4044_s23 + $0x138] sm:$0xff]  ;;  %v840_v60 = vpack.c.bf16 %v760_v54, %v758_v53 }
  0x29   : > { %936 = vmatpush1.bf16.msra.mxu0 %v827_v25  ;;  %v761_v61 = vld [vmem:[%s4044_s23 + $0x120] sm:$0xff]  ;;  %v763_v62 = vld [vmem:[%s4044_s23 + $0x130] sm:$0xff]  ;;  %v839_v63 = vpack.c.bf16 %v759_v56, %v757_v55  ;;  %v766_v0 = vld [vmem:[%s4044_s23 + $0x148] sm:$0xff]  ;;  %v842_v3 = vpack.c.bf16 %v764_v59, %v762_v58 }
  0x2a   : > { %937 = vmatprep.subr.bf16.mxu0 %v830_v26  ;;  %v768_v2 = vld [vmem:[%s4044_s23 + $0x158] sm:$0xff]  ;;  %v841_v4 = vpack.c.bf16 %v763_v62, %v761_v61  ;;  %v765_v6 = vld [vmem:[%s4044_s23 + $0x140] sm:$0xff]  ;;  %v767_v7 = vld [vmem:[%s4044_s23 + $0x150] sm:$0xff] }
  0x2b   : > { %v844_v5 = vpack.c.bf16 %v768_v2, %v766_v0  ;;  %v770_v8 = vld [vmem:[%s4044_s23 + $0x168] sm:$0xff]  ;;  %v772_v9 = vld [vmem:[%s4044_s23 + $0x178] sm:$0xff]  ;;  %v843_v10 = vpack.c.bf16 %v767_v7, %v765_v6  ;;  %v769_v12 = vld [vmem:[%s4044_s23 + $0x160] sm:$0xff]  ;;  %v3896_v7 = vmov 65535  }
  0x2c   : > { %v846_v11 = vpack.c.bf16 %v772_v9, %v770_v8  ;;  %v771_v13 = vld [vmem:[%s4044_s23 + $0x170] sm:$0xff]  ;;  %v774_v14 = vld [vmem:[%s4044_s23 + $0x188] sm:$0xff]  ;;  %v776_v15 = vld [vmem:[%s4044_s23 + $0x198] sm:$0xff]  ;;  %v1094_v8 = vsel %vm1092_vm2, 4294967295, %v3896_v7 }
  0x2d   : > { %938 = vmatpush1.bf16.msra.mxu0 %v829_v31  ;;  %v845_v16 = vpack.c.bf16 %v771_v13, %v769_v12  ;;  %v848_v17 = vpack.c.bf16 %v776_v15, %v774_v14  ;;  %v773_v18 = vld [vmem:[%s4044_s23 + $0x180] sm:$0xff]  ;;  %v775_v19 = vld [vmem:[%s4044_s23 + $0x190] sm:$0xff]  ;;  %v778_v20 = vld [vmem:[%s4044_s23 + $0x1a8] sm:$0xff] }
  0x2e   : > { %939 = vmatprep.subr.bf16.mxu0 %v832_v32  ;;  %v780_v21 = vld [vmem:[%s4044_s23 + $0x1b8] sm:$0xff]  ;;  %v847_v22 = vpack.c.bf16 %v775_v19, %v773_v18  ;;  %v777_v24 = vld [vmem:[%s4044_s23 + $0x1a0] sm:$0xff]  ;;  %v779_v25 = vld [vmem:[%s4044_s23 + $0x1b0] sm:$0xff] }
  0x2f   : > { %v850_v23 = vpack.c.bf16 %v780_v21, %v778_v20  ;;  %v782_v26 = vld [vmem:[%s4044_s23 + $0x1c8] sm:$0xff]  ;;  %v784_v27 = vld [vmem:[%s4044_s23 + $0x1d8] sm:$0xff]  ;;  %v849_v28 = vpack.c.bf16 %v779_v25, %v777_v24  ;;  %v781_v30 = vld [vmem:[%s4044_s23 + $0x1c0] sm:$0xff] }
  0x30   : > { %v852_v29 = vpack.c.bf16 %v784_v27, %v782_v26  ;;  %v783_v31 = vld [vmem:[%s4044_s23 + $0x1d0] sm:$0xff]  ;;  %v786_v32 = vld [vmem:[%s4044_s23 + $0x1e8] sm:$0xff]  ;;  %v788_v33 = vld [vmem:[%s4044_s23 + $0x1f8] sm:$0xff] }
  0x31   : > { %940 = vmatpush1.bf16.msra.mxu0 %v831_v37  ;;  %v851_v34 = vpack.c.bf16 %v783_v31, %v781_v30  ;;  %v854_v35 = vpack.c.bf16 %v788_v33, %v786_v32  ;;  %v785_v36 = vld [vmem:[%s4044_s23 + $0x1e0] sm:$0xff]  ;;  %v787_v37 = vld [vmem:[%s4044_s23 + $0x1f0] sm:$0xff]  ;;  %v792_v39 = vld [vmem:[%s4044_s23 + $0x218] sm:$0xff] }
  0x32   : > { %941 = vmatprep.subr.bf16.mxu0 %v834_v38  ;;  %v790_v38 = vld [vmem:[%s4044_s23 + $0x208] sm:$0xff]  ;;  %v853_v40 = vpack.c.bf16 %v787_v37, %v785_v36  ;;  %v789_v42 = vld [vmem:[%s4044_s23 + $0x200] sm:$0xff]  ;;  %v796_v45 = vld [vmem:[%s4044_s23 + $0x238] sm:$0xff] }
  0x33   : > { %v856_v41 = vpack.c.bf16 %v792_v39, %v790_v38  ;;  %v3653_v46 = vld [vmem:[%s5329_s4] ss:$12 sps:$4 sm:$0xff]   ;;  %v3656_v48 = vld [vmem:[%s5329_s4 + $0x1c] ss:$12 sps:$4 sm:$0xff]  }
  0x34   : > { %v793_v50 = vld [vmem:[%s4044_s23 + $0x220] sm:$0xff]  ;;  %v798_v52 = vld [vmem:[%s4044_s23 + $0x248] sm:$0xff]  ;;  %v800_v53 = vld [vmem:[%s4044_s23 + $0x258] sm:$0xff] }
  0x35   : > { %942 = vmatpush1.bf16.msra.mxu0 %v833_v43  ;;  %v791_v43 = vld [vmem:[%s4044_s23 + $0x210] sm:$0xff]  ;;  %v860_v55 = vpack.c.bf16 %v800_v53, %v798_v52  ;;  %v797_v56 = vld [vmem:[%s4044_s23 + $0x240] sm:$0xff]  ;;  %v802_v58 = vld [vmem:[%s4044_s23 + $0x268] sm:$0x3] }
  0x36   : > { %943 = vmatprep.subr.bf16.mxu0 %v836_v44  ;;  %v794_v44 = vld [vmem:[%s4044_s23 + $0x228] sm:$0xff]  ;;  %v855_v47 = vpack.c.bf16 %v791_v43, %v789_v42  ;;  %v801_v59 = vld [vmem:[%s4044_s23 + $0x260] sm:$0x3]  ;;  %v862_v62 = vpack.c.bf16 %v802_v58, %v802_v58  ;;  %v1663_v7 = vld [vmem:[%s5263_s10 + $0x18] sm:$0xff] }
  0x37   : > { %v3659_v2 = vld [vmem:[%s5329_s4 + $0x8] ss:$12 sps:$4 sm:$0xff]   ;;  %v3661_v15 = vld [vmem:[%s5333_s27] sm:$0xff]  }
  0x38   : > { %v3665_v37 = vld [vmem:[%s5260_s7] sm:$0xff]   ;;  %v3664_v53 = vld [vmem:[%s5266_s13 + $0x8] sm:$0xff]  }
  0x39   : > { %944 = vmatpush1.bf16.msra.mxu0 %v835_v49  ;;  %v858_v49 = vpack.c.bf16 %v796_v45, %v794_v44  ;;  %v3663_v52 = vld [vmem:[%s5266_s13] sm:$0xff]   ;;  %v1052_v58 = vld [vmem:[%s5334_s26 + $0x8] sm:$0xff] }
  0x3a   : > { %945 = vmatprep.subr.bf16.mxu0 %v838_v51  ;;  %v795_v51 = vld [vmem:[%s4044_s23 + $0x230] sm:$0xff] }
  0x3b   : > { %v857_v54 = vpack.c.bf16 %v795_v51, %v793_v50  ;;  %v3667_v51 = vld [vmem:[%s5264_s11] sm:$0xff]  }
  0x3d   : > { %946 = vmatpush1.bf16.msra.mxu0 %v837_v57  ;;  %v799_v57 = vld [vmem:[%s4044_s23 + $0x250] sm:$0xff]  ;;  %s3476_s23 = sshll.u32 %s5459_s28, 5 }
  0x3e   : > { %947 = vmatprep.subr.bf16.mxu0 %v840_v60  ;;  %v3658_v60 = vld [vmem:[%s5329_s4 + $0x18] ss:$12 sps:$4 sm:$0xff]   ;;  %v859_v61 = vpack.c.bf16 %v799_v57, %v797_v56  ;;  %s713_s25 = scalar_lea.vmem %s5332_s6, %s3476_s23 }
  0x3f   : > { %v803_v9 = vld [vmem:[%s713_s25] sm:$0xff] }
  0x41   : > { %948 = vmatpush1.bf16.msra.mxu0 %v839_v63  ;;  %v861_v63 = vpack.c.bf16 %v801_v59, %v801_v59 }
  0x42   : > { %949 = vmatprep.subr.bf16.mxu0 %v842_v3  ;;  %v3660_v3 = vld [vmem:[%s5329_s4 + $0x20] ss:$12 sps:$4 sm:$0xff]  }
  0x43   : > { %v926_v0 = vsel %vm924_vm0, %v861_v63, 0  ;;  %v1054_v63 = vld [vmem:[%s5334_s26 + $0x18] sm:$0xff] }
  0x45   : > { %950 = vmatpush1.bf16.msra.mxu0 %v841_v4  ;;  %v804_v4 = vld [vmem:[%s713_s25 + $0x8] sm:$0xff] }
  0x46   : > { %951 = vmatprep.subr.bf16.mxu0 %v844_v5  ;;  %v806_v5 = vld [vmem:[%s713_s25 + $0x18] sm:$0x1] }
  0x47   : > { %v1050_v6 = vpack.c.bf16 %v806_v5, %v804_v4  ;;  %v1661_v5 = vld [vmem:[%s5263_s10 + $0x8] sm:$0xff] }
  0x49   : > { %952 = vmatpush1.bf16.msra.mxu0 %v843_v10  ;;  %v805_v10 = vld [vmem:[%s713_s25 + $0x10] sm:$0x1]  ;;  %s5457_s25 = sld [smem:[#allocation43_spill]] }
  0x4a   : > { %953 = vmatprep.subr.bf16.mxu0 %v846_v11  ;;  %v1095_v11 = vsel %vm1093_vm3, %v1094_v8, 0  ;;  %v1049_v12 = vpack.c.bf16 %v805_v10, %v803_v9  ;;  %v1053_v8 = vld [vmem:[%s5334_s26 + $0x10] sm:$0xff]  ;;  %v1660_v9 = vld [vmem:[%s5263_s10] sm:$0xff] }
  0x4b   : > { %v1100_v13 = vand.u32 %v1095_v11, %v1050_v6  ;;  %v1051_v6 = vld [vmem:[%s5334_s26] sm:$0xff]  ;;  %v1662_v10 = vld [vmem:[%s5263_s10 + $0x10] sm:$0xff] }
  0x4c   : > { %v1097_v14 = vand.u32 %v1095_v11, %v1049_v12 }
  0x4d   : > { %954 = vmatpush1.bf16.msra.mxu0 %v845_v16  ;;  %1102 = vmatprep.subr.bf16.mxu1 %v1100_v13  ;;  %v3662_v16 = vld [vmem:[%s5333_s27 + $0x8] sm:$0xff]  }
  0x4e   : > { %955 = vmatprep.subr.bf16.mxu0 %v848_v17  ;;  %1103 = vmatpush1.bf16.msra.mxu1 %v1097_v14 }
  0x4f   : > { %3543 = vmatprep.subr.bf16.mxu1 %v3665_v37  ;;  %s5227_s2 = scalar_lea.vmem %s5457_s25, %s3477_s5 }
  0x51   : > { %956 = vmatpush1.bf16.msra.mxu0 %v847_v22  ;;  %3392 = vmatmul.mubr.msk.bf16.vlgmr.msra.gmra.mrb[0].mxu1 %vm1085_vm4, %v3661_v15 }
  0x52   : > { %957 = vmatprep.subr.bf16.mxu0 %v850_v23  ;;  %1144 = vmatprep.mubr.bf16.mxu1 %v5280_v1 }
  0x53   : > { %3544 = vmatpush3.bf16.msra.mxu1 %v3665_v37 }
  0x55   : > { %958 = vmatpush1.bf16.msra.mxu0 %v849_v28 }
  0x56   : > { %959 = vmatprep.subr.bf16.mxu0 %v852_v29 }
  0x59   : > { %960 = vmatpush1.bf16.msra.mxu0 %v851_v34  ;;  %3393 = vmatmul.mubr.msk.bf16.gmra.mrb[4].mxu1 %vm1085_vm4, %v3662_v16 }
  0x5a   : > { %961 = vmatprep.subr.bf16.mxu0 %v854_v35 }
  0x5d   : > { %962 = vmatpush1.bf16.msra.mxu0 %v853_v40 }
  0x5e   : > { %984 = vmatprep.subr.bf16.mxu0 %v856_v41 }
  0x60   : > { %964 = vmatmul.mubr.bf16.vlgmr.msra.gmra.mrb[0].mxu0 %v3653_v46 }
  0x61   : > { %985 = vmatpush1.bf16.msra.mxu0 %v855_v47  ;;  %973 = vmatprep.mubr.bf16.mxu0 %v3656_v48  ;;  %v3666_v47 = vld [vmem:[%s5260_s7 + $0x8] sm:$0xff]  }
  0x62   : > { %986 = vmatprep.subr.bf16.mxu0 %v858_v49  ;;  %3545 = vmatprep.subr.bf16.mxu1 %v3666_v47 }
  0x63   : > { %3546 = vmatpush3.bf16.msra.mxu1 %v3666_v47 }
  0x64   : > { %3579 = vmatprep.subr.bf16.mxu1 %v3667_v51 }
  0x65   : > { %987 = vmatpush1.bf16.msra.mxu0 %v857_v54  ;;  %v1758_v54 = vld [vmem:[%s5267_s14 + $0x8] sm:$0xff] }
  0x66   : > { %988 = vmatprep.subr.bf16.mxu0 %v860_v55  ;;  %v1760_v55 = vld [vmem:[%s5267_s14 + $0x18] sm:$0xff] }
  0x68   : > { %974 = vmatmul.mubr.bf16.gmra.mrb[4].mxu0 %v3658_v60 }
  0x69   : > { %989 = vmatpush1.bf16.msra.mxu0 %v859_v61  ;;  %1016 = vmatprep.mubr.bf16.mxu0 %v5280_v1  ;;  %v1757_v61 = vld [vmem:[%s5267_s14] sm:$0xff] }
  0x6a   : > { %3387 = vmatprep.subr.msk.bf16.mxu0 %vm924_vm0, %v862_v62 }
  0x6d   : > { %991 = vmatpush1.bf16.msra.mxu0 %v926_v0 }
  0x70   : > { %3388 = vmatmul.mubr.msk.bf16.vlgmr.msra.gmra.mrb[0].mxu0 %vm917_vm1, %v3659_v2 }
  0x71   : > { %1026 = vmatprep.mubr.bf16.mxu0 %v5280_v1 }
  0x78   : > { %3389 = vmatmul.mubr.msk.bf16.gmra.mrb[4].mxu0 %vm917_vm1, %v3660_v3  ;;  %v1759_v3 = vld [vmem:[%s5267_s14 + $0x10] sm:$0xff] }
  0x79   : > { %1829 = vmatprep.mubr.bf16.mxu0 %v5280_v1 }
  0x9b   : > { %v870_v17 = vpop.permute.xlu0 %869  ;;  %v880_v29 = vpop.permute.xlu1 %879 }
  0x9f   : > { %v875_v21 = vpop.permute.xlu0 %874 }
  0xa0   : > { %v885_v38 = vpop.permute.xlu1 %884 }
 0x124   : > { %v4190_v56 = vpop.f32.mrb[0].mxu1 }
 0x125   : > { %v4192_v57 = vpop.f32.mrb[1].mxu1 }
 0x126   : > { %v4197_v59 = vpop.f32.mrb[2].mxu1 }
 0x127   : > { %v4199_v60 = vpop.f32.mrb[3].mxu1 }
 0x12c   : > { %v4204_v62 = vpop.f32.mrb[4].mxu1 }
 0x12d   : > { %v4209_v0 = vpop.f32.mrb[5].mxu1 }
 0x12e   : > { %v4211_v2 = vpop.f32.mrb[6].mxu1 }
 0x12f   : > { %v4216_v4 = vpop.f32.mrb[7].mxu1 }
 0x143   : > { %v1018_v18 = vpop.f32.mrb[0].mxu0 }
 0x144   : > { %v3615_v19 = vadd.f32 %v1018_v18, %v870_v17  ;;  %v1020_v20 = vpop.f32.mrb[1].mxu0 }
 0x145   : > { %v3616_v22 = vadd.f32 %v1020_v20, %v870_v17  ;;  %v1022_v23 = vpop.f32.mrb[2].mxu0  ;;  %v3668_v20 = vld [vmem:[%s5264_s11 + $0x8] sm:$0xff]  }
 0x146   : > { %v1037_v24 = vmax.f32 %v3615_v19, 0.0  ;;  %v3617_v25 = vadd.f32 %v1022_v23, %v875_v21  ;;  %v1024_v26 = vpop.f32.mrb[3].mxu0 }
 0x147   : > { %v1038_v27 = vmax.f32 %v3616_v22, 0.0  ;;  %v3618_v28 = vadd.f32 %v1024_v26, %v875_v21 }
 0x148   : > { %v1039_v30 = vmax.f32 %v3617_v25, 0.0  ;;  %1155 = vxpose.xlu0.b32.start [1/4] (short) %v1037_v24, 128 }
 0x149   : > { %v1040_v31 = vmax.f32 %v3618_v28, 0.0  ;;  %1187 = vxpose.xlu1.b32.start [1/4] (short) %v1038_v27, 128 }
 0x14a   : > { %v4153_v32 = vpack.c.bf16 %v1039_v30, %v1037_v24 }
 0x14b   : > { %v4155_v33 = vpack.c.bf16 %v1040_v31, %v1038_v27  ;;  %v1028_v34 = vpop.f32.mrb[4].mxu0 }
 0x14c   : > { %v3619_v35 = vadd.f32 %v1028_v34, %v880_v29  ;;  %v1030_v36 = vpop.f32.mrb[5].mxu0  ;;  %1156 = vxpose.xlu0.b32.cont [2/4] (short) %v1039_v30, 128 }
 0x14d   : > { %v3620_v39 = vadd.f32 %v1030_v36, %v880_v29  ;;  %v1032_v40 = vpop.f32.mrb[6].mxu0  ;;  %1188 = vxpose.xlu1.b32.cont [2/4] (short) %v1040_v31, 128  ;;  %1797 = vmatprep.subr.bf16.mxu0 %v4155_v33 }
 0x14e   : > { %v1041_v41 = vmax.f32 %v3619_v35, 0.0  ;;  %v3621_v42 = vadd.f32 %v1032_v40, %v885_v38  ;;  %v1034_v43 = vpop.f32.mrb[7].mxu0  ;;  %1798 = vmatpush1.bf16.msra.mxu0 %v4153_v32 }
 0x14f   : > { %v1042_v44 = vmax.f32 %v3620_v39, 0.0  ;;  %v3622_v45 = vadd.f32 %v1034_v43, %v885_v38 }
 0x150   : > { %v1043_v46 = vmax.f32 %v3621_v42, 0.0  ;;  %1157 = vxpose.xlu0.b32.cont [3/4] (short) %v1041_v41, 128 }
 0x151   : > { %v1044_v48 = vmax.f32 %v3622_v45, 0.0  ;;  %1189 = vxpose.xlu1.b32.cont [3/4] (short) %v1042_v44, 128 }
 0x152   : > { %v4165_v49 = vpack.c.bf16 %v1043_v46, %v1041_v41 }
 0x153   : > { %v4167_v50 = vpack.c.bf16 %v1044_v48, %v1042_v44 }
 0x154   : > { %1158 = vxpose.xlu0.b32.end [4/4] (short) %v1043_v46, 128 }
 0x155   : > { %1190 = vxpose.xlu1.b32.end [4/4] (short) %v1044_v48, 128  ;;  %1799 = vmatprep.subr.bf16.mxu0 %v4167_v50 }
 0x156   : > { %1800 = vmatpush1.bf16.msra.mxu0 %v4165_v49 }
 0x159   : > { %3438 = vmatmul.mubr.msk.bf16.vlgmr.msra.gmra.mrb[8].mxu0 %vm1258_vm5, %v3663_v52 }
 0x15a   : > { %1839 = vmatprep.mubr.bf16.mxu0 %v5280_v1 }
 0x161   : > { %3439 = vmatmul.mubr.msk.bf16.gmra.mrb[12].mxu0 %vm1258_vm5, %v3664_v53 }
 0x162   : > { %1930 = vmatprep.mubr.bf16.mxu0 %v5280_v1 }
 0x1a3   : > { %1768 = vperm.xlu1 %3652, %v1758_v54  }
 0x1a7   : > { %1778 = vperm.xlu1 %3652, %v1760_v55  }
 0x1ab   : > { %1062 = vperm.xlu1 %3652, %v1052_v58  }
 0x1ad   : > { %1763 = vperm.xlu0 %3651, %v1757_v61  }
 0x1af   : > { %1072 = vperm.xlu1 %3652, %v1054_v63  }
 0x1b1   : > { %1773 = vperm.xlu0 %3651, %v1759_v3  }
 0x1b3   : > { %1671 = vperm.xlu1 %3652, %v1661_v5  }
 0x1b5   : > { %1057 = vperm.xlu0 %3651, %v1051_v6  }
 0x1b7   : > { %1681 = vperm.xlu1 %3652, %v1663_v7  }
 0x1b9   : > { %1067 = vperm.xlu0 %3651, %v1053_v8  }
 0x1bd   : > { %1666 = vperm.xlu0 %3651, %v1660_v9  }
 0x1c1   : > { %1676 = vperm.xlu0 %3651, %v1662_v10  }
 0x1c8   : > { %v1171_v11 = vpop.trf.xlu0 }
 0x1c9   : > { %v1203_v12 = vpop.trf.xlu1 }
 0x1cc   : > { %v1172_v13 = vpop.trf.xlu0 }
 0x1cd   : > { %v4236_v14 = vpack.c.bf16 %v1172_v13, %v1171_v11  ;;  %v1204_v15 = vpop.trf.xlu1 }
 0x1cf   : > { %3547 = vmatprep.mubr.msk.bf16.mxu1 %vm1258_vm5, %v4236_v14 }
 0x1d0   : > { %v1173_v16 = vpop.trf.xlu0 }
 0x1d1   : > { %v1205_v17 = vpop.trf.xlu1 }
 0x1d4   : > { %v1174_v18 = vpop.trf.xlu0 }
 0x1d5   : > { %v4240_v19 = vpack.c.bf16 %v1174_v18, %v1173_v16  ;;  %v1206_v21 = vpop.trf.xlu1 }
 0x1d6   : > { %v4276_v53 = vpack.c.bf16 %v1206_v21, %v1205_v17 }
 0x1d7   : > { %3548 = vmatmul.mubr.msk.bf16.vlgmr.msra.gmra.mrb[8].mxu1 %vm1258_vm5, %v4240_v19 }
 0x1d8   : > { %3580 = vmatpush3.bf16.msra.mxu1 %v3667_v51  ;;  %v1175_v22 = vpop.trf.xlu0  ;;  %v4270_v51 = vpack.c.bf16 %v1204_v15, %v1203_v12 }
 0x1d9   : > { %3581 = vmatprep.subr.bf16.mxu1 %v3668_v20  ;;  %v1207_v23 = vpop.trf.xlu1 }
 0x1dc   : > { %3582 = vmatpush3.bf16.msra.mxu1 %v3668_v20  ;;  %v1176_v24 = vpop.trf.xlu0 }
 0x1dd   : > { %1700 = vmatprep.subr.bf16.mxu1 %v4155_v33  ;;  %v4248_v25 = vpack.c.bf16 %v1176_v24, %v1175_v22  ;;  %v1208_v27 = vpop.trf.xlu1 }
 0x1de   : > { %v4278_v54 = vpack.c.bf16 %v1208_v27, %v1207_v23 }
 0x1df   : > { %3551 = vmatprep.mubr.msk.bf16.mxu1 %vm1258_vm5, %v4248_v25 }
 0x1e0   : > { %v1177_v26 = vpop.trf.xlu0 }
 0x1e1   : > { %v1209_v30 = vpop.trf.xlu1 }
 0x1e4   : > { %v1178_v28 = vpop.trf.xlu0 }
 0x1e5   : > { %v4252_v29 = vpack.c.bf16 %v1178_v28, %v1177_v26  ;;  %v1210_v36 = vpop.trf.xlu1 }
 0x1e6   : > { %v4284_v58 = vpack.c.bf16 %v1210_v36, %v1209_v30 }
 0x1e7   : > { %3552 = vmatmul.mubr.msk.bf16.gmra.mrb[12].mxu1 %vm1258_vm5, %v4252_v29 }
 0x1e8   : > { %v1179_v31 = vpop.trf.xlu0 }
 0x1e9   : > { %v1211_v37 = vpop.trf.xlu1 }
 0x1ec   : > { %v1180_v34 = vpop.trf.xlu0 }
 0x1ed   : > { %v4256_v35 = vpack.c.bf16 %v1180_v34, %v1179_v31  ;;  %v1212_v41 = vpop.trf.xlu1 }
 0x1ee   : > { %v4286_v61 = vpack.c.bf16 %v1212_v41, %v1211_v37 }
 0x1ef   : > { %3555 = vmatprep.mubr.msk.bf16.mxu1 %vm1258_vm5, %v4256_v35 }
 0x1f0   : > { %v1181_v33 = vpop.trf.xlu0 }
 0x1f1   : > { %v1213_v44 = vpop.trf.xlu1 }
 0x1f4   : > { %v1182_v38 = vpop.trf.xlu0 }
 0x1f5   : > { %v4260_v39 = vpack.c.bf16 %v1182_v38, %v1181_v33  ;;  %v1214_v48 = vpop.trf.xlu1 }
 0x1f6   : > { %v4292_v3 = vpack.c.bf16 %v1214_v48, %v1213_v44 }
 0x1f7   : > { %3556 = vmatmul.mubr.msk.bf16.gmra.mrb[16].mxu1 %vm1258_vm5, %v4260_v39 }
 0x1f8   : > { %v1183_v40 = vpop.trf.xlu0 }
 0x1f9   : > { %v1215_v52 = vpop.trf.xlu1 }
 0x1fc   : > { %v1184_v42 = vpop.trf.xlu0 }
 0x1fd   : > { %v4264_v43 = vpack.c.bf16 %v1184_v42, %v1183_v40  ;;  %v1216_v55 = vpop.trf.xlu1 }
 0x1fe   : > { %v4294_v6 = vpack.c.bf16 %v1216_v55, %v1215_v52 }
 0x1ff   : > { %3559 = vmatprep.mubr.msk.bf16.mxu1 %vm1258_vm5, %v4264_v43 }
 0x200   : > { %v1185_v45 = vpop.trf.xlu0 }
 0x201   : > { %v1217_v63 = vpop.trf.xlu1 }
 0x204   : > { %v1186_v46 = vpop.trf.xlu0 }
 0x205   : > { %v4268_v47 = vpack.c.bf16 %v1186_v46, %v1185_v45  ;;  %v1218_v5 = vpop.trf.xlu1 }
 0x206   : > { %v4300_v8 = vpack.c.bf16 %v1218_v5, %v1217_v63 }
 0x207   : > { %3560 = vmatmul.mubr.msk.bf16.gmra.mrb[20].mxu1 %vm1258_vm5, %v4268_v47 }
 0x208   : > { %3563 = vmatprep.mubr.msk.bf16.mxu1 %vm1258_vm5, %v4270_v51 }
 0x20f   : > { %3564 = vmatmul.mubr.msk.bf16.gmra.mrb[24].mxu1 %vm1258_vm5, %v4276_v53 }
 0x210   : > { %3567 = vmatprep.mubr.msk.bf16.mxu1 %vm1258_vm5, %v4278_v54 }
 0x217   : > { %3568 = vmatmul.mubr.msk.bf16.gmra.mrb[28].mxu1 %vm1258_vm5, %v4284_v58 }
 0x218   : > { %3571 = vmatprep.mubr.msk.bf16.mxu1 %vm1258_vm5, %v4286_v61 }
 0x21f   : > { %3572 = vmatmul.mubr.msk.bf16.gmra.mrb[32].mxu1 %vm1258_vm5, %v4292_v3 }
 0x220   : > { %3575 = vmatprep.mubr.msk.bf16.mxu1 %vm1258_vm5, %v4294_v6 }
 0x222   : > { %v1769_v7 = vpop.permute.xlu1 %1768 }
 0x226   : > { %v1779_v9 = vpop.permute.xlu1 %1778 }
 0x227   : > { %3576 = vmatmul.mubr.msk.bf16.gmra.mrb[36].mxu1 %vm1258_vm5, %v4300_v8 }
 0x228   : > { %3583 = vmatprep.mubr.msk.bf16.mxu1 %vm1258_vm5, %v4236_v14 }
 0x22a   : > { %v1063_v15 = vpop.permute.xlu1 %1062 }
 0x22b   : > { %v1143_v27 = vadd.f32 %v4199_v60, %v1063_v15 }
 0x22c   : > { %v1764_v10 = vpop.permute.xlu0 %1763  ;;  %v1831_v11 = vpop.f32.mrb[8].mxu0 }
 0x22d   : > { %v1833_v12 = vpop.f32.mrb[9].mxu0  ;;  %v4306_v16 = vadd.f32 %v1831_v11, %v1764_v10 }
 0x22e   : > { %v1835_v13 = vpop.f32.mrb[10].mxu0  ;;  %v1834_v20 = vadd.f32 %v1833_v12, %v1764_v10  ;;  %v3674_v10 = vld [vmem:[%s5270_s17 + $0x8] sm:$0xff]  }
 0x22f   : > { %v4308_v17 = vadd.f32 %v1835_v13, %v1769_v7  ;;  %3584 = vmatmul.mubr.msk.bf16.vlgmr.msra.gmra.mrb[40].mxu1 %vm1258_vm5, %v4240_v19  ;;  %v1837_v18 = vpop.f32.mrb[11].mxu0  ;;  %v1141_v19 = vadd.f32 %v4197_v59, %v1063_v15 }
 0x230   : > { %1701 = vmatpush1.bf16.msra.mxu1 %v4153_v32  ;;  %v1838_v21 = vadd.f32 %v1837_v18, %v1769_v7  ;;  %3587 = vmatprep.mubr.msk.bf16.mxu1 %vm1258_vm5, %v4248_v25  ;;  %v1774_v14 = vpop.permute.xlu0 %1773  ;;  %v1073_v32 = vpop.permute.xlu1 %1072 }
 0x231   : > { %v2064_v22 = vpack.c.bf16 %v4308_v17, %v4306_v16  ;;  %1702 = vmatprep.subr.bf16.mxu1 %v4167_v50  ;;  %v1151_v59 = vadd.f32 %v4211_v2, %v1073_v32  ;;  %v3669_v2 = vld [vmem:[%s5268_s15] sm:$0xff]  }
 0x232   : > { %v2065_v23 = vpack.c.bf16 %v1838_v21, %v1834_v20 }
 0x234   : > { %1703 = vmatpush1.bf16.msra.mxu1 %v4165_v49  ;;  %v1058_v24 = vpop.permute.xlu0 %1057  ;;  %v1841_v26 = vpop.f32.mrb[12].mxu0 }
 0x235   : > { %v1137_v28 = vadd.f32 %v4190_v56, %v1058_v24  ;;  %v1139_v25 = vadd.f32 %v4192_v57, %v1058_v24  ;;  %2116 = vmatprep.subr.bf16.mxu1 %v2065_v23  ;;  %v1843_v30 = vpop.f32.mrb[13].mxu0  ;;  %v1842_v50 = vadd.f32 %v1841_v26, %v1774_v14  ;;  %v1153_v57 = vadd.f32 %v4216_v4, %v1073_v32  ;;  %v3672_v4 = vld [vmem:[%s5268_s15 + $0x8] sm:$0xff]  }
 0x236   : > { %v1845_v31 = vpop.f32.mrb[14].mxu0  ;;  %v1844_v37 = vadd.f32 %v1843_v30, %v1774_v14 }
 0x237   : > { %v1854_v34 = vpack.c.bf16 %v1141_v19, %v1137_v28  ;;  %v1855_v36 = vpack.c.bf16 %v1143_v27, %v1139_v25  ;;  %v1846_v33 = vadd.f32 %v1845_v31, %v1779_v9  ;;  %3588 = vmatmul.mubr.msk.bf16.gmra.mrb[44].mxu1 %vm1258_vm5, %v4252_v29  ;;  %v1847_v49 = vpop.f32.mrb[15].mxu0 }
 0x238   : > { %v1848_v60 = vadd.f32 %v1847_v49, %v1779_v9  ;;  %3591 = vmatprep.mubr.msk.bf16.mxu1 %vm1258_vm5, %v4256_v35  ;;  %v1068_v56 = vpop.permute.xlu0 %1067  ;;  %v3673_v35 = vld [vmem:[%s5270_s17] sm:$0xff]  }
 0x239   : > { %v2066_v38 = vpack.c.bf16 %v1846_v33, %v1842_v50  ;;  %v1147_v40 = vadd.f32 %v4204_v62, %v1068_v56  ;;  %v1149_v41 = vadd.f32 %v4209_v0, %v1068_v56  ;;  %1898 = vmatprep.subr.bf16.mxu0 %v1855_v36  ;;  %v3670_v62 = vld [vmem:[%s5262_s9] sm:$0xff]   ;;  %v3671_v0 = vld [vmem:[%s5262_s9 + $0x8] sm:$0xff]  }
 0x23a   : > { %v2067_v42 = vpack.c.bf16 %v1848_v60, %v1844_v37  ;;  %1899 = vmatpush1.bf16.msra.mxu0 %v1854_v34 }
 0x23b   : > { %v1856_v29 = vpack.c.bf16 %v1151_v59, %v1147_v40  ;;  %v1857_v44 = vpack.c.bf16 %v1153_v57, %v1149_v41 }
 0x23d   : > { %1900 = vmatprep.subr.bf16.mxu0 %v1857_v44 }
 0x23e   : > { %1901 = vmatpush1.bf16.msra.mxu0 %v1856_v29 }
 0x23f   : > { %3592 = vmatmul.mubr.msk.bf16.gmra.mrb[48].mxu1 %vm1258_vm5, %v4260_v39  ;;  %1995 = vmatprep.subr.bf16.mxu0 %v1855_v36 }
 0x240   : > { %3595 = vmatprep.mubr.msk.bf16.mxu1 %vm1258_vm5, %v4264_v43  ;;  %v4380_v43 = vld [vmem:[%s5261_s8] ss:$0 sm:$0xff] }
 0x241   : > { %3442 = vmatmul.mubr.msk.bf16.vlgmr.msra.gmra.mrb[16].mxu0 %vm1258_vm5, %v3669_v2 }
 0x242   : > { %1996 = vmatpush1.bf16.msra.mxu0 %v1854_v34  ;;  %1940 = vmatprep.mubr.bf16.mxu0 %v5280_v1 }
 0x243   : > { %1997 = vmatprep.subr.bf16.mxu0 %v1857_v44 }
 0x246   : > { %1998 = vmatpush1.bf16.msra.mxu0 %v1856_v29 }
 0x247   : > { %3596 = vmatmul.mubr.msk.bf16.gmra.mrb[52].mxu1 %vm1258_vm5, %v4268_v47 }
 0x248   : > { %3599 = vmatprep.mubr.msk.bf16.mxu1 %vm1258_vm5, %v4270_v51 }
 0x249   : > { %3443 = vmatmul.mubr.msk.bf16.gmra.mrb[20].mxu0 %vm1258_vm5, %v3672_v4 }
 0x24a   : > { %2027 = vmatprep.mubr.bf16.mxu0 %v5280_v1 }
 0x24f   : > { %3600 = vmatmul.mubr.msk.bf16.gmra.mrb[56].mxu1 %vm1258_vm5, %v4276_v53 }
 0x250   : > { %3603 = vmatprep.mubr.msk.bf16.mxu1 %vm1258_vm5, %v4278_v54 }
 0x251   : > { %3446 = vmatmul.mubr.msk.bf16.vlgmr.msra.gmra.mrb[24].mxu0 %vm1258_vm5, %v3673_v35 }
 0x252   : > { %2037 = vmatprep.mubr.bf16.mxu0 %v5280_v1 }
 0x257   : > { %3604 = vmatmul.mubr.msk.bf16.gmra.mrb[60].mxu1 %vm1258_vm5, %v4284_v58 }
 0x258   : > { %3607 = vmatprep.mubr.msk.bf16.mxu1 %vm1258_vm5, %v4286_v61 }
 0x259   : > { %3447 = vmatmul.mubr.msk.bf16.gmra.mrb[28].mxu0 %vm1258_vm5, %v3674_v10 }
 0x25f   : > { %3608 = vmatmul.mubr.msk.bf16.gmra.mrb[64].mxu1 %vm1258_vm5, %v4292_v3 }
 0x260   : > { %3611 = vmatprep.mubr.msk.bf16.mxu1 %vm1258_vm5, %v4294_v6 }
 0x267   : > { %3612 = vmatmul.mubr.msk.bf16.gmra.mrb[68].mxu1 %vm1258_vm5, %v4300_v8 }
 0x268   : > { %1732 = vmatprep.mubr.bf16.mxu1 %v5280_v1 }
 0x26f   : > { %3434 = vmatmul.mubr.msk.bf16.vlgmr.msra.gmra.mrb[72].mxu1 %vm1258_vm5, %v3670_v62 }
 0x270   : > { %2117 = vmatpush1.bf16.msra.mxu1 %v2064_v22  ;;  %1742 = vmatprep.mubr.bf16.mxu1 %v5280_v1 }
 0x271   : > { %2118 = vmatprep.subr.bf16.mxu1 %v2067_v42 }
 0x274   : > { %2119 = vmatpush1.bf16.msra.mxu1 %v2066_v38 }
 0x277   : > { %3435 = vmatmul.mubr.msk.bf16.gmra.mrb[76].mxu1 %vm1258_vm5, %v3671_v0 }
 0x278   : > { %2148 = vmatprep.mubr.bf16.mxu1 %v5280_v1 }
 0x2aa   : > { %v3549_v39 = vpop.f32.mrb[8].mxu1 }
 0x2ab   : > { %v1341_v45 = vpop.f32.mrb[9].mxu1  ;;  %v1350_v47 = vadd.f32 %v3549_v39, %v4380_v43 }
 0x2ac   : > { %v3550_v46 = vpop.f32.mrb[10].mxu1  ;;  %v1342_v52 = vadd.f32 %v4380_v43, %v1341_v45 }
 0x2ad   : > { %v1353_v48 = vadd.f32 %v3550_v46, %v4380_v43  ;;  %v1344_v51 = vpop.f32.mrb[11].mxu1 }
 0x2ae   : > { %v1345_v53 = vadd.f32 %v4380_v43, %v1344_v51 }
 0x2af   : > { %v2049_v54 = vpack.c.bf16 %v1353_v48, %v1350_v47 }
 0x2b0   : > { %v2048_v55 = vpack.c.bf16 %v1345_v53, %v1342_v52 }
 0x2b2   : > { %3448 = vmatmul.mubr.msk.bf16.vlgmr.msra.gmra.mrb[80].mxu1 %vm1258_vm5, %v2048_v55 }
 0x2b3   : > { %2158 = vmatprep.mubr.bf16.mxu1 %v5280_v1 }
 0x2ba   : > { %v3553_v58 = vpop.f32.mrb[12].mxu1  ;;  %3449 = vmatmul.mubr.msk.bf16.gmra.mrb[84].mxu1 %vm1258_vm5, %v2049_v54 }
 0x2bb   : > { %v1357_v61 = vpop.f32.mrb[13].mxu1  ;;  %2168 = vmatprep.mubr.bf16.mxu1 %v5280_v1  ;;  %v1366_v3 = vadd.f32 %v3553_v58, %v4380_v43 }
 0x2bc   : > { %v3554_v63 = vpop.f32.mrb[14].mxu1  ;;  %v1358_v7 = vadd.f32 %v4380_v43, %v1357_v61 }
 0x2bd   : > { %v1369_v5 = vadd.f32 %v3554_v63, %v4380_v43  ;;  %v1360_v6 = vpop.f32.mrb[15].mxu1 }
 0x2be   : > { %v1361_v8 = vadd.f32 %v4380_v43, %v1360_v6 }
 0x2bf   : > { %v2051_v9 = vpack.c.bf16 %v1369_v5, %v1366_v3 }
 0x2c0   : > { %v2050_v11 = vpack.c.bf16 %v1361_v8, %v1358_v7 }
 0x2c2   : > { %3450 = vmatmul.mubr.msk.bf16.gmra.mrb[88].mxu1 %vm1258_vm5, %v2050_v11  ;;  %v4449_v11 = vld [vmem:[%s5265_s12] ss:$0 sm:$0xff] }
 0x2c3   : > { %2178 = vmatprep.mubr.bf16.mxu1 %v5280_v1 }
 0x2ca   : > { %v3557_v12 = vpop.f32.mrb[16].mxu1  ;;  %3451 = vmatmul.mubr.msk.bf16.gmra.mrb[92].mxu1 %vm1258_vm5, %v2051_v9 }
 0x2cb   : > { %v1373_v13 = vpop.f32.mrb[17].mxu1  ;;  %2188 = vmatprep.mubr.bf16.mxu1 %v5280_v1  ;;  %v1382_v16 = vadd.f32 %v3557_v12, %v4380_v43 }
 0x2cc   : > { %v3558_v15 = vpop.f32.mrb[18].mxu1  ;;  %v1374_v20 = vadd.f32 %v4380_v43, %v1373_v13 }
 0x2cd   : > { %v1385_v17 = vadd.f32 %v3558_v15, %v4380_v43  ;;  %v1376_v18 = vpop.f32.mrb[19].mxu1 }
 0x2ce   : > { %v1377_v21 = vadd.f32 %v4380_v43, %v1376_v18 }
 0x2cf   : > { %v2053_v14 = vpack.c.bf16 %v1385_v17, %v1382_v16 }
 0x2d0   : > { %v2052_v22 = vpack.c.bf16 %v1377_v21, %v1374_v20 }
 0x2d2   : > { %3452 = vmatmul.mubr.msk.bf16.gmra.mrb[96].mxu1 %vm1258_vm5, %v2052_v22 }
 0x2d3   : > { %2198 = vmatprep.mubr.bf16.mxu1 %v5280_v1 }
 0x2da   : > { %v3561_v23 = vpop.f32.mrb[20].mxu1  ;;  %3453 = vmatmul.mubr.msk.bf16.gmra.mrb[100].mxu1 %vm1258_vm5, %v2053_v14 }
 0x2db   : > { %v1389_v24 = vpop.f32.mrb[21].mxu1  ;;  %2208 = vmatprep.mubr.bf16.mxu1 %v5280_v1  ;;  %v1398_v19 = vadd.f32 %v3561_v23, %v4380_v43 }
 0x2dc   : > { %v3562_v26 = vpop.f32.mrb[22].mxu1  ;;  %v1390_v28 = vadd.f32 %v4380_v43, %v1389_v24 }
 0x2dd   : > { %v1401_v27 = vadd.f32 %v3562_v26, %v4380_v43  ;;  %v1392_v32 = vpop.f32.mrb[23].mxu1 }
 0x2de   : > { %v1393_v25 = vadd.f32 %v4380_v43, %v1392_v32 }
 0x2df   : > { %v2055_v30 = vpack.c.bf16 %v1401_v27, %v1398_v19 }
 0x2e0   : > { %v2054_v31 = vpack.c.bf16 %v1393_v25, %v1390_v28 }
 0x2e2   : > { %v3565_v34 = vpop.f32.mrb[24].mxu1  ;;  %3454 = vmatmul.mubr.msk.bf16.gmra.mrb[104].mxu1 %vm1258_vm5, %v2054_v31 }
 0x2e3   : > { %v1405_v36 = vpop.f32.mrb[25].mxu1  ;;  %2218 = vmatprep.mubr.bf16.mxu1 %v5280_v1  ;;  %v1414_v33 = vadd.f32 %v3565_v34, %v4380_v43 }
 0x2e4   : > { %v3566_v50 = vpop.f32.mrb[26].mxu1  ;;  %v1406_v37 = vadd.f32 %v4380_v43, %v1405_v36 }
 0x2e5   : > { %v1417_v49 = vadd.f32 %v3566_v50, %v4380_v43  ;;  %v1408_v59 = vpop.f32.mrb[27].mxu1 }
 0x2e6   : > { %v1409_v60 = vadd.f32 %v4380_v43, %v1408_v59 }
 0x2e7   : > { %v2057_v56 = vpack.c.bf16 %v1417_v49, %v1414_v33 }
 0x2e8   : > { %v2056_v57 = vpack.c.bf16 %v1409_v60, %v1406_v37 }
 0x2ea   : > { %v3569_v38 = vpop.f32.mrb[28].mxu1  ;;  %3455 = vmatmul.mubr.msk.bf16.gmra.mrb[108].mxu1 %vm1258_vm5, %v2055_v30 }
 0x2eb   : > { %v1421_v40 = vpop.f32.mrb[29].mxu1  ;;  %2228 = vmatprep.mubr.bf16.mxu1 %v5280_v1  ;;  %v1430_v42 = vadd.f32 %v3569_v38, %v4380_v43 }
 0x2ec   : > { %v3570_v41 = vpop.f32.mrb[30].mxu1  ;;  %v1422_v2 = vadd.f32 %v4380_v43, %v1421_v40 }
 0x2ed   : > { %v1433_v29 = vadd.f32 %v3570_v41, %v4380_v43  ;;  %v1424_v44 = vpop.f32.mrb[31].mxu1 }
 0x2ee   : > { %v1425_v62 = vadd.f32 %v4380_v43, %v1424_v44 }
 0x2ef   : > { %v2059_v0 = vpack.c.bf16 %v1433_v29, %v1430_v42 }
 0x2f0   : > { %v2058_v4 = vpack.c.bf16 %v1425_v62, %v1422_v2 }
 0x2f2   : > { %v3573_v35 = vpop.f32.mrb[32].mxu1  ;;  %3456 = vmatmul.mubr.msk.bf16.gmra.mrb[112].mxu1 %vm1258_vm5, %v2056_v57 }
 0x2f3   : > { %v1437_v39 = vpop.f32.mrb[33].mxu1  ;;  %2238 = vmatprep.mubr.bf16.mxu1 %v5280_v1  ;;  %v1446_v46 = vadd.f32 %v3573_v35, %v4380_v43 }
 0x2f4   : > { %v3574_v45 = vpop.f32.mrb[34].mxu1  ;;  %v1438_v51 = vadd.f32 %v4380_v43, %v1437_v39 }
 0x2f5   : > { %v1449_v47 = vadd.f32 %v3574_v45, %v4380_v43  ;;  %v1440_v48 = vpop.f32.mrb[35].mxu1 }
 0x2f6   : > { %v1441_v52 = vadd.f32 %v4380_v43, %v1440_v48 }
 0x2f7   : > { %v2061_v53 = vpack.c.bf16 %v1449_v47, %v1446_v46 }
 0x2f8   : > { %v2060_v54 = vpack.c.bf16 %v1441_v52, %v1438_v51 }
 0x2fa   : > { %v3577_v55 = vpop.f32.mrb[36].mxu1  ;;  %3457 = vmatmul.mubr.msk.bf16.gmra.mrb[116].mxu1 %vm1258_vm5, %v2057_v56 }
 0x2fb   : > { %v1453_v58 = vpop.f32.mrb[37].mxu1  ;;  %2248 = vmatprep.mubr.bf16.mxu1 %v5280_v1  ;;  %v4437_v63 = vadd.f32 %v3577_v55, %v4380_v43 }
 0x2fc   : > { %v3578_v61 = vpop.f32.mrb[38].mxu1  ;;  %v1454_v6 = vadd.f32 %v4380_v43, %v1453_v58 }
 0x2fd   : > { %v4440_v3 = vadd.f32 %v3578_v61, %v4380_v43  ;;  %v1456_v5 = vpop.f32.mrb[39].mxu1 }
 0x2fe   : > { %v1457_v7 = vadd.f32 %v4380_v43, %v1456_v5 }
 0x2ff   : > { %v2063_v8 = vpack.c.bf16 %v4440_v3, %v4437_v63 }
 0x300   : > { %v2062_v9 = vpack.c.bf16 %v1457_v7, %v1454_v6 }
 0x302   : > { %v3585_v10 = vpop.f32.mrb[40].mxu1  ;;  %3458 = vmatmul.mubr.msk.bf16.gmra.mrb[120].mxu1 %vm1258_vm5, %v2058_v4 }
 0x303   : > { %v1525_v12 = vpop.f32.mrb[41].mxu1  ;;  %2258 = vmatprep.mubr.bf16.mxu1 %v5280_v1  ;;  %v4454_v15 = vadd.f32 %v3585_v10, %v4449_v11 }
 0x304   : > { %v3586_v13 = vpop.f32.mrb[42].mxu1  ;;  %v1526_v17 = vadd.f32 %v4449_v11, %v1525_v12 }
 0x305   : > { %v4457_v43 = vadd.f32 %v3586_v13, %v4449_v11  ;;  %v1528_v16 = vpop.f32.mrb[43].mxu1 }
 0x306   : > { %v1529_v18 = vadd.f32 %v4449_v11, %v1528_v16 }
 0x307   : > { %v2794_v20 = vpack.c.bf16 %v4457_v43, %v4454_v15 }
 0x308   : > { %v2793_v21 = vpack.c.bf16 %v1529_v18, %v1526_v17 }
 0x30a   : > { %v3589_v14 = vpop.f32.mrb[44].mxu1  ;;  %3459 = vmatmul.mubr.msk.bf16.gmra.mrb[124].mxu1 %vm1258_vm5, %v2059_v0 }
 0x30b   : > { %v1541_v22 = vpop.f32.mrb[45].mxu1  ;;  %2268 = vmatprep.mubr.bf16.mxu1 %v5280_v1  ;;  %v4466_v24 = vadd.f32 %v3589_v14, %v4449_v11 }
 0x30c   : > { %v3590_v23 = vpop.f32.mrb[46].mxu1  ;;  %v1542_v27 = vadd.f32 %v4449_v11, %v1541_v22 }
 0x30d   : > { %v4469_v26 = vadd.f32 %v3590_v23, %v4449_v11  ;;  %v1544_v19 = vpop.f32.mrb[47].mxu1 }
 0x30e   : > { %v1545_v32 = vadd.f32 %v4449_v11, %v1544_v19 }
 0x30f   : > { %v2796_v28 = vpack.c.bf16 %v4469_v26, %v4466_v24 }
 0x310   : > { %v2795_v25 = vpack.c.bf16 %v1545_v32, %v1542_v27 }
 0x312   : > { %v3593_v30 = vpop.f32.mrb[48].mxu1  ;;  %3460 = vmatmul.mubr.msk.bf16.gmra.mrb[128].mxu1 %vm1258_vm5, %v2060_v54 }
 0x313   : > { %v1557_v31 = vpop.f32.mrb[49].mxu1  ;;  %2278 = vmatprep.mubr.bf16.mxu1 %v5280_v1  ;;  %v4478_v36 = vadd.f32 %v3593_v30, %v4449_v11 }
 0x314   : > { %v3594_v34 = vpop.f32.mrb[50].mxu1  ;;  %v1558_v49 = vadd.f32 %v4449_v11, %v1557_v31  ;;  %v1667_v31 = vpop.permute.xlu0 %1666 }
 0x315   : > { %v4481_v50 = vadd.f32 %v3594_v34, %v4449_v11  ;;  %v1560_v33 = vpop.f32.mrb[51].mxu1 }
 0x316   : > { %v1561_v59 = vadd.f32 %v4449_v11, %v1560_v33 }
 0x317   : > { %v2798_v37 = vpack.c.bf16 %v4481_v50, %v4478_v36 }
 0x318   : > { %v2797_v60 = vpack.c.bf16 %v1561_v59, %v1558_v49 }
 0x31a   : > { %v3597_v56 = vpop.f32.mrb[52].mxu1  ;;  %3461 = vmatmul.mubr.msk.bf16.gmra.mrb[132].mxu1 %vm1258_vm5, %v2061_v53 }
 0x31b   : > { %v1573_v57 = vpop.f32.mrb[53].mxu1  ;;  %2288 = vmatprep.mubr.bf16.mxu1 %v5280_v1  ;;  %v4490_v40 = vadd.f32 %v3597_v56, %v4449_v11 }
 0x31c   : > { %v3598_v38 = vpop.f32.mrb[54].mxu1  ;;  %v4496_v29 = vadd.f32 %v4449_v11, %v1573_v57 }
 0x31d   : > { %v4493_v41 = vadd.f32 %v3598_v38, %v4449_v11  ;;  %v1576_v42 = vpop.f32.mrb[55].mxu1  ;;  %v1677_v38 = vpop.permute.xlu0 %1676 }
 0x31e   : > { %v1577_v44 = vadd.f32 %v4449_v11, %v1576_v42 }
 0x31f   : > { %v2800_v2 = vpack.c.bf16 %v4493_v41, %v4490_v40 }
 0x320   : > { %v2799_v62 = vpack.c.bf16 %v1577_v44, %v4496_v29 }
 0x322   : > { %v3601_v0 = vpop.f32.mrb[56].mxu1  ;;  %3462 = vmatmul.mubr.msk.bf16.gmra.mrb[136].mxu1 %vm1258_vm5, %v2062_v9 }
 0x323   : > { %v1589_v4 = vpop.f32.mrb[57].mxu1  ;;  %2298 = vmatprep.mubr.bf16.mxu1 %v5280_v1  ;;  %v1598_v39 = vadd.f32 %v3601_v0, %v4449_v11 }
 0x324   : > { %v3602_v35 = vpop.f32.mrb[58].mxu1  ;;  %v1590_v47 = vadd.f32 %v4449_v11, %v1589_v4 }
 0x325   : > { %v1601_v45 = vadd.f32 %v3602_v35, %v4449_v11  ;;  %v1592_v46 = vpop.f32.mrb[59].mxu1 }
 0x326   : > { %v1593_v48 = vadd.f32 %v4449_v11, %v1592_v46 }
 0x327   : > { %v2802_v51 = vpack.c.bf16 %v1601_v45, %v1598_v39  ;;  %v4536_v45 = vpop.f32.mrb[16].mxu0 }
 0x328   : > { %v2801_v52 = vpack.c.bf16 %v1593_v48, %v1590_v47  ;;  %5335 = vst [vmem:[#allocation2_spill] sm:$0xff] %v4536_v45  ;;  %v4538_v40 = vpop.f32.mrb[17].mxu0 }
 0x329   : > { %5336 = vst [vmem:[#allocation3_spill] sm:$0xff] %v4538_v40  ;;  %v4540_v41 = vpop.f32.mrb[18].mxu0 }
 0x32a   : > { %v3605_v53 = vpop.f32.mrb[60].mxu1  ;;  %3463 = vmatmul.mubr.msk.bf16.gmra.mrb[140].mxu1 %vm1258_vm5, %v2063_v8  ;;  %3515 = vmatprep.subr.bf16.mxu0 %v2801_v52  ;;  %5337 = vst [vmem:[#allocation4_spill] sm:$0xff] %v4540_v41 }
 0x32b   : > { %v1605_v54 = vpop.f32.mrb[61].mxu1  ;;  %3516 = vmatpush3.bf16.msra.mxu0 %v2793_v21  ;;  %v1614_v58 = vadd.f32 %v3605_v53, %v4449_v11 }
 0x32c   : > { %v3606_v55 = vpop.f32.mrb[62].mxu1  ;;  %3517 = vmatprep.subr.bf16.mxu0 %v2802_v51  ;;  %v1606_v6 = vadd.f32 %v4449_v11, %v1605_v54 }
 0x32d   : > { %v1617_v61 = vadd.f32 %v3606_v55, %v4449_v11  ;;  %v1608_v5 = vpop.f32.mrb[63].mxu1 }
 0x32e   : > { %v1609_v7 = vadd.f32 %v4449_v11, %v1608_v5 }
 0x32f   : > { %v2804_v9 = vpack.c.bf16 %v1617_v61, %v1614_v58  ;;  %3518 = vmatpush3.bf16.msra.mxu0 %v2794_v20 }
 0x330   : > { %v2803_v63 = vpack.c.bf16 %v1609_v7, %v1606_v6 }
 0x332   : > { %v3609_v3 = vpop.f32.mrb[64].mxu1  ;;  %3519 = vmatprep.subr.bf16.mxu0 %v2803_v63 }
 0x333   : > { %v1621_v8 = vpop.f32.mrb[65].mxu1  ;;  %3520 = vmatpush3.bf16.msra.mxu0 %v2795_v25  ;;  %v1630_v12 = vadd.f32 %v3609_v3, %v4449_v11 }
 0x334   : > { %v3610_v10 = vpop.f32.mrb[66].mxu1  ;;  %3521 = vmatprep.subr.bf16.mxu0 %v2804_v9  ;;  %v1622_v17 = vadd.f32 %v4449_v11, %v1621_v8 }
 0x335   : > { %v1633_v13 = vadd.f32 %v3610_v10, %v4449_v11  ;;  %v1624_v16 = vpop.f32.mrb[67].mxu1 }
 0x336   : > { %v1625_v18 = vadd.f32 %v4449_v11, %v1624_v16 }
 0x337   : > { %v2806_v21 = vpack.c.bf16 %v1633_v13, %v1630_v12  ;;  %3522 = vmatpush3.bf16.msra.mxu0 %v2796_v28  ;;  %v1672_v28 = vpop.permute.xlu1 %1671 }
 0x338   : > { %v2805_v15 = vpack.c.bf16 %v1625_v18, %v1622_v17 }
 0x33a   : > { %v3613_v43 = vpop.f32.mrb[68].mxu1  ;;  %3523 = vmatprep.subr.bf16.mxu0 %v2805_v15 }
 0x33b   : > { %v1637_v20 = vpop.f32.mrb[69].mxu1  ;;  %3524 = vmatpush3.bf16.msra.mxu0 %v2797_v60  ;;  %v1646_v22 = vadd.f32 %v3613_v43, %v4449_v11 }
 0x33c   : > { %v3614_v14 = vpop.f32.mrb[70].mxu1  ;;  %3525 = vmatprep.subr.bf16.mxu0 %v2806_v21  ;;  %v1638_v27 = vadd.f32 %v4449_v11, %v1637_v20 }
 0x33d   : > { %v1649_v23 = vadd.f32 %v3614_v14, %v4449_v11  ;;  %v1640_v19 = vpop.f32.mrb[71].mxu1 }
 0x33e   : > { %v1641_v32 = vadd.f32 %v4449_v11, %v1640_v19 }
 0x33f   : > { %v2808_v25 = vpack.c.bf16 %v1649_v23, %v1646_v22  ;;  %3526 = vmatpush3.bf16.msra.mxu0 %v2798_v37  ;;  %v1682_v37 = vpop.permute.xlu1 %1681 }
 0x340   : > { %v2807_v24 = vpack.c.bf16 %v1641_v32, %v1638_v27 }
 0x342   : > { %v1734_v26 = vpop.f32.mrb[72].mxu1  ;;  %3527 = vmatprep.subr.bf16.mxu0 %v2807_v24 }
 0x343   : > { %v1736_v30 = vpop.f32.mrb[73].mxu1  ;;  %3528 = vmatpush3.bf16.msra.mxu0 %v2799_v62  ;;  %v1735_v33 = vadd.f32 %v1734_v26, %v1667_v31 }
 0x344   : > { %v1738_v34 = vpop.f32.mrb[74].mxu1  ;;  %3529 = vmatprep.subr.bf16.mxu0 %v2808_v25  ;;  %v1737_v60 = vadd.f32 %v1736_v30, %v1667_v31 }
 0x345   : > { %v1739_v49 = vadd.f32 %v1738_v34, %v1672_v28  ;;  %v1740_v59 = vpop.f32.mrb[75].mxu1 }
 0x346   : > { %v1741_v56 = vadd.f32 %v1740_v59, %v1672_v28 }
 0x347   : > { %v2789_v11 = vpack.c.bf16 %v1739_v49, %v1735_v33  ;;  %3530 = vmatpush3.bf16.msra.mxu0 %v2800_v2  ;;  %v4542_v2 = vpop.f32.mrb[19].mxu0 }
 0x348   : > { %v2790_v36 = vpack.c.bf16 %v1741_v56, %v1737_v60  ;;  %5338 = vst [vmem:[#allocation5_spill] sm:$0xff] %v4542_v2  ;;  %v4544_v46 = vpop.f32.mrb[20].mxu0 }
 0x349   : > { %5339 = vst [vmem:[#allocation6_spill] sm:$0xff] %v4544_v46  ;;  %v4546_v47 = vpop.f32.mrb[21].mxu0 }
 0x34a   : > { %v1744_v50 = vpop.f32.mrb[76].mxu1  ;;  %2841 = vmatprep.mubr.bf16.mxu0 %v2790_v36  ;;  %5340 = vst [vmem:[#allocation7_spill] sm:$0xff] %v4546_v47  ;;  %v4548_v48 = vpop.f32.mrb[22].mxu0 }
 0x34b   : > { %v1746_v57 = vpop.f32.mrb[77].mxu1  ;;  %2842 = vmatmul.mubr.bf16.vlgmr.msra.gmra.mrb[32].mxu0 %v2789_v11  ;;  %v1745_v29 = vadd.f32 %v1744_v50, %v1677_v38  ;;  %5341 = vst [vmem:[#allocation8_spill] sm:$0xff] %v4548_v48  ;;  %v4550_v51 = vpop.f32.mrb[23].mxu0 }
 0x34c   : > { %v1748_v42 = vpop.f32.mrb[78].mxu1  ;;  %v1747_v0 = vadd.f32 %v1746_v57, %v1677_v38  ;;  %5342 = vst [vmem:[#allocation9_spill] sm:$0xff] %v4550_v51  ;;  %v4552_v52 = vpop.f32.mrb[24].mxu0 }
 0x34d   : > { %v1749_v44 = vadd.f32 %v1748_v42, %v1682_v37  ;;  %v1750_v62 = vpop.f32.mrb[79].mxu1  ;;  %5343 = vst [vmem:[#allocation10_spill] sm:$0xff] %v4552_v52  ;;  %v4554_v53 = vpop.f32.mrb[25].mxu0 }
 0x34e   : > { %v1751_v4 = vadd.f32 %v1750_v62, %v1682_v37  ;;  %5344 = vst [vmem:[#allocation11_spill] sm:$0xff] %v4554_v53  ;;  %v4556_v54 = vpop.f32.mrb[26].mxu0 }
 0x34f   : > { %v2791_v35 = vpack.c.bf16 %v1749_v44, %v1745_v29  ;;  %5345 = vst [vmem:[#allocation12_spill] sm:$0xff] %v4556_v54  ;;  %v4558_v55 = vpop.f32.mrb[27].mxu0 }
 0x350   : > { %v2792_v39 = vpack.c.bf16 %v1751_v4, %v1747_v0  ;;  %5346 = vst [vmem:[#allocation13_spill] sm:$0xff] %v4558_v55  ;;  %v4584_v16 = vpop.f32.mrb[28].mxu0 }
 0x351   : > { %5347 = vst [vmem:[#allocation14_spill] sm:$0xff] %v4584_v16  ;;  %v4588_v18 = vpop.f32.mrb[29].mxu0 }
 0x352   : > { %2849 = vmatprep.mubr.bf16.mxu0 %v2792_v39  ;;  %5348 = vst [vmem:[#allocation15_spill] sm:$0xff] %v4588_v18  ;;  %v4592_v15 = vpop.f32.mrb[30].mxu0 }
 0x353   : > { %2850 = vmatmul.mubr.bf16.gmra.mrb[36].mxu0 %v2791_v35  ;;  %5349 = vst [vmem:[#allocation16_spill] sm:$0xff] %v4592_v15  ;;  %v4598_v14 = vpop.f32.mrb[31].mxu0 }
 0x354   : > { %5350 = vst [vmem:[#allocation17_spill] sm:$0xff] %v4598_v14 }
 0x385   : > { %v4560_v58 = vpop.f32.mrb[80].mxu1 }
 0x386   : > { %v4562_v61 = vpop.f32.mrb[81].mxu1 }
 0x387   : > { %v4564_v5 = vpop.f32.mrb[82].mxu1  ;;  %v2309_v6 = vmax.f32 %v4560_v58, %v4562_v61 }
 0x388   : > { %v4568_v7 = vpop.f32.mrb[83].mxu1 }
 0x389   : > { %2310 = vmax.xlane.f32.xlu0 %v2309_v6  ;;  %v2312_v9 = vmax.f32 %v4564_v5, %v4568_v7 }
 0x38b   : > { %2313 = vmax.xlane.f32.xlu1 %v2312_v9 }
 0x38d   : > { %v4572_v63 = vpop.f32.mrb[84].mxu1 }
 0x38e   : > { %v4574_v3 = vpop.f32.mrb[85].mxu1 }
 0x38f   : > { %v4576_v8 = vpop.f32.mrb[86].mxu1  ;;  %v2315_v10 = vmax.f32 %v4572_v63, %v4574_v3 }
 0x390   : > { %v4580_v12 = vpop.f32.mrb[87].mxu1 }
 0x391   : > { %2316 = vmax.xlane.f32.xlu0 %v2315_v10  ;;  %v2318_v13 = vmax.f32 %v4576_v8, %v4580_v12 }
 0x395   : > { %2319 = vmax.xlane.f32.xlu0 %v2318_v13  ;;  %v4586_v17 = vpop.f32.mrb[88].mxu1 }
 0x396   : > { %v4590_v21 = vpop.f32.mrb[89].mxu1 }
 0x397   : > { %v4594_v43 = vpop.f32.mrb[90].mxu1  ;;  %v2321_v20 = vmax.f32 %v4586_v17, %v4590_v21 }
 0x398   : > { %v4600_v22 = vpop.f32.mrb[91].mxu1 }
 0x399   : > { %2322 = vmax.xlane.f32.xlu1 %v2321_v20  ;;  %v2324_v23 = vmax.f32 %v4594_v43, %v4600_v22 }
 0x39b   : > { %2325 = vmax.xlane.f32.xlu0 %v2324_v23 }
 0x39d   : > { %v4604_v19 = vpop.f32.mrb[92].mxu1 }
 0x39e   : > { %v4606_v27 = vpop.f32.mrb[93].mxu1 }
 0x39f   : > { %v4608_v32 = vpop.f32.mrb[94].mxu1  ;;  %v2327_v25 = vmax.f32 %v4604_v19, %v4606_v27 }
 0x3a0   : > { %v4612_v24 = vpop.f32.mrb[95].mxu1 }
 0x3a1   : > { %2328 = vmax.xlane.f32.xlu1 %v2327_v25  ;;  %v2330_v26 = vmax.f32 %v4608_v32, %v4612_v24 }
 0x3a3   : > { %2331 = vmax.xlane.f32.xlu0 %v2330_v26 }
 0x3a5   : > { %v4616_v28 = vpop.f32.mrb[96].mxu1 }
 0x3a6   : > { %v4618_v30 = vpop.f32.mrb[97].mxu1 }
 0x3a7   : > { %v4620_v31 = vpop.f32.mrb[98].mxu1  ;;  %v2333_v34 = vmax.f32 %v4616_v28, %v4618_v30 }
 0x3a8   : > { %v4624_v33 = vpop.f32.mrb[99].mxu1 }
 0x3a9   : > { %2334 = vmax.xlane.f32.xlu1 %v2333_v34  ;;  %v2336_v49 = vmax.f32 %v4620_v31, %v4624_v33 }
 0x3ab   : > { %2337 = vmax.xlane.f32.xlu0 %v2336_v49 }
 0x3ad   : > { %v4628_v59 = vpop.f32.mrb[100].mxu1 }
 0x3ae   : > { %v4630_v60 = vpop.f32.mrb[101].mxu1 }
 0x3af   : > { %v4632_v56 = vpop.f32.mrb[102].mxu1  ;;  %v2339_v11 = vmax.f32 %v4628_v59, %v4630_v60 }
 0x3b0   : > { %v4636_v36 = vpop.f32.mrb[103].mxu1 }
 0x3b1   : > { %2340 = vmax.xlane.f32.xlu1 %v2339_v11  ;;  %v2342_v50 = vmax.f32 %v4632_v56, %v4636_v36 }
 0x3b3   : > { %2343 = vmax.xlane.f32.xlu0 %v2342_v50 }
 0x3b5   : > { %v4640_v37 = vpop.f32.mrb[104].mxu1 }
 0x3b6   : > { %v4642_v57 = vpop.f32.mrb[105].mxu1 }
 0x3b7   : > { %v4644_v38 = vpop.f32.mrb[106].mxu1  ;;  %v2345_v42 = vmax.f32 %v4640_v37, %v4642_v57 }
 0x3b8   : > { %v4648_v29 = vpop.f32.mrb[107].mxu1 }
 0x3b9   : > { %2346 = vmax.xlane.f32.xlu1 %v2345_v42  ;;  %v2348_v44 = vmax.f32 %v4644_v38, %v4648_v29 }
 0x3bb   : > { %2349 = vmax.xlane.f32.xlu0 %v2348_v44 }
 0x3bd   : > { %v4652_v62 = vpop.f32.mrb[108].mxu1 }
 0x3be   : > { %v4654_v0 = vpop.f32.mrb[109].mxu1 }
 0x3bf   : > { %5351 = vst [vmem:[#allocation18_spill] sm:$0xff] %v4654_v0  ;;  %v4656_v4 = vpop.f32.mrb[110].mxu1  ;;  %v2351_v35 = vmax.f32 %v4652_v62, %v4654_v0 }
 0x3c0   : > { %5352 = vst [vmem:[#allocation19_spill] sm:$0xff] %v4656_v4  ;;  %v4660_v39 = vpop.f32.mrb[111].mxu1 }
 0x3c1   : > { %5353 = vst [vmem:[#allocation20_spill] sm:$0xff] %v4660_v39  ;;  %2352 = vmax.xlane.f32.xlu1 %v2351_v35  ;;  %v2354_v6 = vmax.f32 %v4656_v4, %v4660_v39 }
 0x3c3   : > { %2355 = vmax.xlane.f32.xlu0 %v2354_v6 }
 0x3c5   : > { %v4664_v9 = vpop.f32.mrb[112].mxu1 }
 0x3c6   : > { %5354 = vst [vmem:[#allocation21_spill] sm:$0xff] %v4664_v9  ;;  %v4666_v10 = vpop.f32.mrb[113].mxu1 }
 0x3c7   : > { %5355 = vst [vmem:[#allocation22_spill] sm:$0xff] %v4666_v10  ;;  %v4668_v13 = vpop.f32.mrb[114].mxu1  ;;  %v2357_v20 = vmax.f32 %v4664_v9, %v4666_v10 }
 0x3c8   : > { %5356 = vst [vmem:[#allocation23_spill] sm:$0xff] %v4668_v13  ;;  %v4672_v23 = vpop.f32.mrb[115].mxu1 }
 0x3c9   : > { %5357 = vst [vmem:[#allocation24_spill] sm:$0xff] %v4672_v23  ;;  %2358 = vmax.xlane.f32.xlu1 %v2357_v20  ;;  %v2360_v25 = vmax.f32 %v4668_v13, %v4672_v23 }
 0x3cb   : > { %2361 = vmax.xlane.f32.xlu0 %v2360_v25 }
 0x3cd   : > { %v4676_v26 = vpop.f32.mrb[116].mxu1 }
 0x3ce   : > { %5358 = vst [vmem:[#allocation25_spill] sm:$0xff] %v4676_v26  ;;  %v4678_v34 = vpop.f32.mrb[117].mxu1 }
 0x3cf   : > { %5359 = vst [vmem:[#allocation26_spill] sm:$0xff] %v4678_v34  ;;  %v4680_v49 = vpop.f32.mrb[118].mxu1  ;;  %v2363_v11 = vmax.f32 %v4676_v26, %v4678_v34 }
 0x3d0   : > { %5360 = vst [vmem:[#allocation27_spill] sm:$0xff] %v4680_v49  ;;  %v4684_v50 = vpop.f32.mrb[119].mxu1 }
 0x3d1   : > { %5361 = vst [vmem:[#allocation28_spill] sm:$0xff] %v4684_v50  ;;  %2364 = vmax.xlane.f32.xlu1 %v2363_v11  ;;  %v2366_v42 = vmax.f32 %v4680_v49, %v4684_v50 }
 0x3d3   : > { %2367 = vmax.xlane.f32.xlu0 %v2366_v42 }
 0x3d5   : > { %v4688_v44 = vpop.f32.mrb[120].mxu1 }
 0x3d6   : > { %5362 = vst [vmem:[#allocation29_spill] sm:$0xff] %v4688_v44  ;;  %v4690_v35 = vpop.f32.mrb[121].mxu1 }
 0x3d7   : > { %5363 = vst [vmem:[#allocation30_spill] sm:$0xff] %v4690_v35  ;;  %v4692_v6 = vpop.f32.mrb[122].mxu1  ;;  %v2369_v20 = vmax.f32 %v4688_v44, %v4690_v35 }
 0x3d8   : > { %5364 = vst [vmem:[#allocation31_spill] sm:$0xff] %v4692_v6  ;;  %v4696_v25 = vpop.f32.mrb[123].mxu1 }
 0x3d9   : > { %5365 = vst [vmem:[#allocation32_spill] sm:$0xff] %v4696_v25  ;;  %2370 = vmax.xlane.f32.xlu0 %v2369_v20  ;;  %v2372_v1 = vmax.f32 %v4692_v6, %v4696_v25 }
 0x3db   : > { %2373 = vmax.xlane.f32.xlu1 %v2372_v1 }
 0x3dd   : > { %v4700_v11 = vpop.f32.mrb[124].mxu1 }
 0x3de   : > { %5366 = vst [vmem:[#allocation33_spill] sm:$0xff] %v4700_v11  ;;  %v4702_v14 = vpop.f32.mrb[125].mxu1 }
 0x3df   : > { %5367 = vst [vmem:[#allocation34_spill] sm:$0xff] %v4702_v14  ;;  %v4704_v42 = vpop.f32.mrb[126].mxu1  ;;  %v2375_v15 = vmax.f32 %v4700_v11, %v4702_v14 }
 0x3e0   : > { %v4708_v18 = vpop.f32.mrb[127].mxu1 }
 0x3e1   : > { %2376 = vmax.xlane.f32.xlu0 %v2375_v15 }
 0x3e5   : > { %v4712_v20 = vpop.f32.mrb[128].mxu1 }
 0x3e6   : > { %v4714_v55 = vpop.f32.mrb[129].mxu1 }
 0x3e7   : > { %v4716_v1 = vpop.f32.mrb[130].mxu1 }
 0x3e8   : > { %v4720_v53 = vpop.f32.mrb[131].mxu1 }
 0x3ed   : > { %v4724_v51 = vpop.f32.mrb[132].mxu1 }
 0x3ee   : > { %v4726_v15 = vpop.f32.mrb[133].mxu1 }
 0x3ef   : > { %v4728_v48 = vpop.f32.mrb[134].mxu1 }
 0x3f0   : > { %v4732_v47 = vpop.f32.mrb[135].mxu1 }
 0x3f5   : > { %v4736_v54 = vpop.f32.mrb[136].mxu1 }
 0x3f6   : > { %v4738_v2 = vpop.f32.mrb[137].mxu1 }
 0x3f7   : > { %v4740_v41 = vpop.f32.mrb[138].mxu1 }
 0x3f8   : > { %v4744_v40 = vpop.f32.mrb[139].mxu1 }
 0x3fd   : > { %v4748_v16 = vpop.f32.mrb[140].mxu1 }
 0x3fe   : > { %v4750_v14 = vpop.f32.mrb[141].mxu1 }
 0x3ff   : > { %v4752_v11 = vpop.f32.mrb[142].mxu1 }
 0x400   : > { %v4756_v25 = vpop.f32.mrb[143].mxu1 }
 0x416   : > { %v2311_v35 = vpop.xlane.xlu0 %2310 }
 0x417   : > { %v2405_v9 = vsub.f32 %v4560_v58, %v2311_v35 }
 0x418   : > { %v2314_v13 = vpop.xlane.xlu1 %2313 }
 0x41e   : > { %v3531_v52 = vpop.f32.mrb[32].mxu0  ;;  %v2317_v23 = vpop.xlane.xlu0 %2316 }
 0x41f   : > { %v3532_v44 = vpop.f32.mrb[33].mxu0 }
 0x420   : > { %v4760_v50 = vadd.f32 %v3532_v44, %v3531_v52  ;;  %v3534_v45 = vpop.f32.mrb[34].mxu0 }
 0x421   : > { %v3535_v49 = vpop.f32.mrb[35].mxu0 }
 0x422   : > { %5368 = vst [vmem:[#allocation35_spill] sm:$0xff] %v4760_v50  ;;  %v4762_v34 = vadd.f32 %v3535_v49, %v3534_v45  ;;  %v2858_v26 = vsel %vm1258_vm5, %v4760_v50, -inf  ;;  %v2407_v45 = vsub.f32 %v4564_v5, %v2314_v13  ;;  %v2320_v49 = vpop.xlane.xlu0 %2319  ;;  %v2408_v50 = vsub.f32 %v4568_v7, %v2314_v13 }
 0x423   : > { %2859 = vmax.xlane.f32.xlu1 %v2858_v26  ;;  %v2411_v58 = vsub.f32 %v4576_v8, %v2320_v49  ;;  %v2412_v5 = vsub.f32 %v4580_v12, %v2320_v49 }
 0x424   : > { %5369 = vst [vmem:[#allocation36_spill] sm:$0xff] %v4762_v34  ;;  %v2861_v46 = vsel %vm1258_vm5, %v4762_v34, -inf  ;;  %v2469_v34 = vmul.f32 1.442695, %v2405_v9  ;;  %v2475_v7 = vmul.f32 1.442695, %v2408_v50 }
 0x425   : > { %2862 = vmax.xlane.f32.xlu0 %v2861_v46  ;;  %v2406_v46 = vsub.f32 %v4562_v61, %v2311_v35  ;;  %v5371_v61 = vmax.f32 %v4704_v42, %v4708_v18  ;;  %v2481_v8 = vmul.f32 1.442695, %v2411_v58  ;;  %v2483_v35 = vmul.f32 1.442695, %v2412_v5 }
 0x426   : > { %v3537_v6 = vpop.f32.mrb[36].mxu0  ;;  %v2323_v0 = vpop.xlane.xlu1 %2322  ;;  %3679 = vpow2.f32 %v2469_v34 }
 0x427   : > { %v3538_v10 = vpop.f32.mrb[37].mxu0  ;;  %v2413_v9 = vsub.f32 %v4586_v17, %v2323_v0  ;;  %v2414_v34 = vsub.f32 %v4590_v21, %v2323_v0  ;;  %v5373_v17 = vmax.f32 %v4712_v20, %v4714_v55 }
 0x428   : > { %v4769_v52 = vadd.f32 %v3538_v10, %v3537_v6  ;;  %v3540_v44 = vpop.f32.mrb[38].mxu0  ;;  %v2473_v6 = vmul.f32 1.442695, %v2407_v45  ;;  %v2326_v13 = vpop.xlane.xlu0 %2325 }
 0x429   : > { %v3541_v39 = vpop.f32.mrb[39].mxu0  ;;  %v2415_v12 = vsub.f32 %v4594_v43, %v2326_v13  ;;  %v2485_v43 = vmul.f32 1.442695, %v2413_v9 }
 0x42a   : > { %5370 = vst [vmem:[#allocation37_spill] sm:$0xff] %v4769_v52  ;;  %v4773_v4 = vadd.f32 %v3541_v39, %v3540_v44  ;;  %v2864_v26 = vsel %vm1258_vm5, %v4769_v52, -inf  ;;  %v2409_v39 = vsub.f32 %v4572_v63, %v2317_v23  ;;  %v2471_v44 = vmul.f32 1.442695, %v2406_v46 }
 0x42b   : > { %2865 = vmax.xlane.f32.xlu1 %v2864_v26  ;;  %v2410_v52 = vsub.f32 %v4574_v3, %v2317_v23  ;;  %3681 = vpow2.f32 %v2473_v6  ;;  %v5372_v63 = vmax.f32 %v4716_v1, %v4720_v53  ;;  %v2416_v3 = vsub.f32 %v4600_v22, %v2326_v13 }
 0x42c   : > { %v2867_v10 = vsel %vm1258_vm5, %v4773_v4, -inf  ;;  %3683 = vpow2.f32 %v2475_v7  ;;  %v2477_v50 = vmul.f32 1.442695, %v2409_v39  ;;  %v2489_v46 = vmul.f32 1.442695, %v2415_v12 }
 0x42d   : > { %2868 = vmax.xlane.f32.xlu0 %v2867_v10  ;;  %3685 = vpow2.f32 %v2471_v44  ;;  %v2479_v49 = vmul.f32 1.442695, %v2410_v52  ;;  %v5374_v22 = vmax.f32 %v4728_v48, %v4732_v47  ;;  %v2491_v52 = vmul.f32 1.442695, %v2416_v3 }
 0x42e   : > { %v2329_v45 = vpop.xlane.xlu1 %2328  ;;  %3687 = vpow2.f32 %v2481_v8  ;;  %v2487_v10 = vmul.f32 1.442695, %v2414_v34 }
 0x42f   : > { %2379 = vmax.xlane.f32.xlu1 %v5371_v61  ;;  %v2417_v26 = vsub.f32 %v4604_v19, %v2329_v45  ;;  %3689 = vpow2.f32 %v2483_v35  ;;  %v2418_v6 = vsub.f32 %v4606_v27, %v2329_v45  ;;  %v5375_v19 = vmax.f32 %v4724_v51, %v4726_v15 }
 0x430   : > { %v2332_v23 = vpop.xlane.xlu0 %2331  ;;  %3691 = vpow2.f32 %v2477_v50  ;;  %v4812_v44 = vpop.eup %3679  ;;  %v5377_v35 = vmax.f32 %v4736_v54, %v4738_v2 }
 0x431   : > { %2385 = vmax.xlane.f32.xlu0 %v5372_v63  ;;  %v2419_v58 = vsub.f32 %v4608_v32, %v2332_v23  ;;  %v2420_v21 = vsub.f32 %v4612_v24, %v2332_v23  ;;  %3693 = vpow2.f32 %v2479_v49  ;;  %v2493_v5 = vmul.f32 1.442695, %v2417_v26 }
 0x432   : > { %3695 = vpow2.f32 %v2485_v43  ;;  %v5376_v24 = vmax.f32 %v4740_v41, %v4744_v40  ;;  %v2495_v9 = vmul.f32 1.442695, %v2418_v6 }
 0x433   : > { %2382 = vmax.xlane.f32.xlu1 %v5373_v17  ;;  %3697 = vpow2.f32 %v2489_v46  ;;  %v2497_v39 = vmul.f32 1.442695, %v2419_v58  ;;  %v2499_v27 = vmul.f32 1.442695, %v2420_v21  ;;  %v5379_v17 = vmax.f32 %v4748_v16, %v4750_v14 }
 0x434   : > { %3699 = vpow2.f32 %v2491_v52 }
 0x435   : > { %2391 = vmax.xlane.f32.xlu0 %v5374_v22  ;;  %v4815_v8 = vpop.eup %3681  ;;  %3701 = vpow2.f32 %v2487_v10 }
 0x436   : > { %v2335_v0 = vpop.xlane.xlu1 %2334  ;;  %3703 = vpow2.f32 %v2493_v5 }
 0x437   : > { %2388 = vmax.xlane.f32.xlu1 %v5375_v19  ;;  %v2421_v32 = vsub.f32 %v4616_v28, %v2335_v0  ;;  %v2422_v28 = vsub.f32 %v4618_v30, %v2335_v0  ;;  %3705 = vpow2.f32 %v2497_v39 }
 0x438   : > { %v2338_v7 = vpop.xlane.xlu0 %2337  ;;  %3707 = vpow2.f32 %v2499_v27 }
 0x439   : > { %v2423_v13 = vsub.f32 %v4620_v31, %v2338_v7  ;;  %2397 = vmax.xlane.f32.xlu0 %v5376_v24  ;;  %v2424_v61 = vsub.f32 %v4624_v33, %v2338_v7  ;;  %v4821_v31 = vpop.eup %3683  ;;  %v2501_v12 = vmul.f32 1.442695, %v2421_v32  ;;  %v5378_v33 = vmax.f32 %v4752_v11, %v4756_v25 }
 0x43a   : > { %v4823_v45 = vpop.eup %3685  ;;  %3709 = vpow2.f32 %v2495_v9  ;;  %v2503_v49 = vmul.f32 1.442695, %v2422_v28  ;;  %v2600_v43 = vadd.f32 %v4821_v31, %v4815_v8 }
 0x43b   : > { %2394 = vmax.xlane.f32.xlu1 %v5377_v35  ;;  %v2505_v63 = vmul.f32 1.442695, %v2423_v13  ;;  %v4828_v50 = vpop.eup %3687  ;;  %v2507_v30 = vmul.f32 1.442695, %v2424_v61  ;;  %3711 = vpow2.f32 %v2501_v12  ;;  %v2597_v21 = vadd.f32 %v4823_v45, %v4812_v44 }
 0x43c   : > { %v4830_v23 = vpop.eup %3689 }
 0x43d   : > { %2403 = vmax.xlane.f32.xlu0 %v5378_v33  ;;  %v4838_v26 = vpop.eup %3691  ;;  %3713 = vpow2.f32 %v2505_v63  ;;  %v2606_v10 = vadd.f32 %v4830_v23, %v4828_v50 }
 0x43e   : > { %v2341_v3 = vpop.xlane.xlu1 %2340  ;;  %v4841_v22 = vpop.eup %3693  ;;  %3715 = vpow2.f32 %v2507_v30 }
 0x43f   : > { %v2425_v34 = vsub.f32 %v4628_v59, %v2341_v3  ;;  %2400 = vmax.xlane.f32.xlu1 %v5379_v17  ;;  %v2426_v46 = vsub.f32 %v4630_v60, %v2341_v3  ;;  %v4847_v0 = vpop.eup %3695  ;;  %3717 = vpow2.f32 %v2503_v49  ;;  %v2603_v7 = vadd.f32 %v4841_v22, %v4838_v26 }
 0x440   : > { %v2344_v58 = vpop.xlane.xlu0 %2343  ;;  %v4851_v6 = vpop.eup %3697 }
 0x441   : > { %v2427_v52 = vsub.f32 %v4632_v56, %v2344_v58  ;;  %v2428_v59 = vsub.f32 %v4636_v36, %v2344_v58  ;;  %2601 = vadd.xlane.f32.xlu0 %v2600_v43  ;;  %v2509_v60 = vmul.f32 1.442695, %v2425_v34  ;;  %v4853_v56 = vpop.eup %3699  ;;  %v2511_v36 = vmul.f32 1.442695, %v2426_v46 }
 0x442   : > { %v4855_v32 = vpop.eup %3701  ;;  %v2612_v9 = vadd.f32 %v4853_v56, %v4851_v6 }
 0x443   : > { %v2513_v19 = vmul.f32 1.442695, %v2427_v52  ;;  %v2515_v5 = vmul.f32 1.442695, %v2428_v59  ;;  %2598 = vadd.xlane.f32.xlu1 %v2597_v21  ;;  %v4859_v39 = vpop.eup %3703  ;;  %v2609_v12 = vadd.f32 %v4855_v32, %v4847_v0  ;;  %v5380_v21 = vld [vmem:[#allocation18_spill] sm:$0xff] }
 0x444   : > { %v4861_v24 = vpop.eup %3705 }
 0x445   : > { %3719 = vpow2.f32 %v2513_v19  ;;  %2607 = vadd.xlane.f32.xlu0 %v2606_v10  ;;  %v4867_v28 = vpop.eup %3707 }
 0x446   : > { %3721 = vpow2.f32 %v2515_v5  ;;  %v2347_v13 = vpop.xlane.xlu1 %2346  ;;  %v4871_v63 = vpop.eup %3709  ;;  %v2618_v43 = vadd.f32 %v4867_v28, %v4861_v24 }
 0x447   : > { %3723 = vpow2.f32 %v2509_v60  ;;  %v2429_v27 = vsub.f32 %v4640_v37, %v2347_v13  ;;  %v2430_v61 = vsub.f32 %v4642_v57, %v2347_v13  ;;  %2604 = vadd.xlane.f32.xlu1 %v2603_v7  ;;  %v4875_v57 = vpop.eup %3711 }
 0x448   : > { %3725 = vpow2.f32 %v2511_v36  ;;  %v2350_v35 = vpop.xlane.xlu0 %2349  ;;  %v4877_v49 = vpop.eup %3713 }
 0x449   : > { %v2517_v33 = vmul.f32 1.442695, %v2429_v27  ;;  %v2519_v30 = vmul.f32 1.442695, %v2430_v61  ;;  %v2431_v3 = vsub.f32 %v4644_v38, %v2350_v35  ;;  %v2432_v37 = vsub.f32 %v4648_v29, %v2350_v35  ;;  %2613 = vadd.xlane.f32.xlu0 %v2612_v9  ;;  %v4881_v46 = vpop.eup %3715  ;;  %v5381_v61 = vld [vmem:[#allocation19_spill] sm:$0xff]  ;;  %v5382_v35 = vld [vmem:[#allocation20_spill] sm:$0xff] }
 0x44a   : > { %v4883_v58 = vpop.eup %3717  ;;  %v2615_v38 = vadd.f32 %v4871_v63, %v4859_v39  ;;  %v2624_v60 = vadd.f32 %v4881_v46, %v4877_v49 }
 0x44b   : > { %3727 = vpow2.f32 %v2517_v33  ;;  %v2521_v34 = vmul.f32 1.442695, %v2431_v3  ;;  %v2523_v17 = vmul.f32 1.442695, %v2432_v37  ;;  %2610 = vadd.xlane.f32.xlu1 %v2609_v12  ;;  %v2621_v36 = vadd.f32 %v4883_v58, %v4875_v57 }
 0x44c   : > { %3729 = vpow2.f32 %v2519_v30 }
 0x44d   : > { %3731 = vpow2.f32 %v2521_v34  ;;  %2619 = vadd.xlane.f32.xlu0 %v2618_v43 }
 0x44e   : > { %3733 = vpow2.f32 %v2523_v17  ;;  %v2353_v29 = vpop.xlane.xlu1 %2352 }
 0x44f   : > { %v4887_v52 = vpop.eup %3719  ;;  %v2433_v59 = vsub.f32 %v4652_v62, %v2353_v29  ;;  %v2434_v10 = vsub.f32 %v5380_v21, %v2353_v29  ;;  %2616 = vadd.xlane.f32.xlu1 %v2615_v38  ;;  %v5384_v29 = vld [vmem:[#allocation21_spill] sm:$0xff]  ;;  %v5385_v21 = vld [vmem:[#allocation22_spill] sm:$0xff] }
 0x450   : > { %v4893_v19 = vpop.eup %3721  ;;  %v2356_v5 = vpop.xlane.xlu0 %2355 }
 0x451   : > { %v4897_v7 = vpop.eup %3723  ;;  %v2525_v13 = vmul.f32 1.442695, %v2433_v59  ;;  %v2527_v27 = vmul.f32 1.442695, %v2434_v10  ;;  %v2435_v9 = vsub.f32 %v5381_v61, %v2356_v5  ;;  %v2436_v62 = vsub.f32 %v5382_v35, %v2356_v5  ;;  %2625 = vadd.xlane.f32.xlu0 %v2624_v60  ;;  %v5387_v61 = vld [vmem:[#allocation23_spill] sm:$0xff]  ;;  %v5388_v35 = vld [vmem:[#allocation24_spill] sm:$0xff] }
 0x452   : > { %v4901_v12 = vpop.eup %3725  ;;  %v2630_v3 = vadd.f32 %v4893_v19, %v4887_v52 }
 0x453   : > { %3735 = vpow2.f32 %v2525_v13  ;;  %v2529_v33 = vmul.f32 1.442695, %v2435_v9  ;;  %v2531_v30 = vmul.f32 1.442695, %v2436_v62  ;;  %2622 = vadd.xlane.f32.xlu1 %v2621_v36  ;;  %v2627_v34 = vadd.f32 %v4901_v12, %v4897_v7 }
 0x454   : > { %3737 = vpow2.f32 %v2527_v27 }
 0x455   : > { %v4905_v37 = vpop.eup %3727  ;;  %3739 = vpow2.f32 %v2529_v33  ;;  %2631 = vadd.xlane.f32.xlu0 %v2630_v3 }
 0x456   : > { %v4909_v17 = vpop.eup %3729  ;;  %3741 = vpow2.f32 %v2531_v30  ;;  %v2359_v43 = vpop.xlane.xlu1 %2358 }
 0x457   : > { %v4911_v38 = vpop.eup %3731  ;;  %v2437_v59 = vsub.f32 %v5384_v29, %v2359_v43  ;;  %v2438_v10 = vsub.f32 %v5385_v21, %v2359_v43  ;;  %2628 = vadd.xlane.f32.xlu1 %v2627_v34  ;;  %v2633_v36 = vadd.f32 %v4909_v17, %v4905_v37  ;;  %v5392_v21 = vld [vmem:[#allocation25_spill] sm:$0xff] }
 0x458   : > { %5383 = vst [vmem:[#allocation18_spill] sm:$0xff] %v4911_v38  ;;  %v4915_v60 = vpop.eup %3733  ;;  %v2362_v5 = vpop.xlane.xlu0 %2361 }
 0x459   : > { %5386 = vst [vmem:[#allocation19_spill] sm:$0xff] %v4915_v60  ;;  %v2533_v13 = vmul.f32 1.442695, %v2437_v59  ;;  %v2535_v27 = vmul.f32 1.442695, %v2438_v10  ;;  %v2439_v9 = vsub.f32 %v5387_v61, %v2362_v5  ;;  %v2440_v62 = vsub.f32 %v5388_v35, %v2362_v5  ;;  %v5393_v5 = vld [vmem:[#allocation26_spill] sm:$0xff] }
 0x45a   : > { %v2636_v33 = vadd.f32 %v4915_v60, %v4911_v38 }
 0x45b   : > { %3743 = vpow2.f32 %v2533_v13  ;;  %v2537_v30 = vmul.f32 1.442695, %v2439_v9  ;;  %v2539_v3 = vmul.f32 1.442695, %v2440_v62  ;;  %2634 = vadd.xlane.f32.xlu1 %v2633_v36  ;;  %v5395_v62 = vld [vmem:[#allocation27_spill] sm:$0xff] }
 0x45c   : > { %3745 = vpow2.f32 %v2535_v27  ;;  %2637 = vadd.xlane.f32.xlu0 %v2636_v33 }
 0x45d   : > { %v4923_v34 = vpop.eup %3735  ;;  %3747 = vpow2.f32 %v2537_v30  ;;  %v5396_v30 = vld [vmem:[#allocation28_spill] sm:$0xff] }
 0x45e   : > { %5389 = vst [vmem:[#allocation20_spill] sm:$0xff] %v4923_v34  ;;  %v4925_v43 = vpop.eup %3737  ;;  %3749 = vpow2.f32 %v2539_v3  ;;  %v2365_v29 = vpop.xlane.xlu1 %2364 }
 0x45f   : > { %5390 = vst [vmem:[#allocation21_spill] sm:$0xff] %v4925_v43  ;;  %v4927_v59 = vpop.eup %3739  ;;  %v2441_v10 = vsub.f32 %v5392_v21, %v2365_v29  ;;  %v2442_v61 = vsub.f32 %v5393_v5, %v2365_v29  ;;  %v2639_v13 = vadd.f32 %v4925_v43, %v4923_v34  ;;  %v5404_v34 = vld [vmem:[#allocation32_spill] sm:$0xff] }
 0x460   : > { %5391 = vst [vmem:[#allocation22_spill] sm:$0xff] %v4927_v59  ;;  %v4933_v9 = vpop.eup %3741  ;;  %v2368_v36 = vpop.xlane.xlu0 %2367 }
 0x461   : > { %5394 = vst [vmem:[#allocation23_spill] sm:$0xff] %v4933_v9  ;;  %v2541_v27 = vmul.f32 1.442695, %v2441_v10  ;;  %v2543_v35 = vmul.f32 1.442695, %v2442_v61  ;;  %v2443_v33 = vsub.f32 %v5395_v62, %v2368_v36  ;;  %v2444_v38 = vsub.f32 %v5396_v30, %v2368_v36  ;;  %2640 = vadd.xlane.f32.xlu1 %v2639_v13  ;;  %v5400_v62 = vld [vmem:[#allocation29_spill] sm:$0xff] }
 0x462   : > { %v2642_v3 = vadd.f32 %v4933_v9, %v4927_v59  ;;  %v5401_v13 = vld [vmem:[#allocation30_spill] sm:$0xff]  ;;  %v5403_v59 = vld [vmem:[#allocation31_spill] sm:$0xff] }
 0x463   : > { %3751 = vpow2.f32 %v2541_v27  ;;  %v2545_v21 = vmul.f32 1.442695, %v2443_v33  ;;  %v2547_v60 = vmul.f32 1.442695, %v2444_v38 }
 0x464   : > { %3753 = vpow2.f32 %v2543_v35  ;;  %2643 = vadd.xlane.f32.xlu0 %v2642_v3 }
 0x465   : > { %v4939_v29 = vpop.eup %3743  ;;  %3755 = vpow2.f32 %v2545_v21 }
 0x466   : > { %5397 = vst [vmem:[#allocation24_spill] sm:$0xff] %v4939_v29  ;;  %v4941_v5 = vpop.eup %3745  ;;  %3757 = vpow2.f32 %v2547_v60  ;;  %v2371_v10 = vpop.xlane.xlu0 %2370 }
 0x467   : > { %5398 = vst [vmem:[#allocation25_spill] sm:$0xff] %v4941_v5  ;;  %v4943_v61 = vpop.eup %3747  ;;  %v2445_v36 = vsub.f32 %v5400_v62, %v2371_v10  ;;  %v2446_v30 = vsub.f32 %v5401_v13, %v2371_v10  ;;  %v2645_v27 = vadd.f32 %v4941_v5, %v4939_v29 }
 0x468   : > { %5399 = vst [vmem:[#allocation26_spill] sm:$0xff] %v4943_v61  ;;  %v4949_v33 = vpop.eup %3749  ;;  %v2374_v38 = vpop.xlane.xlu1 %2373 }
 0x469   : > { %5402 = vst [vmem:[#allocation27_spill] sm:$0xff] %v4949_v33  ;;  %v2549_v35 = vmul.f32 1.442695, %v2445_v36  ;;  %v2551_v3 = vmul.f32 1.442695, %v2446_v30  ;;  %v2447_v21 = vsub.f32 %v5403_v59, %v2374_v38  ;;  %v2448_v9 = vsub.f32 %v5404_v34, %v2374_v38  ;;  %2646 = vadd.xlane.f32.xlu1 %v2645_v27  ;;  %v5408_v59 = vld [vmem:[#allocation33_spill] sm:$0xff] }
 0x46a   : > { %v2648_v60 = vadd.f32 %v4949_v33, %v4943_v61  ;;  %v5409_v27 = vld [vmem:[#allocation34_spill] sm:$0xff] }
 0x46b   : > { %3759 = vpow2.f32 %v2549_v35  ;;  %v2553_v62 = vmul.f32 1.442695, %v2447_v21  ;;  %v2555_v43 = vmul.f32 1.442695, %v2448_v9 }
 0x46c   : > { %3761 = vpow2.f32 %v2551_v3  ;;  %2649 = vadd.xlane.f32.xlu0 %v2648_v60 }
 0x46d   : > { %v4955_v10 = vpop.eup %3751  ;;  %3763 = vpow2.f32 %v2553_v62 }
 0x46e   : > { %5405 = vst [vmem:[#allocation28_spill] sm:$0xff] %v4955_v10  ;;  %v4957_v13 = vpop.eup %3753  ;;  %3765 = vpow2.f32 %v2555_v43  ;;  %v2377_v36 = vpop.xlane.xlu0 %2376 }
 0x46f   : > { %5406 = vst [vmem:[#allocation29_spill] sm:$0xff] %v4957_v13  ;;  %v4959_v30 = vpop.eup %3755  ;;  %v2449_v34 = vsub.f32 %v5408_v59, %v2377_v36  ;;  %v2450_v38 = vsub.f32 %v5409_v27, %v2377_v36  ;;  %v2651_v35 = vadd.f32 %v4957_v13, %v4955_v10 }
 0x470   : > { %5407 = vst [vmem:[#allocation30_spill] sm:$0xff] %v4959_v30  ;;  %v4965_v21 = vpop.eup %3757 }
 0x471   : > { %5410 = vst [vmem:[#allocation31_spill] sm:$0xff] %v4965_v21  ;;  %v2557_v9 = vmul.f32 1.442695, %v2449_v34  ;;  %v2559_v3 = vmul.f32 1.442695, %v2450_v38  ;;  %2652 = vadd.xlane.f32.xlu1 %v2651_v35  ;;  %v2654_v60 = vadd.f32 %v4965_v21, %v4959_v30  ;;  %v5417_v30 = vld [vmem:[#allocation35_spill] sm:$0xff] }
 0x473   : > { %3767 = vpow2.f32 %v2557_v9  ;;  %2655 = vadd.xlane.f32.xlu0 %v2654_v60 }
 0x474   : > { %3769 = vpow2.f32 %v2559_v3 }
 0x475   : > { %v4969_v43 = vpop.eup %3759 }
 0x476   : > { %5411 = vst [vmem:[#allocation32_spill] sm:$0xff] %v4969_v43  ;;  %v4971_v62 = vpop.eup %3761 }
 0x477   : > { %5412 = vst [vmem:[#allocation33_spill] sm:$0xff] %v4971_v62  ;;  %v4973_v59 = vpop.eup %3763  ;;  %v2657_v36 = vadd.f32 %v4971_v62, %v4969_v43  ;;  %v5418_v43 = vld [vmem:[#allocation36_spill] sm:$0xff] }
 0x478   : > { %5413 = vst [vmem:[#allocation34_spill] sm:$0xff] %v4973_v59  ;;  %v4977_v27 = vpop.eup %3765 }
 0x479   : > { %5414 = vst [vmem:[#allocation38_spill] sm:$0xff] %v4977_v27  ;;  %2658 = vadd.xlane.f32.xlu1 %v2657_v36  ;;  %v2660_v34 = vadd.f32 %v4977_v27, %v4973_v59  ;;  %v5419_v36 = vld [vmem:[#allocation37_spill] sm:$0xff] }
 0x47b   : > { %2661 = vadd.xlane.f32.xlu0 %v2660_v34 }
 0x47d   : > { %v4981_v38 = vpop.eup %3767 }
 0x47e   : > { %5415 = vst [vmem:[#allocation39_spill] sm:$0xff] %v4981_v38  ;;  %v4983_v35 = vpop.eup %3769 }
 0x47f   : > { %5416 = vst [vmem:[#allocation40_spill] sm:$0xff] %v4983_v35  ;;  %v2663_v9 = vadd.f32 %v4983_v35, %v4981_v38 }
 0x481   : > { %2664 = vadd.xlane.f32.xlu1 %v2663_v9 }
 0x4b0   : > { %v2860_v3 = vpop.xlane.xlu1 %2859 }
 0x4b1   : > { %v2870_v10 = vsub.f32 %v5417_v30, %v2860_v3 }
 0x4b2   : > { %v2863_v60 = vpop.xlane.xlu0 %2862 }
 0x4b3   : > { %v2871_v62 = vsub.f32 %v5418_v43, %v2863_v60  ;;  %v2874_v61 = vmul.f32 1.442695, %v2870_v10 }
 0x4b5   : > { %v2876_v34 = vmul.f32 1.442695, %v2871_v62  ;;  %3771 = vpow2.f32 %v2874_v61 }
 0x4b7   : > { %3773 = vpow2.f32 %v2876_v34 }
 0x4b8   : > { %v2866_v21 = vpop.xlane.xlu1 %2865 }
 0x4b9   : > { %v2872_v13 = vsub.f32 %v5419_v36, %v2866_v21 }
 0x4ba   : > { %v2869_v59 = vpop.xlane.xlu0 %2868 }
 0x4bb   : > { %v2878_v27 = vmul.f32 1.442695, %v2872_v13 }
 0x4bc   : > { %v2380_v29 = vpop.xlane.xlu1 %2379 }
 0x4bd   : > { %v2451_v33 = vsub.f32 %v4704_v42, %v2380_v29  ;;  %v2452_v5 = vsub.f32 %v4708_v18, %v2380_v29  ;;  %3775 = vpow2.f32 %v2878_v27 }
 0x4be   : > { %v2386_v9 = vpop.xlane.xlu0 %2385 }
 0x4bf   : > { %v2561_v38 = vmul.f32 1.442695, %v2451_v33  ;;  %v2563_v35 = vmul.f32 1.442695, %v2452_v5  ;;  %v2455_v30 = vsub.f32 %v4716_v1, %v2386_v9  ;;  %v2456_v43 = vsub.f32 %v4720_v53, %v2386_v9  ;;  %v5002_v36 = vpop.eup %3771 }
 0x4c0   : > { %v2383_v21 = vpop.xlane.xlu1 %2382 }
 0x4c1   : > { %3777 = vpow2.f32 %v2561_v38  ;;  %v2569_v10 = vmul.f32 1.442695, %v2455_v30  ;;  %v2453_v13 = vsub.f32 %v4712_v20, %v2383_v21  ;;  %v2454_v62 = vsub.f32 %v4714_v55, %v2383_v21  ;;  %v5005_v9 = vpop.eup %3773 }
 0x4c2   : > { %3779 = vpow2.f32 %v2563_v35  ;;  %v2571_v42 = vmul.f32 1.442695, %v2456_v43  ;;  %v2392_v18 = vpop.xlane.xlu0 %2391  ;;  %v2873_v55 = vsub.f32 %v4773_v4, %v2869_v59 }
 0x4c3   : > { %3781 = vpow2.f32 %v2569_v10  ;;  %v2565_v29 = vmul.f32 1.442695, %v2453_v13  ;;  %v2567_v61 = vmul.f32 1.442695, %v2454_v62  ;;  %v2459_v5 = vsub.f32 %v4728_v48, %v2392_v18 }
 0x4c4   : > { %3783 = vpow2.f32 %v2571_v42  ;;  %v2460_v1 = vsub.f32 %v4732_v47, %v2392_v18  ;;  %v2389_v33 = vpop.xlane.xlu1 %2388  ;;  %v2880_v30 = vmul.f32 1.442695, %v2873_v55 }
 0x4c5   : > { %3785 = vpow2.f32 %v2565_v29  ;;  %v2577_v53 = vmul.f32 1.442695, %v2459_v5  ;;  %v2457_v27 = vsub.f32 %v4724_v51, %v2389_v33  ;;  %v2458_v20 = vsub.f32 %v4726_v15, %v2389_v33 }
 0x4c6   : > { %3787 = vpow2.f32 %v2567_v61  ;;  %v2579_v38 = vmul.f32 1.442695, %v2460_v1  ;;  %v2398_v35 = vpop.xlane.xlu0 %2397 }
 0x4c7   : > { %3789 = vpow2.f32 %v2577_v53  ;;  %v2573_v3 = vmul.f32 1.442695, %v2457_v27  ;;  %v2575_v60 = vmul.f32 1.442695, %v2458_v20  ;;  %v2463_v48 = vsub.f32 %v4740_v41, %v2398_v35  ;;  %v5009_v59 = vpop.eup %3775 }
 0x4c8   : > { %3791 = vpow2.f32 %v2579_v38  ;;  %v2464_v47 = vsub.f32 %v4744_v40, %v2398_v35  ;;  %v2395_v34 = vpop.xlane.xlu1 %2394 }
 0x4c9   : > { %3793 = vpow2.f32 %v2573_v3  ;;  %v2585_v51 = vmul.f32 1.442695, %v2463_v48  ;;  %v2461_v4 = vsub.f32 %v4736_v54, %v2395_v34  ;;  %v2462_v15 = vsub.f32 %v4738_v2, %v2395_v34 }
 0x4ca   : > { %3795 = vpow2.f32 %v2575_v60  ;;  %v2587_v43 = vmul.f32 1.442695, %v2464_v47  ;;  %v2404_v41 = vpop.xlane.xlu0 %2403 }
 0x4cb   : > { %v5011_v21 = vpop.eup %3777  ;;  %3797 = vpow2.f32 %v2585_v51  ;;  %v2581_v10 = vmul.f32 1.442695, %v2461_v4  ;;  %v2583_v40 = vmul.f32 1.442695, %v2462_v15  ;;  %v2467_v13 = vsub.f32 %v4752_v11, %v2404_v41 }
 0x4cc   : > { %v5014_v62 = vpop.eup %3779  ;;  %3799 = vpow2.f32 %v2587_v43  ;;  %v2468_v54 = vsub.f32 %v4756_v25, %v2404_v41  ;;  %v2401_v42 = vpop.xlane.xlu1 %2400 }
 0x4cd   : > { %v5017_v2 = vpop.eup %3781  ;;  %3801 = vpow2.f32 %v2581_v10  ;;  %v2593_v18 = vmul.f32 1.442695, %v2467_v13  ;;  %v2465_v29 = vsub.f32 %v4748_v16, %v2401_v42  ;;  %v2666_v11 = vadd.f32 %v5014_v62, %v5011_v21 }
 0x4ce   : > { %v5020_v61 = vpop.eup %3783  ;;  %3803 = vpow2.f32 %v2583_v40  ;;  %v2595_v5 = vmul.f32 1.442695, %v2468_v54  ;;  %v2602_v1 = vpop.xlane.xlu0 %2601  ;;  %v2466_v27 = vsub.f32 %v4750_v14, %v2401_v42 }
 0x4cf   : > { %v5024_v33 = vpop.eup %3785  ;;  %3805 = vpow2.f32 %v2880_v30  ;;  %v2589_v53 = vmul.f32 1.442695, %v2465_v29  ;;  %2667 = vadd.xlane.f32.xlu0 %v2666_v11  ;;  %v2672_v3 = vadd.f32 %v5020_v61, %v5017_v2 }
 0x4d0   : > { %v5026_v25 = vpop.eup %3787  ;;  %3807 = vpow2.f32 %v2593_v18  ;;  %v2599_v20 = vpop.xlane.xlu1 %2598  ;;  %v2591_v48 = vmul.f32 1.442695, %v2466_v27 }
 0x4d1   : > { %v5029_v16 = vpop.eup %3789  ;;  %3809 = vpow2.f32 %v2595_v5  ;;  %v2669_v55 = vadd.f32 %v5026_v25, %v5024_v33 }
 0x4d2   : > { %v5033_v38 = vpop.eup %3791  ;;  %3811 = vpow2.f32 %v2589_v53  ;;  %v2608_v35 = vpop.xlane.xlu0 %2607 }
 0x4d3   : > { %v5037_v60 = vpop.eup %3793  ;;  %3813 = vrcp.f32 %v2602_v1  ;;  %2670 = vadd.xlane.f32.xlu1 %v2669_v55  ;;  %2673 = vadd.xlane.f32.xlu0 %v2672_v3  ;;  %v2678_v30 = vadd.f32 %v5033_v38, %v5029_v16  ;;  %v2882_v55 = vsel %vm1258_vm5, %v5002_v36, 0.0 }
 0x4d4   : > { %v5039_v14 = vpop.eup %3795  ;;  %3815 = vrcp.f32 %v2599_v20  ;;  %v2605_v47 = vpop.xlane.xlu1 %2604  ;;  %v2885_v20 = vsel %vm1258_vm5, %v5005_v9, 0.0 }
 0x4d5   : > { %v5041_v34 = vpop.eup %3797  ;;  %3817 = vrcp.f32 %v2608_v35  ;;  %v2675_v51 = vadd.f32 %v5039_v14, %v5037_v60 }
 0x4d6   : > { %v5045_v4 = vpop.eup %3799  ;;  %3819 = vrcp.f32 %v2605_v47  ;;  %v2614_v15 = vpop.xlane.xlu0 %2613 }
 0x4d7   : > { %v5049_v43 = vpop.eup %3801  ;;  %3821 = vrcp.f32 %v2614_v15  ;;  %2676 = vadd.xlane.f32.xlu1 %v2675_v51  ;;  %2679 = vadd.xlane.f32.xlu0 %v2678_v30  ;;  %v2684_v18 = vadd.f32 %v5045_v4, %v5041_v34 }
 0x4d8   : > { %v5051_v41 = vpop.eup %3803  ;;  %3823 = vpow2.f32 %v2591_v48  ;;  %v2611_v10 = vpop.xlane.xlu1 %2610 }
 0x4d9   : > { %v5053_v40 = vpop.eup %3805  ;;  %3825 = vrcp.f32 %v2611_v10  ;;  %v2681_v13 = vadd.f32 %v5051_v41, %v5049_v43 }
 0x4da   : > { %v5057_v54 = vpop.eup %3807  ;;  %v2620_v42 = vpop.xlane.xlu0 %2619 }
 0x4db   : > { %v5061_v29 = vpop.eup %3809  ;;  %3827 = vrcp.f32 %v2620_v42  ;;  %2682 = vadd.xlane.f32.xlu1 %v2681_v13  ;;  %2685 = vadd.xlane.f32.xlu0 %v2684_v18 }
 0x4dc   : > { %v5063_v5 = vpop.eup %3811  ;;  %v2617_v1 = vpop.xlane.xlu1 %2616 }
 0x4dd   : > { %v3814_v11 = vpop.eup %3813  ;;  %3829 = vrcp.f32 %v2617_v1 }
 0x4de   : > { %v3816_v53 = vpop.eup %3815  ;;  %v2626_v27 = vpop.xlane.xlu0 %2625  ;;  %v2728_v35 = vmul.f32 %v3814_v11, %v4821_v31  ;;  %v2727_v51 = vmul.f32 %v3814_v11, %v4815_v8 }
 0x4df   : > { %v3818_v3 = vpop.eup %3817  ;;  %3831 = vrcp.f32 %v2626_v27  ;;  %2883 = vadd.xlane.f32.xlu1 %v2882_v55  ;;  %v2726_v48 = vmul.f32 %v3816_v53, %v4823_v45  ;;  %v2725_v47 = vmul.f32 %v3816_v53, %v4812_v44  ;;  %2886 = vadd.xlane.f32.xlu0 %v2885_v20  ;;  %v2888_v45 = vsel %vm1258_vm5, %v5009_v59, 0.0 }
 0x4e0   : > { %v3820_v15 = vpop.eup %3819  ;;  %v2623_v30 = vpop.xlane.xlu1 %2622  ;;  %v2732_v10 = vmul.f32 %v3818_v3, %v4830_v23  ;;  %v2731_v8 = vmul.f32 %v3818_v3, %v4828_v50  ;;  %v2891_v23 = vsel %vm1258_vm5, %v5053_v40, 0.0 }
 0x4e1   : > { %v3822_v13 = vpop.eup %3821  ;;  %v2907_v42 = vpack.c.bf16 %v2728_v35, %v2726_v48  ;;  %3833 = vrcp.f32 %v2623_v30  ;;  %v2906_v18 = vpack.c.bf16 %v2727_v51, %v2725_v47  ;;  %v2730_v31 = vmul.f32 %v3820_v15, %v4841_v22 }
 0x4e2   : > { %v5075_v1 = vpop.eup %3823  ;;  %v2632_v27 = vpop.xlane.xlu0 %2631  ;;  %v2729_v44 = vmul.f32 %v3820_v15, %v4838_v26  ;;  %v2736_v22 = vmul.f32 %v3822_v13, %v4853_v56  ;;  %v2735_v3 = vmul.f32 %v3822_v13, %v4851_v6  ;;  %v2690_v47 = vadd.f32 %v5061_v29, %v5057_v54 }
 0x4e3   : > { %v3826_v11 = vpop.eup %3825  ;;  %2938 = vmatprep.subr.bf16.mxu0 %v2907_v42  ;;  %3835 = vrcp.f32 %v2632_v27  ;;  %2889 = vadd.xlane.f32.xlu1 %v2888_v45  ;;  %v2909_v53 = vpack.c.bf16 %v2732_v10, %v2730_v31  ;;  %v2687_v50 = vadd.f32 %v5075_v1, %v5063_v5 }
 0x4e4   : > { %2939 = vmatpush1.bf16.msra.mxu0 %v2906_v18  ;;  %2892 = vadd.xlane.f32.xlu0 %v2891_v23  ;;  %v2629_v20 = vpop.xlane.xlu1 %2628  ;;  %v2908_v55 = vpack.c.bf16 %v2731_v8, %v2729_v44  ;;  %v2734_v35 = vmul.f32 %v3826_v11, %v4855_v32  ;;  %v2733_v26 = vmul.f32 %v3826_v11, %v4847_v0 }
 0x4e5   : > { %v3828_v48 = vpop.eup %3827  ;;  %2940 = vmatprep.subr.bf16.mxu0 %v2909_v53  ;;  %3837 = vrcp.f32 %v2629_v20 }
 0x4e6   : > { %v2911_v56 = vpack.c.bf16 %v2736_v22, %v2734_v35  ;;  %v2910_v15 = vpack.c.bf16 %v2735_v3, %v2733_v26  ;;  %v2740_v30 = vmul.f32 %v3828_v48, %v4867_v28  ;;  %v2739_v13 = vmul.f32 %v3828_v48, %v4861_v24 }
 0x4e7   : > { %v3830_v51 = vpop.eup %3829  ;;  %2688 = vadd.xlane.f32.xlu1 %v2687_v50  ;;  %v5421_v50 = vld [vmem:[#allocation18_spill] sm:$0xff] }
 0x4e8   : > { %2941 = vmatpush1.bf16.msra.mxu0 %v2908_v55  ;;  %2691 = vadd.xlane.f32.xlu0 %v2690_v47  ;;  %v2635_v32 = vpop.xlane.xlu1 %2634  ;;  %v2738_v0 = vmul.f32 %v3830_v51, %v4871_v63  ;;  %v2737_v10 = vmul.f32 %v3830_v51, %v4859_v39 }
 0x4e9   : > { %v3832_v42 = vpop.eup %3831  ;;  %v2638_v18 = vpop.xlane.xlu0 %2637  ;;  %2942 = vmatprep.subr.bf16.mxu0 %v2911_v56  ;;  %3839 = vrcp.f32 %v2635_v32 }
 0x4ea   : > { %3841 = vrcp.f32 %v2638_v18  ;;  %v2913_v6 = vpack.c.bf16 %v2740_v30, %v2738_v0  ;;  %v2912_v27 = vpack.c.bf16 %v2739_v13, %v2737_v10  ;;  %v2744_v44 = vmul.f32 %v3832_v42, %v4881_v46  ;;  %v1861_v0 = vld [vmem:[%s5269_s16 + $0x18] sm:$0xff] }
 0x4eb   : > { %v3834_v31 = vpop.eup %3833  ;;  %v2743_v39 = vmul.f32 %v3832_v42, %v4877_v49  ;;  %v5422_v30 = vld [vmem:[#allocation21_spill] sm:$0xff]  ;;  %v5423_v42 = vld [vmem:[#allocation23_spill] sm:$0xff] }
 0x4ec   : > { %2943 = vmatpush1.bf16.msra.mxu0 %v2910_v15  ;;  %v2742_v45 = vmul.f32 %v3834_v31, %v4883_v58  ;;  %v2741_v63 = vmul.f32 %v3834_v31, %v4875_v57  ;;  %v1859_v15 = vld [vmem:[%s5269_s16 + $0x8] sm:$0xff]  ;;  %v5425_v31 = vld [vmem:[#allocation22_spill] sm:$0xff] }
 0x4ed   : > { %v3836_v28 = vpop.eup %3835  ;;  %2944 = vmatprep.subr.bf16.mxu0 %v2913_v6  ;;  %v5424_v6 = vld [vmem:[#allocation20_spill] sm:$0xff] }
 0x4ee   : > { %v2641_v8 = vpop.xlane.xlu1 %2640  ;;  %v2915_v11 = vpack.c.bf16 %v2744_v44, %v2742_v45  ;;  %v2914_v53 = vpack.c.bf16 %v2743_v39, %v2741_v63  ;;  %v2748_v22 = vmul.f32 %v3836_v28, %v4893_v19  ;;  %v2747_v46 = vmul.f32 %v3836_v28, %v4887_v52  ;;  %v1858_v19 = vld [vmem:[%s5269_s16] sm:$0xff] }
 0x4ef   : > { %v3838_v23 = vpop.eup %3837  ;;  %3843 = vrcp.f32 %v2641_v8  ;;  %v1955_v63 = vld [vmem:[%s5271_s18] sm:$0xff]  ;;  %v1956_v8 = vld [vmem:[%s5271_s18 + $0x8] sm:$0xff] }
 0x4f0   : > { %2945 = vmatpush1.bf16.msra.mxu0 %v2912_v27  ;;  %v2746_v24 = vmul.f32 %v3838_v23, %v4901_v12  ;;  %v2745_v58 = vmul.f32 %v3838_v23, %v4897_v7  ;;  %v5420_v7 = vld [vmem:[#allocation19_spill] sm:$0xff]  ;;  %v1957_v23 = vld [vmem:[%s5271_s18 + $0x10] sm:$0xff] }
 0x4f1   : > { %v2644_v20 = vpop.xlane.xlu0 %2643  ;;  %2946 = vmatprep.subr.bf16.mxu0 %v2915_v11 }
 0x4f2   : > { %3845 = vrcp.f32 %v2644_v20  ;;  %v2917_v57 = vpack.c.bf16 %v2748_v22, %v2746_v24  ;;  %v2916_v35 = vpack.c.bf16 %v2747_v46, %v2745_v58  ;;  %v1958_v24 = vld [vmem:[%s5271_s18 + $0x18] sm:$0xff]  ;;  %v5427_v20 = vld [vmem:[#allocation27_spill] sm:$0xff]  ;;  %v5428_v46 = vld [vmem:[#allocation24_spill] sm:$0xff] }
 0x4f3   : > { %v3840_v55 = vpop.eup %3839  ;;  %v5426_v22 = vld [vmem:[#allocation25_spill] sm:$0xff] }
 0x4f4   : > { %v3842_v49 = vpop.eup %3841  ;;  %2947 = vmatpush1.bf16.msra.mxu0 %v2914_v53  ;;  %v2750_v26 = vmul.f32 %v3840_v55, %v4909_v17  ;;  %v2749_v48 = vmul.f32 %v3840_v55, %v4905_v37  ;;  %v1860_v37 = vld [vmem:[%s5269_s16 + $0x10] sm:$0xff] }
 0x4f5   : > { %2948 = vmatprep.subr.bf16.mxu0 %v2917_v57  ;;  %v2752_v12 = vmul.f32 %v3842_v49, %v5420_v7  ;;  %v2751_v3 = vmul.f32 %v3842_v49, %v5421_v50  ;;  %v5429_v49 = vld [vmem:[#allocation26_spill] sm:$0xff] }
 0x4f6   : > { %v2647_v47 = vpop.xlane.xlu1 %2646  ;;  %v3242_v50 = vld [vmem:[%s5274_s21] sm:$0xff] }
 0x4f7   : > { %v2919_v56 = vpack.c.bf16 %v2752_v12, %v2750_v26  ;;  %3847 = vrcp.f32 %v2647_v47  ;;  %v2918_v52 = vpack.c.bf16 %v2751_v3, %v2749_v48  ;;  %v5430_v47 = vld [vmem:[#allocation29_spill] sm:$0xff] }
 0x4f8   : > { %2949 = vmatpush1.bf16.msra.mxu0 %v2916_v35  ;;  %1864 = vperm.xlu1 %3652, %v1858_v19  }
 0x4f9   : > { %v2650_v51 = vpop.xlane.xlu0 %2649  ;;  %2950 = vmatprep.subr.bf16.mxu0 %v2919_v56  ;;  %v3844_v17 = vpop.eup %3843 }
 0x4fa   : > { %3849 = vrcp.f32 %v2650_v51  ;;  %v2754_v10 = vmul.f32 %v3844_v17, %v5422_v30  ;;  %v2753_v13 = vmul.f32 %v3844_v17, %v5424_v6 }
 0x4fc   : > { %v3846_v32 = vpop.eup %3845  ;;  %2951 = vmatpush1.bf16.msra.mxu0 %v2918_v52  ;;  %1874 = vperm.xlu1 %3652, %v1860_v37   ;;  %v5431_v52 = vld [vmem:[#allocation31_spill] sm:$0xff]  ;;  %v5432_v37 = vld [vmem:[#allocation28_spill] sm:$0xff] }
 0x4fd   : > { %v2756_v18 = vmul.f32 %v3846_v32, %v5423_v42  ;;  %v2755_v27 = vmul.f32 %v3846_v32, %v5425_v31 }
 0x4fe   : > { %1869 = vperm.xlu0 %3651, %v1859_v15   ;;  %v2653_v45 = vpop.xlane.xlu1 %2652  ;;  %v5433_v15 = vld [vmem:[#allocation30_spill] sm:$0xff] }
 0x4ff   : > { %3851 = vrcp.f32 %v2653_v45  ;;  %v2921_v44 = vpack.c.bf16 %v2756_v18, %v2754_v10  ;;  %v2920_v28 = vpack.c.bf16 %v2755_v27, %v2753_v13  ;;  %v3244_v18 = vld [vmem:[%s5274_s21 + $0x10] sm:$0xff]  ;;  %v5434_v13 = vld [vmem:[#allocation33_spill] sm:$0xff]  ;;  %v5435_v27 = vld [vmem:[#allocation38_spill] sm:$0xff] }
 0x500   : > { %v2656_v39 = vpop.xlane.xlu0 %2655  ;;  %1879 = vperm.xlu1 %3652, %v1861_v0   ;;  %v3243_v0 = vld [vmem:[%s5274_s21 + $0x8] sm:$0xff] }
 0x501   : > { %3853 = vrcp.f32 %v2656_v39  ;;  %2952 = vmatprep.subr.bf16.mxu0 %v2921_v44  ;;  %v3848_v11 = vpop.eup %3847  ;;  %v5436_v44 = vld [vmem:[#allocation32_spill] sm:$0xff] }
 0x502   : > { %1961 = vperm.xlu0 %3651, %v1955_v63   ;;  %2953 = vmatpush1.bf16.msra.mxu0 %v2920_v28  ;;  %v2758_v58 = vmul.f32 %v3848_v11, %v5426_v22  ;;  %v2757_v55 = vmul.f32 %v3848_v11, %v5428_v46  ;;  %v5437_v28 = vld [vmem:[#allocation34_spill] sm:$0xff] }
 0x504   : > { %v3850_v53 = vpop.eup %3849  ;;  %1966 = vperm.xlu1 %3652, %v1956_v8   ;;  %v3245_v8 = vld [vmem:[%s5274_s21 + $0x18] sm:$0xff] }
 0x505   : > { %v2760_v57 = vmul.f32 %v3850_v53, %v5427_v20  ;;  %v2759_v35 = vmul.f32 %v3850_v53, %v5429_v49 }
 0x506   : > { %1971 = vperm.xlu0 %3651, %v1957_v23   ;;  %v2659_v26 = vpop.xlane.xlu1 %2658 }
 0x507   : > { %3855 = vrcp.f32 %v2659_v26  ;;  %v2923_v48 = vpack.c.bf16 %v2760_v57, %v2758_v58  ;;  %v2922_v19 = vpack.c.bf16 %v2759_v35, %v2757_v55  ;;  %v5438_v35 = vld [vmem:[#allocation40_spill] sm:$0xff] }
 0x508   : > { %v2662_v7 = vpop.xlane.xlu0 %2661  ;;  %1976 = vperm.xlu1 %3652, %v1958_v24  }
 0x509   : > { %v3852_v12 = vpop.eup %3851  ;;  %3857 = vrcp.f32 %v2662_v7  ;;  %2954 = vmatprep.subr.bf16.mxu0 %v2923_v48  ;;  %v5439_v7 = vld [vmem:[#allocation39_spill] sm:$0xff] }
 0x50a   : > { %2955 = vmatpush1.bf16.msra.mxu0 %v2922_v19  ;;  %v2762_v56 = vmul.f32 %v3852_v12, %v5430_v47  ;;  %v2761_v17 = vmul.f32 %v3852_v12, %v5432_v37 }
 0x50b   : > { %v3854_v3 = vpop.eup %3853 }
 0x50c   : > { %3248 = vperm.xlu1 %3652, %v3242_v50   ;;  %v2764_v51 = vmul.f32 %v3854_v3, %v5431_v52  ;;  %v2763_v32 = vmul.f32 %v3854_v3, %v5433_v15 }
 0x50e   : > { %v2925_v30 = vpack.c.bf16 %v2764_v51, %v2762_v56  ;;  %v2924_v10 = vpack.c.bf16 %v2763_v32, %v2761_v17  ;;  %v2665_v53 = vpop.xlane.xlu1 %2664 }
 0x50f   : > { %3859 = vrcp.f32 %v2665_v53 }
 0x510   : > { %3253 = vperm.xlu1 %3652, %v3243_v0   ;;  %2956 = vmatprep.subr.bf16.mxu0 %v2925_v30 }
 0x511   : > { %v3856_v42 = vpop.eup %3855  ;;  %2957 = vmatpush1.bf16.msra.mxu0 %v2924_v10 }
 0x512   : > { %v2766_v31 = vmul.f32 %v3856_v42, %v5434_v13  ;;  %v2765_v63 = vmul.f32 %v3856_v42, %v5436_v44 }
 0x513   : > { %v3858_v6 = vpop.eup %3857 }
 0x514   : > { %3258 = vperm.xlu1 %3652, %v3244_v18   ;;  %v2768_v45 = vmul.f32 %v3858_v6, %v5435_v27  ;;  %v2767_v39 = vmul.f32 %v3858_v6, %v5437_v28 }
 0x516   : > { %v2927_v11 = vpack.c.bf16 %v2768_v45, %v2766_v31  ;;  %v2926_v23 = vpack.c.bf16 %v2767_v39, %v2765_v63 }
 0x518   : > { %3263 = vperm.xlu1 %3652, %v3245_v8   ;;  %2958 = vmatprep.subr.bf16.mxu0 %v2927_v11 }
 0x519   : > { %2959 = vmatpush1.bf16.msra.mxu0 %v2926_v23  ;;  %v3860_v57 = vpop.eup %3859 }
 0x51a   : > { %v2770_v26 = vmul.f32 %v3860_v57, %v5438_v35  ;;  %v2769_v12 = vmul.f32 %v3860_v57, %v5439_v7  ;;  %v5444_v35 = vld [vmem:[#allocation6_spill] sm:$0xff] }
 0x55c   : > { %v2668_v24 = vpop.xlane.xlu0 %2667 }
 0x55d   : > { %3861 = vrcp.f32 %v2668_v24  ;;  %v5440_v24 = vld [vmem:[#allocation2_spill] sm:$0xff] }
 0x560   : > { %v2671_v22 = vpop.xlane.xlu1 %2670  ;;  %v2674_v58 = vpop.xlane.xlu0 %2673 }
 0x561   : > { %3863 = vrcp.f32 %v2671_v22  ;;  %v5441_v22 = vld [vmem:[#allocation3_spill] sm:$0xff] }
 0x562   : > { %3865 = vrcp.f32 %v2674_v58 }
 0x564   : > { %v2677_v20 = vpop.xlane.xlu1 %2676  ;;  %v2680_v46 = vpop.xlane.xlu0 %2679 }
 0x565   : > { %3867 = vrcp.f32 %v2677_v20  ;;  %v5442_v20 = vld [vmem:[#allocation4_spill] sm:$0xff] }
 0x566   : > { %3869 = vrcp.f32 %v2680_v46  ;;  %v5443_v46 = vld [vmem:[#allocation5_spill] sm:$0xff] }
 0x567   : > { %v3862_v55 = vpop.eup %3861 }
 0x568   : > { %v2683_v49 = vpop.xlane.xlu1 %2682  ;;  %v2686_v48 = vpop.xlane.xlu0 %2685  ;;  %v2772_v19 = vmul.f32 %v3862_v55, %v5014_v62  ;;  %v2771_v50 = vmul.f32 %v3862_v55, %v5011_v21 }
 0x569   : > { %3871 = vrcp.f32 %v2683_v49 }
 0x56a   : > { %3873 = vrcp.f32 %v2686_v48  ;;  %v2929_v47 = vpack.c.bf16 %v2772_v19, %v2770_v26  ;;  %v2928_v56 = vpack.c.bf16 %v2771_v50, %v2769_v12  ;;  %v5445_v48 = vld [vmem:[#allocation7_spill] sm:$0xff] }
 0x56b   : > { %v3864_v3 = vpop.eup %3863 }
 0x56c   : > { %v3866_v52 = vpop.eup %3865  ;;  %v2884_v51 = vpop.xlane.xlu1 %2883  ;;  %v2774_v37 = vmul.f32 %v3864_v3, %v5026_v25  ;;  %v2773_v17 = vmul.f32 %v3864_v3, %v5024_v33  ;;  %2960 = vmatprep.subr.bf16.mxu0 %v2929_v47 }
 0x56d   : > { %v2887_v15 = vpop.xlane.xlu0 %2886  ;;  %3875 = vrcp.f32 %v2884_v51  ;;  %v2776_v32 = vmul.f32 %v3866_v52, %v5020_v61  ;;  %v2775_v62 = vmul.f32 %v3866_v52, %v5017_v2  ;;  %2961 = vmatpush1.bf16.msra.mxu0 %v2928_v56  ;;  %v5446_v51 = vld [vmem:[#allocation8_spill] sm:$0xff] }
 0x56e   : > { %3877 = vrcp.f32 %v2887_v15 }
 0x56f   : > { %v3868_v0 = vpop.eup %3867  ;;  %v2931_v21 = vpack.c.bf16 %v2776_v32, %v2774_v37  ;;  %v2930_v30 = vpack.c.bf16 %v2775_v62, %v2773_v17  ;;  %v5447_v17 = vld [vmem:[#allocation9_spill] sm:$0xff] }
 0x570   : > { %v3870_v10 = vpop.eup %3869  ;;  %v2890_v42 = vpop.xlane.xlu1 %2889  ;;  %v2778_v18 = vmul.f32 %v3868_v0, %v5039_v14  ;;  %v2777_v25 = vmul.f32 %v3868_v0, %v5037_v60 }
 0x571   : > { %v2893_v6 = vpop.xlane.xlu0 %2892  ;;  %2962 = vmatprep.subr.bf16.mxu0 %v2931_v21  ;;  %v2780_v33 = vmul.f32 %v3870_v10, %v5033_v38  ;;  %v2779_v13 = vmul.f32 %v3870_v10, %v5029_v16  ;;  %3879 = vrcp.f32 %v2890_v42 }
 0x572   : > { %2963 = vmatpush1.bf16.msra.mxu0 %v2930_v30 }
 0x573   : > { %v3872_v2 = vpop.eup %3871  ;;  %v2933_v61 = vpack.c.bf16 %v2780_v33, %v2778_v18  ;;  %v2932_v31 = vpack.c.bf16 %v2779_v13, %v2777_v25  ;;  %v5449_v18 = vld [vmem:[#allocation11_spill] sm:$0xff]  ;;  %v5450_v33 = vld [vmem:[#allocation12_spill] sm:$0xff] }
 0x574   : > { %v3874_v27 = vpop.eup %3873  ;;  %v2689_v45 = vpop.xlane.xlu1 %2688  ;;  %v2782_v44 = vmul.f32 %v3872_v2, %v5051_v41  ;;  %v2781_v63 = vmul.f32 %v3872_v2, %v5049_v43 }
 0x575   : > { %v2692_v14 = vpop.xlane.xlu0 %2691  ;;  %2964 = vmatprep.subr.bf16.mxu0 %v2933_v61  ;;  %3881 = vrcp.f32 %v2689_v45  ;;  %v2784_v60 = vmul.f32 %v3874_v27, %v5045_v4  ;;  %v2783_v38 = vmul.f32 %v3874_v27, %v5041_v34 }
 0x576   : > { %3883 = vrcp.f32 %v2692_v14  ;;  %2965 = vmatpush1.bf16.msra.mxu0 %v2932_v31  ;;  %v5452_v31 = vld [vmem:[#allocation14_spill] sm:$0xff] }
 0x577   : > { %v3876_v16 = vpop.eup %3875  ;;  %3885 = vrcp.f32 %v2893_v6  ;;  %v2935_v28 = vpack.c.bf16 %v2784_v60, %v2782_v44  ;;  %v2934_v39 = vpack.c.bf16 %v2783_v38, %v2781_v63  ;;  %v5453_v44 = vld [vmem:[#allocation15_spill] sm:$0xff]  ;;  %v5454_v63 = vld [vmem:[#allocation16_spill] sm:$0xff]  ;;  %v5455_v60 = vld [vmem:[#allocation17_spill] sm:$0xff] }
 0x578   : > { %v2898_v8 = vmul.f32 %v3876_v16, %v5002_v36  ;;  %v1865_v11 = vpop.permute.xlu1 %1864  ;;  %v3878_v23 = vpop.eup %3877 }
 0x579   : > { %2966 = vmatprep.subr.bf16.mxu0 %v2935_v28  ;;  %v2899_v41 = vmul.f32 %v3878_v23, %v5005_v9  ;;  %v1933_v34 = vadd.f32 %v5440_v24, %v1865_v11  ;;  %v1935_v58 = vadd.f32 %v5441_v22, %v1865_v11 }
 0x57a   : > { %2967 = vmatpush1.bf16.msra.mxu0 %v2934_v39  ;;  %2991 = vxpose.xlu0.b32.start [1/4] (short) (narrow) %v2898_v8, 32  ;;  %v5456_v39 = vmov 0  }
 0x57b   : > { %v3880_v43 = vpop.eup %3879 }
 0x57c   : > { %v1875_v53 = vpop.permute.xlu1 %1874  ;;  %v2900_v49 = vmul.f32 %v3880_v43, %v5009_v59 }
 0x57d   : > { %v1870_v4 = vpop.permute.xlu0 %1869  ;;  %v1943_v26 = vadd.f32 %v5444_v35, %v1875_v53  ;;  %v1945_v19 = vadd.f32 %v5445_v48, %v1875_v53 }
 0x57e   : > { %v1937_v57 = vadd.f32 %v5442_v20, %v1870_v4  ;;  %v1939_v55 = vadd.f32 %v5443_v46, %v1870_v4  ;;  %2992 = vxpose.xlu0.b32.cont [2/4] (short) (narrow) %v2899_v41, 32 }
 0x57f   : > { %v3882_v36 = vpop.eup %3881 }
 0x580   : > { %v3884_v7 = vpop.eup %3883  ;;  %v2902_v9 = vpack.c.bf16 %v1937_v57, %v1933_v34  ;;  %v2903_v12 = vpack.c.bf16 %v1939_v55, %v1935_v58  ;;  %v1880_v50 = vpop.permute.xlu1 %1879  ;;  %v2786_v3 = vmul.f32 %v3882_v36, %v5075_v1  ;;  %v2785_v47 = vmul.f32 %v3882_v36, %v5063_v5  ;;  %v5448_v5 = vld [vmem:[#allocation10_spill] sm:$0xff] }
 0x581   : > { %v3886_v56 = vpop.eup %3885  ;;  %v1962_v52 = vpop.permute.xlu0 %1961  ;;  %v1947_v37 = vadd.f32 %v5446_v51, %v1880_v50  ;;  %v1949_v15 = vadd.f32 %v5447_v17, %v1880_v50  ;;  %v2788_v59 = vmul.f32 %v3884_v7, %v5061_v29  ;;  %v2787_v32 = vmul.f32 %v3884_v7, %v5057_v54  ;;  %v5451_v29 = vld [vmem:[#allocation13_spill] sm:$0xff]  ;;  %v3676_v17 = vld [vmem:[%s5273_s20 + $0x8] sm:$0xff]  }
 0x582   : > { %2970 = vmatprep.mubr.bf16.mxu0 %v2903_v12  ;;  %2993 = vxpose.xlu0.b32.cont [3/4] (short) (narrow) %v2900_v49, 32  ;;  %v2901_v1 = vmul.f32 %v3886_v56, %v5053_v40  ;;  %v2030_v42 = vadd.f32 %v5448_v5, %v1962_v52  ;;  %v2032_v25 = vadd.f32 %v5449_v18, %v1962_v52 }
 0x583   : > { %v2904_v62 = vpack.c.bf16 %v1947_v37, %v1943_v26  ;;  %v2905_v0 = vpack.c.bf16 %v1949_v15, %v1945_v19  ;;  %v2937_v21 = vpack.c.bf16 %v2788_v59, %v2786_v3  ;;  %v2936_v30 = vpack.c.bf16 %v2787_v32, %v2785_v47  ;;  %v3675_v37 = vld [vmem:[%s5273_s20] sm:$0xff]   ;;  %v3678_v59 = vld [vmem:[%s5272_s19 + $0x8] sm:$0xff]  }
 0x584   : > { %v1967_v10 = vpop.permute.xlu1 %1966  ;;  %v3677_v15 = vld [vmem:[%s5272_s19] sm:$0xff]  }
 0x585   : > { %v1972_v6 = vpop.permute.xlu0 %1971  ;;  %2968 = vmatprep.subr.bf16.mxu0 %v2937_v21  ;;  %v2034_v13 = vadd.f32 %v5450_v33, %v1967_v10  ;;  %v2036_v2 = vadd.f32 %v5451_v29, %v1967_v10  ;;  %v810_v33 = vld [vmem:[%s5227_s2 + $0x18] sm:$0xff] }
 0x586   : > { %2969 = vmatpush1.bf16.msra.mxu0 %v2936_v30  ;;  %2994 = vxpose.xlu0.b32.end [4/4] (short) (narrow) %v2901_v1, 32  ;;  %v2040_v27 = vadd.f32 %v5452_v31, %v1972_v6  ;;  %v2042_v40 = vadd.f32 %v5453_v44, %v1972_v6  ;;  %v808_v1 = vld [vmem:[%s5227_s2 + $0x8] sm:$0xff] }
 0x587   : > { %v3025_v54 = vpack.c.bf16 %v2034_v13, %v2030_v42  ;;  %v3026_v61 = vpack.c.bf16 %v2036_v2, %v2032_v25  ;;  %v809_v42 = vld [vmem:[%s5227_s2 + $0x10] sm:$0xff] }
 0x588   : > { %v1977_v45 = vpop.permute.xlu1 %1976 }
 0x589   : > { %2971 = vmatmul.mubr.bf16.vlgmr.msra.gmra.mrb[40].mxu0 %v2902_v9  ;;  %v2044_v14 = vadd.f32 %v5454_v63, %v1977_v45  ;;  %v2046_v38 = vadd.f32 %v5455_v60, %v1977_v45  ;;  %3035 = vmatprep.subr.bf16.mxu0 %v3026_v61 }
 0x58a   : > { %2980 = vmatprep.mubr.bf16.mxu0 %v2905_v0  ;;  %3036 = vmatpush1.bf16.msra.mxu0 %v3025_v54  ;;  %v807_v0 = vld [vmem:[%s5227_s2] sm:$0xff] }
 0x58b   : > { %v3027_v16 = vpack.c.bf16 %v2044_v14, %v2040_v27  ;;  %v3028_v28 = vpack.c.bf16 %v2046_v38, %v2042_v40  ;;  %v811_v27 = vld [vmem:[%s5227_s2 + $0x20] sm:$0xff]  ;;  %v812_v40 = vld [vmem:[%s5227_s2 + $0x28] sm:$0xff]  ;;  %v813_v38 = vld [vmem:[%s5227_s2 + $0x30] sm:$0xff] }
 0x58c   : > { %v3249_v32 = vpop.permute.xlu1 %3248 }
 0x58d   : > { %3037 = vmatprep.subr.bf16.mxu0 %v3028_v28 }
 0x58e   : > { %3038 = vmatpush1.bf16.msra.mxu0 %v3027_v16 }
 0x591   : > { %2981 = vmatmul.mubr.bf16.gmra.mrb[44].mxu0 %v2904_v62  ;;  %v3254_v62 = vpop.permute.xlu1 %3253 }
 0x592   : > { %3067 = vmatprep.mubr.bf16.mxu0 %v5456_v39 }
 0x595   : > { %v3259_v29 = vpop.permute.xlu1 %3258 }
 0x599   : > { %v3264_v14 = vpop.permute.xlu1 %3263 }
 0x5fa   : > { %v3007_v8 = vpop.trf.xlu0 }
 0x5fe   : > { %v3008_v11 = vpop.trf.xlu0 }
 0x5ff   : > { %v3023_v23 = vpack.c.bf16 %v3008_v11, %v3007_v8  ;;  %v814_v8 = vld [vmem:[%s5227_s2 + $0x38] sm:$0xff] }
 0x601   : > { %3464 = vmatmul.mubr.msk.bf16.vlgmr.msra.gmra.mrb[48].mxu0 %vm1258_vm5, %v3023_v23 }
 0x602   : > { %v3009_v43 = vpop.trf.xlu0  ;;  %3077 = vmatprep.mubr.bf16.mxu0 %v5456_v39 }
 0x606   : > { %v3010_v41 = vpop.trf.xlu0 }
 0x607   : > { %v3024_v53 = vpack.c.bf16 %v3010_v41, %v3009_v43 }
 0x609   : > { %3465 = vmatmul.mubr.msk.bf16.gmra.mrb[52].mxu0 %vm1258_vm5, %v3024_v53 }
 0x60a   : > { %3152 = vmatprep.mubr.bf16.mxu0 %v5456_v39 }
 0x65c   : > { %v2972_v4 = vpop.f32.mrb[40].mxu0 }
 0x65d   : > { %v2974_v24 = vpop.f32.mrb[41].mxu0 }
 0x65e   : > { %v2976_v34 = vpop.f32.mrb[42].mxu0 }
 0x65f   : > { %v3092_v22 = vpack.c.bf16 %v2976_v34, %v2972_v4  ;;  %v2978_v58 = vpop.f32.mrb[43].mxu0 }
 0x660   : > { %v3093_v20 = vpack.c.bf16 %v2978_v58, %v2974_v24 }
 0x664   : > { %v2982_v57 = vpop.f32.mrb[44].mxu0 }
 0x665   : > { %v2984_v46 = vpop.f32.mrb[45].mxu0 }
 0x666   : > { %v2986_v55 = vpop.f32.mrb[46].mxu0 }
 0x667   : > { %v3094_v36 = vpack.c.bf16 %v2986_v55, %v2982_v57  ;;  %v2988_v49 = vpop.f32.mrb[47].mxu0 }
 0x668   : > { %v3095_v35 = vpack.c.bf16 %v2988_v49, %v2984_v46 }
 0x6d4   : > { %v3069_v26 = vpop.f32.mrb[48].mxu0 }
 0x6d5   : > { %v3071_v48 = vpop.f32.mrb[49].mxu0 }
 0x6d6   : > { %v3073_v19 = vpop.f32.mrb[50].mxu0 }
 0x6d7   : > { %v3100_v7 = vpack.c.bf16 %v3073_v19, %v3069_v26  ;;  %v3075_v9 = vpop.f32.mrb[51].mxu0 }
 0x6d8   : > { %v3101_v12 = vpack.c.bf16 %v3075_v9, %v3071_v48 }
 0x6da   : > { %3120 = vmatprep.subr.bf16.mxu0 %v3101_v12 }
 0x6db   : > { %3121 = vmatpush1.bf16.msra.mxu0 %v3100_v7 }
 0x6dc   : > { %v3079_v50 = vpop.f32.mrb[52].mxu0 }
 0x6dd   : > { %v3081_v3 = vpop.f32.mrb[53].mxu0 }
 0x6de   : > { %v3083_v47 = vpop.f32.mrb[54].mxu0 }
 0x6df   : > { %v3102_v56 = vpack.c.bf16 %v3083_v47, %v3079_v50  ;;  %v3085_v52 = vpop.f32.mrb[55].mxu0 }
 0x6e0   : > { %v3103_v51 = vpack.c.bf16 %v3085_v52, %v3081_v3 }
 0x6e2   : > { %3122 = vmatprep.subr.bf16.mxu0 %v3103_v51 }
 0x6e3   : > { %3123 = vmatpush1.bf16.msra.mxu0 %v3102_v56 }
 0x6e4   : > { %3189 = vmatprep.subr.bf16.mxu0 %v3093_v20 }
 0x6e6   : > { %3468 = vmatmul.mubr.msk.bf16.vlgmr.msra.gmra.mrb[56].mxu0 %vm1258_vm5, %v3675_v37 }
 0x6e7   : > { %3190 = vmatpush1.bf16.msra.mxu0 %v3092_v22  ;;  %3162 = vmatprep.mubr.bf16.mxu0 %v5456_v39 }
 0x6e8   : > { %3191 = vmatprep.subr.bf16.mxu0 %v3095_v35 }
 0x6eb   : > { %3192 = vmatpush1.bf16.msra.mxu0 %v3094_v36 }
 0x6ee   : > { %3469 = vmatmul.mubr.msk.bf16.gmra.mrb[60].mxu0 %vm1258_vm5, %v3676_v17 }
 0x6ef   : > { %3221 = vmatprep.mubr.bf16.mxu0 %v5456_v39 }
 0x6f6   : > { %3472 = vmatmul.mubr.msk.bf16.vlgmr.msra.gmra.mrb[56].mxu0 %vm1258_vm5, %v3677_v15 }
 0x6f7   : > { %3231 = vmatprep.mubr.bf16.mxu0 %v5456_v39 }
 0x6fe   : > { %3473 = vmatmul.mubr.msk.bf16.gmra.mrb[60].mxu0 %vm1258_vm5, %v3678_v59 }
 0x7c9   : > { %v3223_v21 = vpop.f32.mrb[56].mxu0 }
 0x7ca   : > { %v3266_v30 = vadd.f32 %v3249_v32, %v3223_v21  ;;  %v3225_v10 = vpop.f32.mrb[57].mxu0 }
 0x7cb   : > { %v3267_v5 = vadd.f32 %v3249_v32, %v3225_v10  ;;  %v3227_v18 = vpop.f32.mrb[58].mxu0 }
 0x7cc   : > { %v3274_v25 = vadd.f32 %v3266_v30, %v807_v0  ;;  %v3268_v6 = vadd.f32 %v3254_v62, %v3227_v18  ;;  %v3229_v13 = vpop.f32.mrb[59].mxu0 }
 0x7cd   : > { %v3275_v2 = vadd.f32 %v3267_v5, %v808_v1  ;;  %v3269_v54 = vadd.f32 %v3254_v62, %v3229_v13 }
 0x7ce   : > { %3282 = vst [vmem:[%s5234_s0] sm:$0xff] %v3274_v25  ;;  %v3276_v61 = vadd.f32 %v3268_v6, %v809_v42 }
 0x7cf   : > { %3283 = vst [vmem:[%s5234_s0 + $0x8] sm:$0xff] %v3275_v2  ;;  %v3277_v31 = vadd.f32 %v3269_v54, %v810_v33 }
 0x7d0   : > { %3284 = vst [vmem:[%s5234_s0 + $0x10] sm:$0xff] %v3276_v61 }
 0x7d1   : > { %3285 = vst [vmem:[%s5234_s0 + $0x18] sm:$0xff] %v3277_v31  ;;  %v3233_v45 = vpop.f32.mrb[60].mxu0 }
 0x7d2   : > { %v3270_v44 = vadd.f32 %v3259_v29, %v3233_v45  ;;  %v3235_v63 = vpop.f32.mrb[61].mxu0 }
 0x7d3   : > { %v3271_v60 = vadd.f32 %v3259_v29, %v3235_v63  ;;  %v3237_v16 = vpop.f32.mrb[62].mxu0 }
 0x7d4   : > { %v3278_v28 = vadd.f32 %v3270_v44, %v811_v27  ;;  %v3272_v39 = vadd.f32 %v3264_v14, %v3237_v16  ;;  %v3239_v11 = vpop.f32.mrb[63].mxu0 }
 0x7d5   : > { %v3279_v23 = vadd.f32 %v3271_v60, %v812_v40  ;;  %v3273_v43 = vadd.f32 %v3264_v14, %v3239_v11 }
 0x7d6   : > { %3286 = vst [vmem:[%s5234_s0 + $0x20] sm:$0xff] %v3278_v28  ;;  %v3280_v41 = vadd.f32 %v3272_v39, %v813_v38 }
 0x7d7   : > { %3287 = vst [vmem:[%s5234_s0 + $0x28] sm:$0xff] %v3279_v23  ;;  %v3281_v53 = vadd.f32 %v3273_v43, %v814_v8 }
 0x7d8   : > { %3288 = vst [vmem:[%s5234_s0 + $0x30] sm:$0xff] %v3280_v41 }
 0x7d9   : > { %3289 = vst [vmem:[%s5234_s0 + $0x38] sm:$0xff] %v3281_v53 }
 0x7da PF: > { %s32_s3 = sadd.s32 1, %s3893_s3  }
 0x7db   : > { %p29_p4 = scmp.ge.s32.totalorder %s32_s3, 4  }
 0x7dd   :  { %31 = sbr.rel (!%p29_p4) target bundleno = 8 (0x8), region = 144 }

// kernel: rcu_forward.3
= control target key start
LH: loop header
LB: loop body
LE: loop exit
PB: predicated region body
PF: predicated region fallthrough
CT: control target
= control target key end

     0   :  { %s602_s17 = smov 0   ;;  %s725_s0 = inlined_call_operand.vmem [shape: f32[2,288,256], index: 0, kind: input, shape index: {}]   ;;  %s726_s1 = inlined_call_operand.vmem [shape: f32[2,1,256], index: 1, kind: input, shape index: {}]   ;;  %s727_s2 = inlined_call_operand.vmem [shape: bf16[1,288], index: 2, kind: input, shape index: {}]   ;;  %s728_s3 = inlined_call_operand.<no memory space> [shape: f32[1,1], index: 3, kind: input, shape index: {}]   ;;  %s729_s4 = inlined_call_operand.vmem [shape: f32[2,1,256], index: 4, kind: output, shape index: {}]  }
   0x1   :  { %v9_v0 = vstv %s728_s3 }
   0x2   :  { %10 = vst [vmem:[#allocation2] sm:$0x1] %v9_v0 }
   0x3 LB: > { %s538_s18 = sadd.s32 4294967295, %s570_s17   ;;  %p542_p0 = scmp.ge.s32.totalorder %s570_s17, 1  ;;  %s570_s17 = sphi %s602_s17, %s16_s17  }
   0x4   : > { %p173_p1 = scmp.lt.s32.totalorder %s570_s17, 3 }
   0x6   : > { %p174_p2 = pnand %p542_p0, %p173_p1 }
   0x7   : > { %p202_p3 = scmp.lt.s32.totalorder (!%p174_p2), %s538_s18, 1  ;;  %v337_v1 = vlaneseq (!%p174_p2)  ;;  %v572_v2 = vmov (!%p174_p2), 0   ;;  %v573_v4 = vmov (!%p174_p2), 1966171168   ;;  %vm351_vm0 = vcmask (!%p174_p2), 261120  }
   0x8   : > { %177 = sbr.rel (%p174_p2) target bundleno = 312 (0x138), region = 36  ;;  %428 = vmatprep.mubr.bf16.mxu0 (!%p174_p2), %v572_v2  ;;  %563 = vset.pattern.permute.xlu0 (!%p174_p2), %v572_v2  ;;  %v335_v5 = vunpack.c.l.s4 (!%p174_p2), %v573_v4  ;;  %v618_v7 = vld.sshfl [vmem:[%s727_s2] sm:$0x13 pattern:$0x75316420] (!%p174_p2) }
   0x9   : > { %v457_v3 = vld [vmem:[#allocation2] sm:$0x1] (!%p174_p2)  ;;  %v613_v6 = vshrl.u32 (!%p174_p2), %v337_v1, 7  ;;  %v333_v9 = vcombine.high (!%p174_p2), %v618_v7, %v618_v7  ;;  %vm470_vm1 = vcmp.lt.s32.totalorder (!%p174_p2), %v337_v1, 256 }
   0xa   : > { %460 = vperm.xlu0 (!%p174_p2), %563, %v457_v3   ;;  %v336_v8 = vunpack.c.0.s8 (!%p174_p2), %v335_v5 }
   0xc   : > { %v629_v10 = vsub.s32 (!%p174_p2), %v336_v8, %v613_v6 }
   0xe   : > { %v347_v18 = vrot.slane (!%p174_p2), %v333_v9, %v629_v10  ;;  %v672_v3 = vrot.slane (!%p174_p2), %v618_v7, %v629_v10 }
   0xf   : > { %s731_s18 = smov (!%p202_p3, %s538_s18), 1 }
  0x10   : > { %s552_s20 = smul.u32 576, %s731_s18  ;;  %387 = vmatprep.mubr.bf16.mxu1 %v347_v18  ;;  %s544_s24 = sshll.u32 %s731_s18, 1 }
  0x11   : > { %s210_s27 = scalar_lea.vmem %s726_s1, %s544_s24  ;;  %s214_s30 = scalar_lea.vmem %s729_s4, %s544_s24 }
  0x12   : > { %s626_s23 = scalar_lea.vmem %s725_s0, %s552_s20 }
  0x13   : > { %v218_v11 = vld [vmem:[%s626_s23 + $0x8] sm:$0xff]  ;;  %v220_v12 = vld [vmem:[%s626_s23 + $0x18] sm:$0xff]  ;;  %v217_v13 = vld [vmem:[%s626_s23] sm:$0xff] }
  0x14   : > { %v290_v14 = vpack.c.bf16 %v220_v12, %v218_v11  ;;  %v219_v15 = vld [vmem:[%s626_s23 + $0x10] sm:$0xff]  ;;  %v222_v16 = vld [vmem:[%s626_s23 + $0x28] sm:$0xff]  ;;  %v224_v17 = vld [vmem:[%s626_s23 + $0x38] sm:$0xff] }
  0x15   : > { %v289_v19 = vpack.c.bf16 %v219_v15, %v217_v13  ;;  %v292_v20 = vpack.c.bf16 %v224_v17, %v222_v16  ;;  %v221_v21 = vld [vmem:[%s626_s23 + $0x20] sm:$0xff]  ;;  %v223_v22 = vld [vmem:[%s626_s23 + $0x30] sm:$0xff]  ;;  %v226_v23 = vld [vmem:[%s626_s23 + $0x48] sm:$0xff] }
  0x16   : > { %355 = vmatprep.subr.bf16.mxu1 %v290_v14  ;;  %v228_v24 = vld [vmem:[%s626_s23 + $0x58] sm:$0xff]  ;;  %v291_v25 = vpack.c.bf16 %v223_v22, %v221_v21  ;;  %v225_v27 = vld [vmem:[%s626_s23 + $0x40] sm:$0xff]  ;;  %v227_v28 = vld [vmem:[%s626_s23 + $0x50] sm:$0xff]  ;;  %v348_v14 = vcombine.high %v672_v3, %v672_v3 }
  0x17   : > { %356 = vmatpush1.bf16.msra.mxu1 %v289_v19  ;;  %v294_v26 = vpack.c.bf16 %v228_v24, %v226_v23  ;;  %v230_v29 = vld [vmem:[%s626_s23 + $0x68] sm:$0xff]  ;;  %v232_v30 = vld [vmem:[%s626_s23 + $0x78] sm:$0xff]  ;;  %v293_v31 = vpack.c.bf16 %v227_v28, %v225_v27  ;;  %v229_v33 = vld [vmem:[%s626_s23 + $0x60] sm:$0xff] }
  0x18   : > { %357 = vmatprep.subr.bf16.mxu1 %v292_v20  ;;  %v296_v32 = vpack.c.bf16 %v232_v30, %v230_v29  ;;  %v231_v34 = vld [vmem:[%s626_s23 + $0x70] sm:$0xff]  ;;  %v234_v35 = vld [vmem:[%s626_s23 + $0x88] sm:$0xff]  ;;  %v236_v36 = vld [vmem:[%s626_s23 + $0x98] sm:$0xff] }
  0x19   : > { %v295_v37 = vpack.c.bf16 %v231_v34, %v229_v33  ;;  %v298_v38 = vpack.c.bf16 %v236_v36, %v234_v35  ;;  %v233_v39 = vld [vmem:[%s626_s23 + $0x80] sm:$0xff]  ;;  %v235_v40 = vld [vmem:[%s626_s23 + $0x90] sm:$0xff]  ;;  %v238_v41 = vld [vmem:[%s626_s23 + $0xa8] sm:$0xff] }
  0x1a   : > { %v240_v42 = vld [vmem:[%s626_s23 + $0xb8] sm:$0xff]  ;;  %v297_v43 = vpack.c.bf16 %v235_v40, %v233_v39  ;;  %v237_v45 = vld [vmem:[%s626_s23 + $0xa0] sm:$0xff]  ;;  %v239_v46 = vld [vmem:[%s626_s23 + $0xb0] sm:$0xff] }
  0x1b   : > { %358 = vmatpush1.bf16.msra.mxu1 %v291_v25  ;;  %v300_v44 = vpack.c.bf16 %v240_v42, %v238_v41  ;;  %v242_v47 = vld [vmem:[%s626_s23 + $0xc8] sm:$0xff]  ;;  %v244_v48 = vld [vmem:[%s626_s23 + $0xd8] sm:$0xff]  ;;  %v281_v51 = vld [vmem:[%s626_s23 + $0x200] sm:$0xff]  ;;  %v299_v53 = vpack.c.bf16 %v239_v46, %v237_v45 }
  0x1c   : > { %359 = vmatprep.subr.bf16.mxu1 %v294_v26  ;;  %v282_v49 = vld [vmem:[%s626_s23 + $0x208] sm:$0xff]  ;;  %v284_v50 = vld [vmem:[%s626_s23 + $0x218] sm:$0xff]  ;;  %v283_v52 = vld [vmem:[%s626_s23 + $0x210] sm:$0xff]  ;;  %v302_v58 = vpack.c.bf16 %v244_v48, %v242_v47 }
  0x1d   : > { %v241_v54 = vld [vmem:[%s626_s23 + $0xc0] sm:$0xff]  ;;  %v243_v55 = vld [vmem:[%s626_s23 + $0xd0] sm:$0xff]  ;;  %v322_v56 = vpack.c.bf16 %v284_v50, %v282_v49  ;;  %v321_v57 = vpack.c.bf16 %v283_v52, %v281_v51  ;;  %v246_v59 = vld [vmem:[%s626_s23 + $0xe8] sm:$0xff] }
  0x1e   : > { %v286_v60 = vld [vmem:[%s626_s23 + $0x228] sm:$0xff]  ;;  %v288_v61 = vld [vmem:[%s626_s23 + $0x238] sm:$0xff]  ;;  %v285_v0 = vld [vmem:[%s626_s23 + $0x220] sm:$0xff]  ;;  %v301_v5 = vpack.c.bf16 %v243_v55, %v241_v54 }
  0x1f   : > { %360 = vmatpush1.bf16.msra.mxu1 %v293_v31  ;;  %v248_v62 = vld [vmem:[%s626_s23 + $0xf8] sm:$0xff]  ;;  %396 = vmatprep.subr.bf16.mxu0 %v322_v56  ;;  %v324_v63 = vpack.c.bf16 %v288_v61, %v286_v60  ;;  %v287_v2 = vld [vmem:[%s626_s23 + $0x230] sm:$0xff]  ;;  %v245_v9 = vld [vmem:[%s626_s23 + $0xe0] sm:$0xff] }
  0x20   : > { %361 = vmatprep.subr.bf16.mxu1 %v296_v32  ;;  %397 = vmatpush1.bf16.msra.mxu0 %v321_v57  ;;  %v323_v4 = vpack.c.bf16 %v287_v2, %v285_v0  ;;  %v304_v8 = vpack.c.bf16 %v248_v62, %v246_v59  ;;  %v247_v11 = vld [vmem:[%s626_s23 + $0xf0] sm:$0xff]  ;;  %v250_v12 = vld [vmem:[%s626_s23 + $0x108] sm:$0xff]  ;;  %v252_v13 = vld [vmem:[%s626_s23 + $0x118] sm:$0xff] }
  0x21   : > { %398 = vmatprep.subr.bf16.mxu0 %v324_v63  ;;  %v303_v7 = vpack.c.bf16 %v247_v11, %v245_v9  ;;  %v306_v15 = vpack.c.bf16 %v252_v13, %v250_v12  ;;  %v249_v16 = vld [vmem:[%s626_s23 + $0x100] sm:$0xff]  ;;  %v251_v17 = vld [vmem:[%s626_s23 + $0x110] sm:$0xff]  ;;  %v254_v18 = vld [vmem:[%s626_s23 + $0x128] sm:$0xff]  ;;  %v465_v13 = vsub.s32 0, %v613_v6 }
  0x22   : > { %v256_v19 = vld [vmem:[%s626_s23 + $0x138] sm:$0xff]  ;;  %v305_v20 = vpack.c.bf16 %v251_v17, %v249_v16  ;;  %v253_v22 = vld [vmem:[%s626_s23 + $0x120] sm:$0xff]  ;;  %v255_v23 = vld [vmem:[%s626_s23 + $0x130] sm:$0xff] }
  0x23   : > { %362 = vmatpush1.bf16.msra.mxu1 %v295_v37  ;;  %v308_v21 = vpack.c.bf16 %v256_v19, %v254_v18  ;;  %v258_v24 = vld [vmem:[%s626_s23 + $0x148] sm:$0xff]  ;;  %v260_v25 = vld [vmem:[%s626_s23 + $0x158] sm:$0xff]  ;;  %v307_v26 = vpack.c.bf16 %v255_v23, %v253_v22  ;;  %v257_v28 = vld [vmem:[%s626_s23 + $0x140] sm:$0xff] }
  0x24   : > { %363 = vmatprep.subr.bf16.mxu1 %v298_v38  ;;  %399 = vmatpush1.bf16.msra.mxu0 %v323_v4  ;;  %v310_v27 = vpack.c.bf16 %v260_v25, %v258_v24  ;;  %v259_v29 = vld [vmem:[%s626_s23 + $0x150] sm:$0xff]  ;;  %v262_v30 = vld [vmem:[%s626_s23 + $0x168] sm:$0xff]  ;;  %v264_v31 = vld [vmem:[%s626_s23 + $0x178] sm:$0xff] }
  0x25   : > { %v309_v32 = vpack.c.bf16 %v259_v29, %v257_v28  ;;  %v312_v33 = vpack.c.bf16 %v264_v31, %v262_v30  ;;  %v261_v34 = vld [vmem:[%s626_s23 + $0x160] sm:$0xff]  ;;  %v263_v35 = vld [vmem:[%s626_s23 + $0x170] sm:$0xff]  ;;  %v266_v36 = vld [vmem:[%s626_s23 + $0x188] sm:$0xff] }
  0x26   : > { %v268_v37 = vld [vmem:[%s626_s23 + $0x198] sm:$0xff]  ;;  %v311_v38 = vpack.c.bf16 %v263_v35, %v261_v34  ;;  %v265_v40 = vld [vmem:[%s626_s23 + $0x180] sm:$0xff]  ;;  %v267_v41 = vld [vmem:[%s626_s23 + $0x190] sm:$0xff] }
  0x27   : > { %364 = vmatpush1.bf16.msra.mxu1 %v297_v43  ;;  %547 = vmatmul.mubr.msk.bf16.vlgmr.msra.gmra.mrb[0].mxu0 %vm351_vm0, %v348_v14  ;;  %v314_v39 = vpack.c.bf16 %v268_v37, %v266_v36  ;;  %v270_v42 = vld [vmem:[%s626_s23 + $0x1a8] sm:$0xff]  ;;  %v272_v43 = vld [vmem:[%s626_s23 + $0x1b8] sm:$0xff]  ;;  %v269_v46 = vld [vmem:[%s626_s23 + $0x1a0] sm:$0xff] }
  0x28   : > { %365 = vmatprep.subr.bf16.mxu1 %v300_v44  ;;  %v313_v44 = vpack.c.bf16 %v267_v41, %v265_v40  ;;  %v316_v45 = vpack.c.bf16 %v272_v43, %v270_v42  ;;  %v271_v47 = vld [vmem:[%s626_s23 + $0x1b0] sm:$0xff]  ;;  %v274_v48 = vld [vmem:[%s626_s23 + $0x1c8] sm:$0xff]  ;;  %v276_v49 = vld [vmem:[%s626_s23 + $0x1d8] sm:$0xff] }
  0x29   : > { %v315_v50 = vpack.c.bf16 %v271_v47, %v269_v46  ;;  %v318_v51 = vpack.c.bf16 %v276_v49, %v274_v48  ;;  %v273_v52 = vld [vmem:[%s626_s23 + $0x1c0] sm:$0xff]  ;;  %v278_v54 = vld [vmem:[%s626_s23 + $0x1e8] sm:$0xff]  ;;  %v280_v55 = vld [vmem:[%s626_s23 + $0x1f8] sm:$0xff] }
  0x2a   : > { %v320_v57 = vpack.c.bf16 %v280_v55, %v278_v54  ;;  %v279_v59 = vld [vmem:[%s626_s23 + $0x1f0] sm:$0xff] }
  0x2b   : > { %366 = vmatpush1.bf16.msra.mxu1 %v299_v53  ;;  %v275_v53 = vld [vmem:[%s626_s23 + $0x1d0] sm:$0xff] }
  0x2c   : > { %367 = vmatprep.subr.bf16.mxu1 %v302_v58  ;;  %v317_v56 = vpack.c.bf16 %v275_v53, %v273_v52  ;;  %v277_v58 = vld [vmem:[%s626_s23 + $0x1e0] sm:$0xff] }
  0x2d   : > { %v319_v60 = vpack.c.bf16 %v279_v59, %v277_v58 }
  0x2f   : > { %368 = vmatpush1.bf16.msra.mxu1 %v301_v5 }
  0x30   : > { %369 = vmatprep.subr.bf16.mxu1 %v304_v8 }
  0x33   : > { %370 = vmatpush1.bf16.msra.mxu1 %v303_v7  ;;  %v437_v7 = vld [vmem:[%s210_s27] sm:$0x3] }
  0x34   : > { %371 = vmatprep.subr.bf16.mxu1 %v306_v15 }
  0x37   : > { %372 = vmatpush1.bf16.msra.mxu1 %v305_v20 }
  0x38   : > { %373 = vmatprep.subr.bf16.mxu1 %v308_v21 }
  0x3b   : > { %374 = vmatpush1.bf16.msra.mxu1 %v307_v26 }
  0x3c   : > { %375 = vmatprep.subr.bf16.mxu1 %v310_v27 }
  0x3f   : > { %376 = vmatpush1.bf16.msra.mxu1 %v309_v32 }
  0x40   : > { %377 = vmatprep.subr.bf16.mxu1 %v312_v33 }
  0x43   : > { %378 = vmatpush1.bf16.msra.mxu1 %v311_v38 }
  0x44   : > { %379 = vmatprep.subr.bf16.mxu1 %v314_v39 }
  0x47   : > { %380 = vmatpush1.bf16.msra.mxu1 %v313_v44 }
  0x48   : > { %381 = vmatprep.subr.bf16.mxu1 %v316_v45 }
  0x4b   : > { %382 = vmatpush1.bf16.msra.mxu1 %v315_v50 }
  0x4c   : > { %383 = vmatprep.subr.bf16.mxu1 %v318_v51 }
  0x4f   : > { %384 = vmatpush1.bf16.msra.mxu1 %v317_v56 }
  0x50   : > { %385 = vmatprep.subr.bf16.mxu1 %v320_v57 }
  0x53   : > { %386 = vmatpush1.bf16.msra.mxu1 %v319_v60 }
  0x56   : > { %388 = vmatmul.mubr.bf16.vlgmr.msra.gmra.mrb[0].mxu1 %v672_v3 }
  0x89   : > { %v461_v14 = vpop.permute.xlu0 %460 }
  0x8a   : > { %v466_v16 = vrot.slane %v461_v14, %v465_v13 }
  0xfa   : > { %v430_v61 = vpop.f32.mrb[0].mxu0 }
  0xfb   : > { %v432_v62 = vpop.f32.mrb[1].mxu0 }
  0xfc   : > { %v434_v63 = vpop.f32.mrb[2].mxu0 }
  0xfd   : > { %v435_v0 = vpop.f32.mrb[3].mxu0 }
 0x129   : > { %v389_v2 = vpop.f32.mrb[0].mxu1 }
 0x12a   : > { %v431_v4 = vadd.f32 %v430_v61, %v389_v2  ;;  %v391_v5 = vpop.f32.mrb[1].mxu1 }
 0x12b   : > { %v433_v8 = vadd.f32 %v432_v62, %v391_v5  ;;  %v393_v9 = vpop.f32.mrb[2].mxu1 }
 0x12c   : > { %v394_v11 = vpop.f32.mrb[3].mxu1 }
 0x12d   : > { %v440_v12 = vcombine.low %v431_v4, %v433_v8 }
 0x12f   : > { %v447_v3 = vrot.slane %v440_v12, %v629_v10 }
 0x131   : > { %v454_v15 = vrot.slane %v447_v3, %v629_v10 }
 0x133   : > { %v456_v17 = vadd.f32 %v454_v15, %v437_v7 }
 0x135   : > { %v467_v18 = vadd.f32 %v466_v16, %v456_v17 }
 0x137   : > { %472 = vst.msk [vmem:[%s214_s30] sm:$0x3] %vm470_vm1, %v467_v18 }
 0x138 PF: > { %s16_s17 = sadd.s32 1, %s570_s17  }
 0x139   : > { %p13_p4 = scmp.ge.s32.totalorder %s16_s17, 4  }
 0x13b   :  { %15 = sbr.rel (!%p13_p4) target bundleno = 3 (0x3), region = 69 }

</bundles_post_ra>
